<compile_context>
chip_gen: v7x
topology: tpu7x:2x2x1
jax: 0.10.0
libtpu: 0.0.40
codegen_flags: <defaults>
</compile_context>

<pallas_src>
import jax
import jax.numpy as jnp
from jax.experimental import pallas as pl
from jax.experimental.pallas import tpu as pltpu


# ----------------------------------------------------------------------------
# Scaled-down dims (multiples of 128; hidden dims multiples of 256 for the
# 256-wide MXU on v6e/v7x).
# Original module: dim1 -> 8000 -> 6000 -> 4096 -> 2*2048 ; decoder mirrors it.
# ----------------------------------------------------------------------------
DIM1 = 256
H1, H2, H3 = 512, 512, 256
LATENT = 128

BATCH_TILE = 128  # rows per grid step; >=128 fills the MXU M dimension


# ----------------------------------------------------------------------------
# Fused Pallas kernel: whole VAE forward for one batch tile.
# ----------------------------------------------------------------------------
def _vae_fused_kernel(
    x_ref, eps_ref,
    we0, be0, we1, be1, we2, be2, we3, be3,      # encoder params (W: (in,out) bf16, b: (1,out) f32)
    wd0, bd0, wd1, bd1, wd2, bd2, wd3, bd3,      # decoder params
    recon_ref, mu_ref, logvar_ref,               # outputs (f32)
):
    def dense_relu(h, w_ref, b_ref):
        # bf16 inputs on the MXU, f32 accumulation; epilogue stays f32 (VPU).
        y = jnp.dot(h.astype(jnp.bfloat16), w_ref[...],
                    preferred_element_type=jnp.float32) + b_ref[...]
        return jnp.maximum(y, 0.0)

    # ---- encoder (Dropout = identity in eval mode) ----
    h = x_ref[...]
    h = dense_relu(h, we0, be0)
    h = dense_relu(h, we1, be1)
    h = dense_relu(h, we2, be2)
    y = dense_relu(h, we3, be3)           # (TB, 2*LATENT); ReLU as in the module

    # ---- torch.chunk(y, 2, dim=1) + reparameterize, fused in the epilogue ----
    mu = y[:, :LATENT]
    logvar = y[:, LATENT:]
    mu_ref[...] = mu
    logvar_ref[...] = logvar
    z = mu + eps_ref[...] * jnp.exp(0.5 * logvar)   # f32 on VPU/EUP

    # ---- decoder ----
    h = dense_relu(z, wd0, bd0)
    h = dense_relu(h, wd1, bd1)
    h = dense_relu(h, wd2, bd2)
    h = dense_relu(h, wd3, bd3)
    recon_ref[...] = h


def vae_forward(params, x, eps, *, batch_tile=BATCH_TILE):
    """Forward pass: returns (x_recon, mu, logvar). Dropout = identity (eval)."""
    B = x.shape[0]
    assert B % batch_tile == 0, "batch must be a multiple of the batch tile"
    grid = (B // batch_tile,)

    # Flatten params. Weights are bf16 (in,out); biases reshaped to (1, N) f32
    # so every VMEM operand is 2D.  Constant index_maps -> one DMA, resident
    # across all batch tiles.
    flat = []
    flat_specs = []
    for (w, b) in params["enc"] + params["dec"]:
        b2 = b.reshape(1, -1)
        flat += [w, b2]
        flat_specs += [
            pl.BlockSpec(w.shape, lambda i: (0, 0)),
            pl.BlockSpec(b2.shape, lambda i: (0, 0)),
        ]

    in_specs = [
        pl.BlockSpec((batch_tile, DIM1), lambda i: (i, 0)),     # x tile
        pl.BlockSpec((batch_tile, LATENT), lambda i: (i, 0)),   # eps tile
    ] + flat_specs

    out_specs = (
        pl.BlockSpec((batch_tile, DIM1), lambda i: (i, 0)),     # x_recon
        pl.BlockSpec((batch_tile, LATENT), lambda i: (i, 0)),   # mu
        pl.BlockSpec((batch_tile, LATENT), lambda i: (i, 0)),   # logvar
    )

    return pl.pallas_call(
        _vae_fused_kernel,
        out_shape=(
            jax.ShapeDtypeStruct((B, DIM1), jnp.float32),
            jax.ShapeDtypeStruct((B, LATENT), jnp.float32),
            jax.ShapeDtypeStruct((B, LATENT), jnp.float32),
        ),
        grid=grid,
        in_specs=in_specs,
        out_specs=out_specs,
        compiler_params=pltpu.CompilerParams(
            # Batch tiles are independent -> megacore sharding on v7x.
            dimension_semantics=("parallel",),
            # ~2.3 MB bf16 weights (x2 for pipeline buffers) + small tiles;
            # 32 MiB leaves ample headroom on v5e/v6e/v7x.
            vmem_limit_bytes=32 * 1024 * 1024,
        ),
    )(x, eps, *flat)


# ----------------------------------------------------------------------------
# Parameter init (shapes follow the nn.Linear layers; weights stored (in,out)
# = PyTorch weight.T, in bf16; biases f32).
# ----------------------------------------------------------------------------
def init_params(key):
    dims_enc = [(DIM1, H1), (H1, H2), (H2, H3), (H3, 2 * LATENT)]
    dims_dec = [(LATENT, H3), (H3, H2), (H2, H1), (H1, DIM1)]
    params = {"enc": [], "dec": []}
    for name, dims in (("enc", dims_enc), ("dec", dims_dec)):
        for (din, dout) in dims:
            key, kw, kb = jax.random.split(key, 3)
            w = (jax.random.normal(kw, (din, dout), jnp.float32)
                 * (1.0 / jnp.sqrt(din))).astype(jnp.bfloat16)
            b = (jax.random.normal(kb, (dout,), jnp.float32) * 0.01)
            params[name].append((w, b))
    return params


if __name__ == "__main__":
    key = jax.random.PRNGKey(0)
    kp, kx, ke = jax.random.split(key, 3)

    batch = 256  # 2 batch tiles of 128 -> both v7x TensorCores busy
    params = init_params(kp)
    x = jax.random.normal(kx, (batch, DIM1), jnp.float32)
    eps = jax.random.normal(ke, (batch, LATENT), jnp.float32)

    x_recon, mu, logvar = jax.block_until_ready(
        jax.jit(vae_forward)(params, x, eps)
    )

    assert x_recon.shape == (batch, DIM1)
    assert mu.shape == (batch, LATENT)
    assert logvar.shape == (batch, LATENT)
    assert x_recon.dtype == jnp.float32

    # sanity check vs. plain-JAX reference (same bf16-matmul / f32-accum math)
    def ref_forward(params, x, eps):
        def dense_relu(h, w, b):
            y = jnp.dot(h.astype(jnp.bfloat16), w,
                        preferred_element_type=jnp.float32) + b
            return jnp.maximum(y, 0.0)
        h = x
        for (w, b) in params["enc"]:
            h = dense_relu(h, w, b)
        mu, logvar = h[:, :LATENT], h[:, LATENT:]
        z = mu + eps * jnp.exp(0.5 * logvar)
        h = z
        for (w, b) in params["dec"]:
            h = dense_relu(h, w, b)
        return h, mu, logvar

    r_recon, r_mu, r_logvar = ref_forward(params, x, eps)
    assert jnp.allclose(mu, r_mu, atol=1e-2, rtol=1e-2)
    assert jnp.allclose(logvar, r_logvar, atol=1e-2, rtol=1e-2)
    assert jnp.allclose(x_recon, r_recon, atol=1e-2, rtol=1e-2)

    print("KERNEL_OK")
</pallas_src>

<mosaic_0001>
module attributes {stable_mosaic.version = 11 : i64} {
  func.func @_vae_fused_kernel(%arg0: i32, %arg1: memref<128x256xf32, #tpu.memory_space<vmem>>, %arg2: memref<128x128xf32, #tpu.memory_space<vmem>>, %arg3: memref<256x512xbf16, #tpu.memory_space<vmem>>, %arg4: memref<1x512xf32, #tpu.memory_space<vmem>>, %arg5: memref<512x512xbf16, #tpu.memory_space<vmem>>, %arg6: memref<1x512xf32, #tpu.memory_space<vmem>>, %arg7: memref<512x256xbf16, #tpu.memory_space<vmem>>, %arg8: memref<1x256xf32, #tpu.memory_space<vmem>>, %arg9: memref<256x256xbf16, #tpu.memory_space<vmem>>, %arg10: memref<1x256xf32, #tpu.memory_space<vmem>>, %arg11: memref<128x256xbf16, #tpu.memory_space<vmem>>, %arg12: memref<1x256xf32, #tpu.memory_space<vmem>>, %arg13: memref<256x512xbf16, #tpu.memory_space<vmem>>, %arg14: memref<1x512xf32, #tpu.memory_space<vmem>>, %arg15: memref<512x512xbf16, #tpu.memory_space<vmem>>, %arg16: memref<1x512xf32, #tpu.memory_space<vmem>>, %arg17: memref<512x256xbf16, #tpu.memory_space<vmem>>, %arg18: memref<1x256xf32, #tpu.memory_space<vmem>>, %arg19: memref<128x256xf32, #tpu.memory_space<vmem>>, %arg20: memref<128x128xf32, #tpu.memory_space<vmem>>, %arg21: memref<128x128xf32, #tpu.memory_space<vmem>>) attributes {dimension_semantics = [#tpu.dimension_semantics<parallel>], iteration_bounds = array<i64: 2>, scalar_prefetch = 0 : i64, scratch_operands = 0 : i64, tpu.core_type = #tpu.core_type<tc>, window_params = [{transform_indices = @transform_0, window_bounds = array<i64: 128, 256>}, {transform_indices = @transform_1, window_bounds = array<i64: 128, 128>}, {pipeline_mode = #tpu.pipeline_mode<synchronous>, transform_indices = @transform_2, window_bounds = array<i64: 256, 512>}, {pipeline_mode = #tpu.pipeline_mode<synchronous>, transform_indices = @transform_3, window_bounds = array<i64: 1, 512>}, {pipeline_mode = #tpu.pipeline_mode<synchronous>, transform_indices = @transform_4, window_bounds = array<i64: 512, 512>}, {pipeline_mode = #tpu.pipeline_mode<synchronous>, transform_indices = @transform_5, window_bounds = array<i64: 1, 512>}, {pipeline_mode = #tpu.pipeline_mode<synchronous>, transform_indices = @transform_6, window_bounds = array<i64: 512, 256>}, {pipeline_mode = #tpu.pipeline_mode<synchronous>, transform_indices = @transform_7, window_bounds = array<i64: 1, 256>}, {pipeline_mode = #tpu.pipeline_mode<synchronous>, transform_indices = @transform_8, window_bounds = array<i64: 256, 256>}, {pipeline_mode = #tpu.pipeline_mode<synchronous>, transform_indices = @transform_9, window_bounds = array<i64: 1, 256>}, {pipeline_mode = #tpu.pipeline_mode<synchronous>, transform_indices = @transform_10, window_bounds = array<i64: 128, 256>}, {pipeline_mode = #tpu.pipeline_mode<synchronous>, transform_indices = @transform_11, window_bounds = array<i64: 1, 256>}, {pipeline_mode = #tpu.pipeline_mode<synchronous>, transform_indices = @transform_12, window_bounds = array<i64: 256, 512>}, {pipeline_mode = #tpu.pipeline_mode<synchronous>, transform_indices = @transform_13, window_bounds = array<i64: 1, 512>}, {pipeline_mode = #tpu.pipeline_mode<synchronous>, transform_indices = @transform_14, window_bounds = array<i64: 512, 512>}, {pipeline_mode = #tpu.pipeline_mode<synchronous>, transform_indices = @transform_15, window_bounds = array<i64: 1, 512>}, {pipeline_mode = #tpu.pipeline_mode<synchronous>, transform_indices = @transform_16, window_bounds = array<i64: 512, 256>}, {pipeline_mode = #tpu.pipeline_mode<synchronous>, transform_indices = @transform_17, window_bounds = array<i64: 1, 256>}, {transform_indices = @transform_18, window_bounds = array<i64: 128, 256>}, {transform_indices = @transform_19, window_bounds = array<i64: 128, 128>}, {transform_indices = @transform_20, window_bounds = array<i64: 128, 128>}]} {
    %c0 = arith.constant 0 : index
    %c0_0 = arith.constant 0 : index
    %0 = vector.load %arg1[%c0, %c0_0] : memref<128x256xf32, #tpu.memory_space<vmem>>, vector<128x256xf32>
    %1 = arith.truncf %0 : vector<128x256xf32> to vector<128x256xbf16>
    %c0_1 = arith.constant 0 : index
    %c0_2 = arith.constant 0 : index
    %2 = vector.load %arg3[%c0_1, %c0_2] : memref<256x512xbf16, #tpu.memory_space<vmem>>, vector<256x512xbf16>
    %cst = arith.constant dense<0.000000e+00> : vector<128x512xf32>
    %3 = tpu.matmul %1, %2, %cst {dimension_numbers = #tpu.dot_dimension_numbers<[1], [0], [0], [1], [0, 0, 1, 1], [], []>} : vector<128x256xbf16>, vector<256x512xbf16>, vector<128x512xf32> -> vector<128x512xf32>
    %c0_3 = arith.constant 0 : index
    %c0_4 = arith.constant 0 : index
    %4 = vector.load %arg4[%c0_3, %c0_4] : memref<1x512xf32, #tpu.memory_space<vmem>>, vector<1x512xf32>
    %5 = vector.broadcast %4 : vector<1x512xf32> to vector<128x512xf32>
    %6 = arith.addf %3, %5 : vector<128x512xf32>
    %cst_5 = arith.constant 0.000000e+00 : f32
    %7 = vector.broadcast %cst_5 : f32 to vector<128x512xf32>
    %8 = arith.maximumf %6, %7 : vector<128x512xf32>
    %9 = arith.truncf %8 : vector<128x512xf32> to vector<128x512xbf16>
    %c0_6 = arith.constant 0 : index
    %c0_7 = arith.constant 0 : index
    %10 = vector.load %arg5[%c0_6, %c0_7] : memref<512x512xbf16, #tpu.memory_space<vmem>>, vector<512x512xbf16>
    %cst_8 = arith.constant dense<0.000000e+00> : vector<128x512xf32>
    %11 = tpu.matmul %9, %10, %cst_8 {dimension_numbers = #tpu.dot_dimension_numbers<[1], [0], [0], [1], [0, 0, 1, 1], [], []>} : vector<128x512xbf16>, vector<512x512xbf16>, vector<128x512xf32> -> vector<128x512xf32>
    %c0_9 = arith.constant 0 : index
    %c0_10 = arith.constant 0 : index
    %12 = vector.load %arg6[%c0_9, %c0_10] : memref<1x512xf32, #tpu.memory_space<vmem>>, vector<1x512xf32>
    %13 = vector.broadcast %12 : vector<1x512xf32> to vector<128x512xf32>
    %14 = arith.addf %11, %13 : vector<128x512xf32>
    %cst_11 = arith.constant 0.000000e+00 : f32
    %15 = vector.broadcast %cst_11 : f32 to vector<128x512xf32>
    %16 = arith.maximumf %14, %15 : vector<128x512xf32>
    %17 = arith.truncf %16 : vector<128x512xf32> to vector<128x512xbf16>
    %c0_12 = arith.constant 0 : index
    %c0_13 = arith.constant 0 : index
    %18 = vector.load %arg7[%c0_12, %c0_13] : memref<512x256xbf16, #tpu.memory_space<vmem>>, vector<512x256xbf16>
    %cst_14 = arith.constant dense<0.000000e+00> : vector<128x256xf32>
    %19 = tpu.matmul %17, %18, %cst_14 {dimension_numbers = #tpu.dot_dimension_numbers<[1], [0], [0], [1], [0, 0, 1, 1], [], []>} : vector<128x512xbf16>, vector<512x256xbf16>, vector<128x256xf32> -> vector<128x256xf32>
    %c0_15 = arith.constant 0 : index
    %c0_16 = arith.constant 0 : index
    %20 = vector.load %arg8[%c0_15, %c0_16] : memref<1x256xf32, #tpu.memory_space<vmem>>, vector<1x256xf32>
    %21 = vector.broadcast %20 : vector<1x256xf32> to vector<128x256xf32>
    %22 = arith.addf %19, %21 : vector<128x256xf32>
    %cst_17 = arith.constant 0.000000e+00 : f32
    %23 = vector.broadcast %cst_17 : f32 to vector<128x256xf32>
    %24 = arith.maximumf %22, %23 : vector<128x256xf32>
    %25 = arith.truncf %24 : vector<128x256xf32> to vector<128x256xbf16>
    %c0_18 = arith.constant 0 : index
    %c0_19 = arith.constant 0 : index
    %26 = vector.load %arg9[%c0_18, %c0_19] : memref<256x256xbf16, #tpu.memory_space<vmem>>, vector<256x256xbf16>
    %cst_20 = arith.constant dense<0.000000e+00> : vector<128x256xf32>
    %27 = tpu.matmul %25, %26, %cst_20 {dimension_numbers = #tpu.dot_dimension_numbers<[1], [0], [0], [1], [0, 0, 1, 1], [], []>} : vector<128x256xbf16>, vector<256x256xbf16>, vector<128x256xf32> -> vector<128x256xf32>
    %c0_21 = arith.constant 0 : index
    %c0_22 = arith.constant 0 : index
    %28 = vector.load %arg10[%c0_21, %c0_22] : memref<1x256xf32, #tpu.memory_space<vmem>>, vector<1x256xf32>
    %29 = vector.broadcast %28 : vector<1x256xf32> to vector<128x256xf32>
    %30 = arith.addf %27, %29 : vector<128x256xf32>
    %cst_23 = arith.constant 0.000000e+00 : f32
    %31 = vector.broadcast %cst_23 : f32 to vector<128x256xf32>
    %32 = arith.maximumf %30, %31 : vector<128x256xf32>
    %33 = vector.extract_strided_slice %32 {offsets = [0, 0], sizes = [128, 128], strides = [1, 1]} : vector<128x256xf32> to vector<128x128xf32>
    %34 = vector.extract_strided_slice %32 {offsets = [0, 128], sizes = [128, 128], strides = [1, 1]} : vector<128x256xf32> to vector<128x128xf32>
    %c0_24 = arith.constant 0 : index
    %c0_25 = arith.constant 0 : index
    %35 = vector.load %arg20[%c0_24, %c0_25] : memref<128x128xf32, #tpu.memory_space<vmem>>, vector<128x128xf32>
    tpu.vector_store %arg20[%c0_24, %c0_25], %33 {strides = array<i32>} : memref<128x128xf32, #tpu.memory_space<vmem>>, vector<128x128xf32>,
    %c0_26 = arith.constant 0 : index
    %c0_27 = arith.constant 0 : index
    %36 = vector.load %arg21[%c0_26, %c0_27] : memref<128x128xf32, #tpu.memory_space<vmem>>, vector<128x128xf32>
    tpu.vector_store %arg21[%c0_26, %c0_27], %34 {strides = array<i32>} : memref<128x128xf32, #tpu.memory_space<vmem>>, vector<128x128xf32>,
    %c0_28 = arith.constant 0 : index
    %c0_29 = arith.constant 0 : index
    %37 = vector.load %arg2[%c0_28, %c0_29] : memref<128x128xf32, #tpu.memory_space<vmem>>, vector<128x128xf32>
    %cst_30 = arith.constant 5.000000e-01 : f32
    %38 = vector.broadcast %cst_30 : f32 to vector<128x128xf32>
    %39 = arith.mulf %38, %34 : vector<128x128xf32>
    %40 = math.exp %39 : vector<128x128xf32>
    %41 = arith.mulf %37, %40 : vector<128x128xf32>
    %42 = arith.addf %33, %41 : vector<128x128xf32>
    %43 = arith.truncf %42 : vector<128x128xf32> to vector<128x128xbf16>
    %c0_31 = arith.constant 0 : index
    %c0_32 = arith.constant 0 : index
    %44 = vector.load %arg11[%c0_31, %c0_32] : memref<128x256xbf16, #tpu.memory_space<vmem>>, vector<128x256xbf16>
    %cst_33 = arith.constant dense<0.000000e+00> : vector<128x256xf32>
    %45 = tpu.matmul %43, %44, %cst_33 {dimension_numbers = #tpu.dot_dimension_numbers<[1], [0], [0], [1], [0, 0, 1, 1], [], []>} : vector<128x128xbf16>, vector<128x256xbf16>, vector<128x256xf32> -> vector<128x256xf32>
    %c0_34 = arith.constant 0 : index
    %c0_35 = arith.constant 0 : index
    %46 = vector.load %arg12[%c0_34, %c0_35] : memref<1x256xf32, #tpu.memory_space<vmem>>, vector<1x256xf32>
    %47 = vector.broadcast %46 : vector<1x256xf32> to vector<128x256xf32>
    %48 = arith.addf %45, %47 : vector<128x256xf32>
    %cst_36 = arith.constant 0.000000e+00 : f32
    %49 = vector.broadcast %cst_36 : f32 to vector<128x256xf32>
    %50 = arith.maximumf %48, %49 : vector<128x256xf32>
    %51 = arith.truncf %50 : vector<128x256xf32> to vector<128x256xbf16>
    %c0_37 = arith.constant 0 : index
    %c0_38 = arith.constant 0 : index
    %52 = vector.load %arg13[%c0_37, %c0_38] : memref<256x512xbf16, #tpu.memory_space<vmem>>, vector<256x512xbf16>
    %cst_39 = arith.constant dense<0.000000e+00> : vector<128x512xf32>
    %53 = tpu.matmul %51, %52, %cst_39 {dimension_numbers = #tpu.dot_dimension_numbers<[1], [0], [0], [1], [0, 0, 1, 1], [], []>} : vector<128x256xbf16>, vector<256x512xbf16>, vector<128x512xf32> -> vector<128x512xf32>
    %c0_40 = arith.constant 0 : index
    %c0_41 = arith.constant 0 : index
    %54 = vector.load %arg14[%c0_40, %c0_41] : memref<1x512xf32, #tpu.memory_space<vmem>>, vector<1x512xf32>
    %55 = vector.broadcast %54 : vector<1x512xf32> to vector<128x512xf32>
    %56 = arith.addf %53, %55 : vector<128x512xf32>
    %cst_42 = arith.constant 0.000000e+00 : f32
    %57 = vector.broadcast %cst_42 : f32 to vector<128x512xf32>
    %58 = arith.maximumf %56, %57 : vector<128x512xf32>
    %59 = arith.truncf %58 : vector<128x512xf32> to vector<128x512xbf16>
    %c0_43 = arith.constant 0 : index
    %c0_44 = arith.constant 0 : index
    %60 = vector.load %arg15[%c0_43, %c0_44] : memref<512x512xbf16, #tpu.memory_space<vmem>>, vector<512x512xbf16>
    %cst_45 = arith.constant dense<0.000000e+00> : vector<128x512xf32>
    %61 = tpu.matmul %59, %60, %cst_45 {dimension_numbers = #tpu.dot_dimension_numbers<[1], [0], [0], [1], [0, 0, 1, 1], [], []>} : vector<128x512xbf16>, vector<512x512xbf16>, vector<128x512xf32> -> vector<128x512xf32>
    %c0_46 = arith.constant 0 : index
    %c0_47 = arith.constant 0 : index
    %62 = vector.load %arg16[%c0_46, %c0_47] : memref<1x512xf32, #tpu.memory_space<vmem>>, vector<1x512xf32>
    %63 = vector.broadcast %62 : vector<1x512xf32> to vector<128x512xf32>
    %64 = arith.addf %61, %63 : vector<128x512xf32>
    %cst_48 = arith.constant 0.000000e+00 : f32
    %65 = vector.broadcast %cst_48 : f32 to vector<128x512xf32>
    %66 = arith.maximumf %64, %65 : vector<128x512xf32>
    %67 = arith.truncf %66 : vector<128x512xf32> to vector<128x512xbf16>
    %c0_49 = arith.constant 0 : index
    %c0_50 = arith.constant 0 : index
    %68 = vector.load %arg17[%c0_49, %c0_50] : memref<512x256xbf16, #tpu.memory_space<vmem>>, vector<512x256xbf16>
    %cst_51 = arith.constant dense<0.000000e+00> : vector<128x256xf32>
    %69 = tpu.matmul %67, %68, %cst_51 {dimension_numbers = #tpu.dot_dimension_numbers<[1], [0], [0], [1], [0, 0, 1, 1], [], []>} : vector<128x512xbf16>, vector<512x256xbf16>, vector<128x256xf32> -> vector<128x256xf32>
    %c0_52 = arith.constant 0 : index
    %c0_53 = arith.constant 0 : index
    %70 = vector.load %arg18[%c0_52, %c0_53] : memref<1x256xf32, #tpu.memory_space<vmem>>, vector<1x256xf32>
    %71 = vector.broadcast %70 : vector<1x256xf32> to vector<128x256xf32>
    %72 = arith.addf %69, %71 : vector<128x256xf32>
    %cst_54 = arith.constant 0.000000e+00 : f32
    %73 = vector.broadcast %cst_54 : f32 to vector<128x256xf32>
    %74 = arith.maximumf %72, %73 : vector<128x256xf32>
    %c0_55 = arith.constant 0 : index
    %c0_56 = arith.constant 0 : index
    %75 = vector.load %arg19[%c0_55, %c0_56] : memref<128x256xf32, #tpu.memory_space<vmem>>, vector<128x256xf32>
    tpu.vector_store %arg19[%c0_55, %c0_56], %74 {strides = array<i32>} : memref<128x256xf32, #tpu.memory_space<vmem>>, vector<128x256xf32>,
    return
  }
  func.func @transform_0(%arg0: i32) -> (i32, i32) {
    %c0_i32 = arith.constant 0 : i32
    %c0_i32_0 = arith.constant 0 : i32
    return %arg0, %c0_i32 : i32, i32
  }
  func.func @transform_1(%arg0: i32) -> (i32, i32) {
    %c0_i32 = arith.constant 0 : i32
    %c0_i32_0 = arith.constant 0 : i32
    return %arg0, %c0_i32 : i32, i32
  }
  func.func @transform_2(%arg0: i32) -> (i32, i32) {
    %c0_i32 = arith.constant 0 : i32
    %c0_i32_0 = arith.constant 0 : i32
    %c0_i32_1 = arith.constant 0 : i32
    return %c0_i32, %c0_i32_0 : i32, i32
  }
  func.func @transform_3(%arg0: i32) -> (i32, i32) {
    %c0_i32 = arith.constant 0 : i32
    %c0_i32_0 = arith.constant 0 : i32
    %c0_i32_1 = arith.constant 0 : i32
    return %c0_i32, %c0_i32_0 : i32, i32
  }
  func.func @transform_4(%arg0: i32) -> (i32, i32) {
    %c0_i32 = arith.constant 0 : i32
    %c0_i32_0 = arith.constant 0 : i32
    %c0_i32_1 = arith.constant 0 : i32
    return %c0_i32, %c0_i32_0 : i32, i32
  }
  func.func @transform_5(%arg0: i32) -> (i32, i32) {
    %c0_i32 = arith.constant 0 : i32
    %c0_i32_0 = arith.constant 0 : i32
    %c0_i32_1 = arith.constant 0 : i32
    return %c0_i32, %c0_i32_0 : i32, i32
  }
  func.func @transform_6(%arg0: i32) -> (i32, i32) {
    %c0_i32 = arith.constant 0 : i32
    %c0_i32_0 = arith.constant 0 : i32
    %c0_i32_1 = arith.constant 0 : i32
    return %c0_i32, %c0_i32_0 : i32, i32
  }
  func.func @transform_7(%arg0: i32) -> (i32, i32) {
    %c0_i32 = arith.constant 0 : i32
    %c0_i32_0 = arith.constant 0 : i32
    %c0_i32_1 = arith.constant 0 : i32
    return %c0_i32, %c0_i32_0 : i32, i32
  }
  func.func @transform_8(%arg0: i32) -> (i32, i32) {
    %c0_i32 = arith.constant 0 : i32
    %c0_i32_0 = arith.constant 0 : i32
    %c0_i32_1 = arith.constant 0 : i32
    return %c0_i32, %c0_i32_0 : i32, i32
  }
  func.func @transform_9(%arg0: i32) -> (i32, i32) {
    %c0_i32 = arith.constant 0 : i32
    %c0_i32_0 = arith.constant 0 : i32
    %c0_i32_1 = arith.constant 0 : i32
    return %c0_i32, %c0_i32_0 : i32, i32
  }
  func.func @transform_10(%arg0: i32) -> (i32, i32) {
    %c0_i32 = arith.constant 0 : i32
    %c0_i32_0 = arith.constant 0 : i32
    %c0_i32_1 = arith.constant 0 : i32
    return %c0_i32, %c0_i32_0 : i32, i32
  }
  func.func @transform_11(%arg0: i32) -> (i32, i32) {
    %c0_i32 = arith.constant 0 : i32
    %c0_i32_0 = arith.constant 0 : i32
    %c0_i32_1 = arith.constant 0 : i32
    return %c0_i32, %c0_i32_0 : i32, i32
  }
  func.func @transform_12(%arg0: i32) -> (i32, i32) {
    %c0_i32 = arith.constant 0 : i32
    %c0_i32_0 = arith.constant 0 : i32
    %c0_i32_1 = arith.constant 0 : i32
    return %c0_i32, %c0_i32_0 : i32, i32
  }
  func.func @transform_13(%arg0: i32) -> (i32, i32) {
    %c0_i32 = arith.constant 0 : i32
    %c0_i32_0 = arith.constant 0 : i32
    %c0_i32_1 = arith.constant 0 : i32
    return %c0_i32, %c0_i32_0 : i32, i32
  }
  func.func @transform_14(%arg0: i32) -> (i32, i32) {
    %c0_i32 = arith.constant 0 : i32
    %c0_i32_0 = arith.constant 0 : i32
    %c0_i32_1 = arith.constant 0 : i32
    return %c0_i32, %c0_i32_0 : i32, i32
  }
  func.func @transform_15(%arg0: i32) -> (i32, i32) {
    %c0_i32 = arith.constant 0 : i32
    %c0_i32_0 = arith.constant 0 : i32
    %c0_i32_1 = arith.constant 0 : i32
    return %c0_i32, %c0_i32_0 : i32, i32
  }
  func.func @transform_16(%arg0: i32) -> (i32, i32) {
    %c0_i32 = arith.constant 0 : i32
    %c0_i32_0 = arith.constant 0 : i32
    %c0_i32_1 = arith.constant 0 : i32
    return %c0_i32, %c0_i32_0 : i32, i32
  }
  func.func @transform_17(%arg0: i32) -> (i32, i32) {
    %c0_i32 = arith.constant 0 : i32
    %c0_i32_0 = arith.constant 0 : i32
    %c0_i32_1 = arith.constant 0 : i32
    return %c0_i32, %c0_i32_0 : i32, i32
  }
  func.func @transform_18(%arg0: i32) -> (i32, i32) {
    %c0_i32 = arith.constant 0 : i32
    %c0_i32_0 = arith.constant 0 : i32
    return %arg0, %c0_i32 : i32, i32
  }
  func.func @transform_19(%arg0: i32) -> (i32, i32) {
    %c0_i32 = arith.constant 0 : i32
    %c0_i32_0 = arith.constant 0 : i32
    return %arg0, %c0_i32 : i32, i32
  }
  func.func @transform_20(%arg0: i32) -> (i32, i32) {
    %c0_i32 = arith.constant 0 : i32
    %c0_i32_0 = arith.constant 0 : i32
    return %arg0, %c0_i32 : i32, i32
  }
}

</mosaic_0001>

<bundles_post_ra>
// kernel: vae_forward.1
= control target key start
LH: loop header
LB: loop body
LE: loop exit
PB: predicated region body
PF: predicated region fallthrough
CT: control target
= control target key end

     0   :  { %s11469_s0 = inlined_call_operand.hbm [shape: f32[256,256], index: 0, kind: input, shape index: {}]   ;;  %s11470_s1 = inlined_call_operand.hbm [shape: f32[256,128], index: 1, kind: input, shape index: {}]   ;;  %s11471_s2 = inlined_call_operand.hbm [shape: bf16[256,512], index: 2, kind: input, shape index: {}]   ;;  %s11472_s3 = inlined_call_operand.vmem [shape: f32[1,512], index: 3, kind: input, shape index: {}]   ;;  %s11473_s4 = inlined_call_operand.hbm [shape: bf16[512,512], index: 4, kind: input, shape index: {}]   ;;  %s11474_s5 = inlined_call_operand.vmem [shape: f32[1,512], index: 5, kind: input, shape index: {}]   ;;  %s11475_s6 = inlined_call_operand.hbm [shape: bf16[512,256], index: 6, kind: input, shape index: {}]   ;;  %s11476_s7 = inlined_call_operand.vmem [shape: f32[1,256], index: 7, kind: input, shape index: {}]   ;;  %s11477_s8 = inlined_call_operand.hbm [shape: bf16[256,256], index: 8, kind: input, shape index: {}]   ;;  %s11478_s9 = inlined_call_operand.vmem [shape: f32[1,256], index: 9, kind: input, shape index: {}]   ;;  %s11479_s10 = inlined_call_operand.hbm [shape: bf16[128,256], index: 10, kind: input, shape index: {}]   ;;  %s11480_s11 = inlined_call_operand.vmem [shape: f32[1,256], index: 11, kind: input, shape index: {}]   ;;  %s11481_s12 = inlined_call_operand.hbm [shape: bf16[256,512], index: 12, kind: input, shape index: {}]   ;;  %s11482_s13 = inlined_call_operand.vmem [shape: f32[1,512], index: 13, kind: input, shape index: {}]   ;;  %s11483_s14 = inlined_call_operand.hbm [shape: bf16[512,512], index: 14, kind: input, shape index: {}]   ;;  %s11484_s15 = inlined_call_operand.vmem [shape: f32[1,512], index: 15, kind: input, shape index: {}]   ;;  %s11485_s16 = inlined_call_operand.hbm [shape: bf16[512,256], index: 16, kind: input, shape index: {}]   ;;  %s11486_s17 = inlined_call_operand.vmem [shape: f32[1,256], index: 17, kind: input, shape index: {}]   ;;  %s11487_s18 = inlined_call_operand.hbm [shape: f32[256,256], index: 18, kind: output, shape index: {0}]   ;;  %s11488_s19 = inlined_call_operand.hbm [shape: f32[256,128], index: 19, kind: output, shape index: {1}]   ;;  %s11489_s20 = inlined_call_operand.hbm [shape: f32[256,128], index: 20, kind: output, shape index: {2}]  }
   0x1   :  { %11510 = sst [smem:[#allocation32_spill]] %s11469_s0 }
   0x2   :  { %11511 = sst [smem:[#allocation33_spill]] %s11470_s1 }
   0x3   :  { %11512 = sst [smem:[#allocation34_spill]] %s11471_s2 }
   0x4   :  { %11513 = sst [smem:[#allocation35_spill]] %s11472_s3 }
   0x5   :  { %11514 = sst [smem:[#allocation36_spill]] %s11473_s4 }
   0x6   :  { %11515 = sst [smem:[#allocation37_spill]] %s11475_s6 }
   0x7   :  { %11516 = sst [smem:[#allocation38_spill]] %s11476_s7 }
   0x8   :  { %11517 = sst [smem:[#allocation39_spill]] %s11477_s8 }
   0x9   :  { %11518 = sst [smem:[#allocation40_spill]] %s11478_s9 }
   0xa   :  { %11519 = sst [smem:[#allocation41_spill]] %s11479_s10 }
   0xb   :  { %11520 = sst [smem:[#allocation42_spill]] %s11480_s11 }
   0xc   :  { %11521 = sst [smem:[#allocation43_spill]] %s11481_s12 }
   0xd   :  { %11522 = sst [smem:[#allocation44_spill]] %s11482_s13 }
   0xe   :  { %11523 = sst [smem:[#allocation45_spill]] %s11483_s14 }
   0xf   :  { %11524 = sst [smem:[#allocation46_spill]] %s11484_s15 }
  0x10   :  { %11525 = sst [smem:[#allocation47_spill]] %s11486_s17 }
  0x11   :  { %11526 = sst [smem:[#allocation48_spill]] %s11487_s18 }
  0x12   :  { %11527 = sst [smem:[#allocation49_spill]] %s11488_s19 }
  0x13   :  { %11528 = sst [smem:[#allocation50_spill]] %s11489_s20 }
  0x14   :  { %26 = vsyncpa [#allocation3], 0 }
  0x15   :  { %28 = vsyncpa [#allocation3 + $0x1], 0 }
  0x16   :  { %29 = vsyncpa [#allocation6], 0 }
  0x17   :  { %31 = vsyncpa [#allocation6 + $0x1], 0 }
  0x18   :  { %32 = vsyncpa [#allocation9], 0 }
  0x19   :  { %33 = vsyncpa [#allocation12], 0 }
  0x1a   :  { %34 = vsyncpa [#allocation15], 0 }
  0x1b   :  { %35 = vsyncpa [#allocation18], 0 }
  0x1c   :  { %36 = vsyncpa [#allocation4], 0 }
  0x1d   :  { %38 = vsyncpa [#allocation4 + $0x1], 0 }
  0x1e   :  { %39 = vsyncpa [#allocation21], 0 }
  0x1f   :  { %41 = vsyncpa [#allocation21 + $0x1], 0  ;;  %s9990_s1 = smov 0   ;;  %s9992_s22 = smov 0  }
  0x20   :  { %s9994_s23 = smov 0   ;;  %s9996_s24 = smov 0  }
  0x21 LB: > { %s9863_s2 = smov [#allocation7]   ;;  %s10011_s3 = sadd.s32 4294967295, %s9861_s24   ;;  %s9861_s24 = sphi %s9996_s24, %s11580_s24   ;;  %s9857_s23 = sphi %s9994_s23, %s11579_s23   ;;  %s9853_s22 = sphi %s9992_s22, %s11578_s22   ;;  %s9849_s1 = sphi %s9990_s1, %s11577_s1  }
  0x22   : > { %s530_s25 = sshll.u32 %s9863_s2, 4  ;;  %p7410_p0 = scmp.ge.s32.totalorder %s9861_s24, 1  ;;  %s10016_s25 = int_to_ptr.vmem [resolvable:$true] %s530_s25 }
  0x23   : > { %p11497_p1 = scmp.eq.s32.totalorder %s10011_s3, 0  ;;  %p518_p2 = scmp.lt.s32.totalorder %s9861_s24, 3 }
  0x24   : > { %s9864_s27 = smov [#allocation8]   ;;  %s9865_s29 = smov [#allocation11]  }
  0x25   : > { %p10018_p3 = pnand %p7410_p0, %p518_p2  ;;  %s546_s28 = sshll.u32 %s9864_s27, 4  ;;  %s10031_s28 = int_to_ptr.vmem [resolvable:$true] %s546_s28 }
  0x26   : > { %s10033_s30 = sshll.u32 %s9865_s29, 4  ;;  %s11531_s2 = sld [smem:[#allocation34_spill]]  ;;  %s579_s30 = int_to_ptr.vmem [resolvable:$true] %s10033_s30 }
  0x27   : > { %s11529_s26 = scalar_select %p10018_p3, 1, 0 }
  0x28   : > { %p8446_p5 = pneg %p10018_p3 }
  0x2a   : > { %p10027_p6 = pnand %p8446_p5, %p11497_p1 }
  0x2c   : > { %s9427_s18 = scalar_lea.hbm %s11531_s2, 8192  ;;  %p10043_p8 = pneg %p10027_p6 }
  0x2d   : > { %p9428_p7 = scmp.ne.s32.totalorder %s11531_s2, %s9427_s18  ;;  %p9434_p11 = scmp.lt.u32.totalorder %s9427_s18, %s11531_s2 }
  0x2f   : > { %p9430_p9 = pnand %p10043_p8, %p9428_p7 }
  0x31   : > { %p9431_p10 = pneg %p9430_p9 }
  0x33   : > { %p9436_p12 = pnand %p9434_p11, %p9431_p10 }
  0x35   : > { %9439 = shalt.err (!%p9436_p12)
}
  0x36   : > { %s9440_s17 = scalar_lea.vmem %s10016_s25, 8192  ;;  %p9448_p5 = scmp.lt.s32.totalorder %s10016_s25, %s10016_s25 }
  0x37   : > { %p9441_p13 = scmp.ne.s32.totalorder %s10016_s25, %s9440_s17  ;;  %p9449_p4 = scmp.lt.s32.totalorder %s9440_s17, %s9440_s17 }
  0x39   : > { %p9443_p0 = pnand %p9441_p13, %p10043_p8  ;;  %p9450_p7 = por %p9449_p4, %p9448_p5 }
  0x3b   : > { %p9444_p2 = pneg %p9443_p0 }
  0x3d   : > { %p9451_p9 = pnand %p9450_p7, %p9444_p2 }
  0x3f   : > { %9454 = shalt.err (!%p9451_p9)
}
  0x40   : > { %s11499_s20 = smov 256   ;;  %s11501_s18 = smov 16  }
  0x41   : > { %8449 = dma.hbm_to_vmem [thread:$0]  (!%p10027_p6), %s11531_s2, 8192, %s10016_s25, [#allocation6], %s11499_s20, %s11499_s20, %s11501_s18  }
  0x42   : > { %s11533_s15 = sld [smem:[#allocation36_spill]] }
  0x48   : > { %s9455_s17 = scalar_lea.hbm %s11533_s15, 16384 }
  0x49   : > { %p9456_p4 = scmp.ne.s32.totalorder %s11533_s15, %s9455_s17  ;;  %p9462_p12 = scmp.lt.u32.totalorder %s9455_s17, %s11533_s15 }
  0x4b   : > { %p9458_p10 = pnand %p9456_p4, %p10043_p8 }
  0x4d   : > { %p9459_p11 = pneg %p9458_p10 }
  0x4f   : > { %p9464_p13 = pnand %p9462_p12, %p9459_p11 }
  0x51   : > { %9467 = shalt.err (!%p9464_p13)
}
  0x52   : > { %s9468_s25 = scalar_lea.vmem %s10031_s28, 16384  ;;  %p9476_p7 = scmp.lt.s32.totalorder %s10031_s28, %s10031_s28 }
  0x53   : > { %p9469_p0 = scmp.ne.s32.totalorder %s10031_s28, %s9468_s25  ;;  %p9477_p9 = scmp.lt.s32.totalorder %s9468_s25, %s9468_s25 }
  0x55   : > { %p9471_p2 = pnand %p9469_p0, %p10043_p8  ;;  %p9478_p4 = por %p9477_p9, %p9476_p7 }
  0x57   : > { %p9472_p5 = pneg %p9471_p2 }
  0x59   : > { %p9479_p10 = pnand %p9478_p4, %p9472_p5 }
  0x5b   : > { %9482 = shalt.err (!%p9479_p10)
}
  0x5c   : > { %8452 = dma.hbm_to_vmem [thread:$0]  (!%p10027_p6), %s11533_s15, 16384, %s10031_s28, [#allocation9], %s11499_s20, %s11499_s20, %s11501_s18  }
  0x5d   : > { %s11534_s8 = sld [smem:[#allocation39_spill]] }
  0x63   : > { %s9483_s19 = scalar_lea.hbm %s11534_s8, 4096 }
  0x64   : > { %p9484_p11 = scmp.ne.s32.totalorder %s11534_s8, %s9483_s19  ;;  %p9490_p0 = scmp.lt.u32.totalorder %s9483_s19, %s11534_s8 }
  0x66   : > { %p9486_p12 = pnand %p9484_p11, %p10043_p8 }
  0x68   : > { %p9487_p13 = pneg %p9486_p12 }
  0x6a   : > { %p9492_p2 = pnand %p9490_p0, %p9487_p13 }
  0x6c   : > { %9495 = shalt.err (!%p9492_p2)
}
  0x6d   : > { %s9496_s25 = scalar_lea.vmem %s579_s30, 4096  ;;  %p9504_p4 = scmp.lt.s32.totalorder %s579_s30, %s579_s30 }
  0x6e   : > { %p9497_p5 = scmp.ne.s32.totalorder %s579_s30, %s9496_s25  ;;  %p9505_p10 = scmp.lt.s32.totalorder %s9496_s25, %s9496_s25 }
  0x70   : > { %p9499_p7 = pnand %p9497_p5, %p10043_p8  ;;  %p9506_p1 = por %p9505_p10, %p9504_p4 }
  0x72   : > { %p9500_p9 = pneg %p9499_p7 }
  0x74   : > { %p9507_p3 = pnand %p9506_p1, %p9500_p9 }
  0x76   : > { %9510 = shalt.err (!%p9507_p3)
}
  0x77   : > { %s11506_s28 = smov 128   ;;  %s11507_s7 = smov 8  }
  0x78   : > { %8458 = dma.hbm_to_vmem [thread:$0]  (!%p10027_p6), %s11534_s8, 4096, %s579_s30, [#allocation12], %s11506_s28, %s11506_s28, %s11507_s7  }
  0x79   : > { %s9870_s13 = smov [#allocation14]   ;;  %s9871_s0 = smov [#allocation10]  }
  0x7a   : > { %s610_s19 = sshll.u32 %s9870_s13, 4  ;;  %s562_s21 = sshll.u32 %s9871_s0, 4  ;;  %s611_s19 = int_to_ptr.vmem [resolvable:$true] %s610_s19  ;;  %s563_s21 = int_to_ptr.vmem [resolvable:$true] %s562_s21 }
  0x7b   : > { %s11535_s12 = sld [smem:[#allocation43_spill]] }
  0x81   : > { %s9511_s25 = scalar_lea.hbm %s11535_s12, 8192 }
  0x82   : > { %p9512_p1 = scmp.ne.s32.totalorder %s11535_s12, %s9511_s25  ;;  %p9518_p12 = scmp.lt.u32.totalorder %s9511_s25, %s11535_s12 }
  0x84   : > { %p9514_p3 = pnand %p9512_p1, %p10043_p8 }
  0x86   : > { %p9515_p11 = pneg %p9514_p3 }
  0x88   : > { %p9520_p13 = pnand %p9518_p12, %p9515_p11 }
  0x8a   : > { %9523 = shalt.err (!%p9520_p13)
}
  0x8b   : > { %s9524_s30 = scalar_lea.vmem %s611_s19, 8192  ;;  %p9532_p7 = scmp.lt.s32.totalorder %s611_s19, %s611_s19 }
  0x8c   : > { %p9525_p0 = scmp.ne.s32.totalorder %s611_s19, %s9524_s30  ;;  %p9533_p9 = scmp.lt.s32.totalorder %s9524_s30, %s9524_s30 }
  0x8e   : > { %p9527_p2 = pnand %p9525_p0, %p10043_p8  ;;  %p9534_p4 = por %p9533_p9, %p9532_p7 }
  0x90   : > { %p9528_p5 = pneg %p9527_p2 }
  0x92   : > { %p9535_p10 = pnand %p9534_p4, %p9528_p5 }
  0x94   : > { %9538 = shalt.err (!%p9535_p10)
}
  0x95   : > { %s11536_s20 = smov 16   ;;  %s11537_s18 = smov 256  }
  0x96   : > { %8464 = dma.hbm_to_vmem [thread:$0]  (!%p10027_p6), %s11535_s12, 8192, %s611_s19, [#allocation15], %s11537_s18, %s11537_s18, %s11536_s20  }
  0x97   : > { %s11538_s6 = sld [smem:[#allocation37_spill]] }
  0x9d   : > { %s9539_s13 = scalar_lea.hbm %s11538_s6, 8192 }
  0x9e   : > { %p9540_p1 = scmp.ne.s32.totalorder %s11538_s6, %s9539_s13  ;;  %p9546_p12 = scmp.lt.u32.totalorder %s9539_s13, %s11538_s6 }
  0xa0   : > { %p9542_p3 = pnand %p9540_p1, %p10043_p8 }
  0xa2   : > { %p9543_p11 = pneg %p9542_p3 }
  0xa4   : > { %p9548_p13 = pnand %p9546_p12, %p9543_p11 }
  0xa6   : > { %9551 = shalt.err (!%p9548_p13)
}
  0xa7   : > { %s9552_s30 = scalar_lea.vmem %s563_s21, 8192  ;;  %p9560_p7 = scmp.lt.s32.totalorder %s563_s21, %s563_s21 }
  0xa8   : > { %p9553_p0 = scmp.ne.s32.totalorder %s563_s21, %s9552_s30  ;;  %p9561_p9 = scmp.lt.s32.totalorder %s9552_s30, %s9552_s30 }
  0xaa   : > { %p9555_p2 = pnand %p9553_p0, %p10043_p8  ;;  %p9562_p4 = por %p9561_p9, %p9560_p7 }
  0xac   : > { %p9556_p5 = pneg %p9555_p2 }
  0xae   : > { %p9563_p10 = pnand %p9562_p4, %p9556_p5 }
  0xb0   : > { %9566 = shalt.err (!%p9563_p10)
}
  0xb1   : > { %8455 = dma.hbm_to_vmem [thread:$0]  (!%p10027_p6), %s11538_s6, 8192, %s563_s21, [#allocation9], %s11506_s28, %s11506_s28, %s11507_s7  }
  0xb2   : > { %s9872_s2 = smov [#allocation13]   ;;  %s9873_s11 = smov [#allocation16]  }
  0xb3   : > { %s594_s9 = sshll.u32 %s9872_s2, 4  ;;  %s626_s13 = sshll.u32 %s9873_s11, 4  ;;  %s595_s9 = int_to_ptr.vmem [resolvable:$true] %s594_s9  ;;  %s627_s13 = int_to_ptr.vmem [resolvable:$true] %s626_s13 }
  0xb4   : > { %s11539_s10 = sld [smem:[#allocation41_spill]] }
  0xba   : > { %s9567_s17 = scalar_lea.hbm %s11539_s10, 2048 }
  0xbb   : > { %p9568_p1 = scmp.ne.s32.totalorder %s11539_s10, %s9567_s17  ;;  %p9574_p12 = scmp.lt.u32.totalorder %s9567_s17, %s11539_s10 }
  0xbd   : > { %p9570_p3 = pnand %p9568_p1, %p10043_p8 }
  0xbf   : > { %p9571_p11 = pneg %p9570_p3 }
  0xc1   : > { %p9576_p13 = pnand %p9574_p12, %p9571_p11 }
  0xc3   : > { %9579 = shalt.err (!%p9576_p13)
}
  0xc4   : > { %s9580_s21 = scalar_lea.vmem %s595_s9, 2048  ;;  %p9588_p7 = scmp.lt.s32.totalorder %s595_s9, %s595_s9 }
  0xc5   : > { %p9581_p0 = scmp.ne.s32.totalorder %s595_s9, %s9580_s21  ;;  %p9589_p9 = scmp.lt.s32.totalorder %s9580_s21, %s9580_s21 }
  0xc7   : > { %p9583_p2 = pnand %p9581_p0, %p10043_p8  ;;  %p9590_p4 = por %p9589_p9, %p9588_p7 }
  0xc9   : > { %p9584_p5 = pneg %p9583_p2 }
  0xcb   : > { %p9591_p10 = pnand %p9590_p4, %p9584_p5 }
  0xcd   : > { %9594 = shalt.err (!%p9591_p10)
}
  0xce   : > { %8461 = dma.hbm_to_vmem [thread:$0]  (!%p10027_p6), %s11539_s10, 2048, %s595_s9, [#allocation12], %s11506_s28, %s11506_s28, %s11507_s7  }
  0xcf   : > { %s11540_s14 = sld [smem:[#allocation45_spill]] }
  0xd5   : > { %s9595_s0 = scalar_lea.hbm %s11540_s14, 16384 }
  0xd6   : > { %p9596_p1 = scmp.ne.s32.totalorder %s11540_s14, %s9595_s0  ;;  %p9602_p12 = scmp.lt.u32.totalorder %s9595_s0, %s11540_s14 }
  0xd8   : > { %p9598_p3 = pnand %p9596_p1, %p10043_p8 }
  0xda   : > { %p9599_p11 = pneg %p9598_p3 }
  0xdc   : > { %p9604_p13 = pnand %p9602_p12, %p9599_p11 }
  0xde   : > { %9607 = shalt.err (!%p9604_p13)
}
  0xdf   : > { %s9608_s19 = scalar_lea.vmem %s627_s13, 16384  ;;  %p9616_p7 = scmp.lt.s32.totalorder %s627_s13, %s627_s13 }
  0xe0   : > { %p9609_p0 = scmp.ne.s32.totalorder %s627_s13, %s9608_s19  ;;  %p9617_p9 = scmp.lt.s32.totalorder %s9608_s19, %s9608_s19 }
  0xe2   : > { %p9611_p2 = pnand %p9609_p0, %p10043_p8  ;;  %p9618_p4 = por %p9617_p9, %p9616_p7 }
  0xe4   : > { %p9612_p5 = pneg %p9611_p2 }
  0xe6   : > { %p9619_p10 = pnand %p9618_p4, %p9612_p5 }
  0xe8   : > { %9622 = shalt.err (!%p9619_p10)
}
  0xe9   : > { %8467 = dma.hbm_to_vmem [thread:$0]  (!%p10027_p6), %s11540_s14, 16384, %s627_s13, [#allocation15], %s11537_s18, %s11537_s18, %s11536_s20  }
  0xea   : > { %s9874_s8 = smov [#allocation17]   ;;  %s9623_s0 = scalar_lea.hbm %s11485_s16, 8192 }
  0xeb   : > { %s642_s15 = sshll.u32 %s9874_s8, 4  ;;  %p9624_p1 = scmp.ne.s32.totalorder %s11485_s16, %s9623_s0  ;;  %s643_s15 = int_to_ptr.vmem [resolvable:$true] %s642_s15 }
  0xec   : > { %p9630_p12 = scmp.lt.u32.totalorder %s9623_s0, %s11485_s16 }
  0xed   : > { %p9626_p3 = pnand %p9624_p1, %p10043_p8 }
  0xef   : > { %p9627_p11 = pneg %p9626_p3 }
  0xf1   : > { %p9632_p13 = pnand %p9630_p12, %p9627_p11 }
  0xf3   : > { %9635 = shalt.err (!%p9632_p13)
}
  0xf4   : > { %s9636_s13 = scalar_lea.vmem %s643_s15, 8192  ;;  %p9644_p7 = scmp.lt.s32.totalorder %s643_s15, %s643_s15 }
  0xf5   : > { %p9637_p0 = scmp.ne.s32.totalorder %s643_s15, %s9636_s13  ;;  %p9645_p9 = scmp.lt.s32.totalorder %s9636_s13, %s9636_s13 }
  0xf7   : > { %p9639_p2 = pnand %p9637_p0, %p10043_p8  ;;  %p9646_p4 = por %p9645_p9, %p9644_p7 }
  0xf9   : > { %p9640_p5 = pneg %p9639_p2 }
  0xfb   : > { %p9647_p10 = pnand %p9646_p4, %p9640_p5 }
  0xfd   : > { %9650 = shalt.err (!%p9647_p10)
}
  0xfe   : > { %8470 = dma.hbm_to_vmem [thread:$0]  (!%p10027_p6), %s11485_s16, 8192, %s643_s15, [#allocation18], %s11506_s28, %s11506_s28, %s11507_s7  }
  0xff   : > { %s11505_s4 = sadd.s32 4294967294, %s9861_s24   ;;  %s10222_s27 = sadd.s32 1, %s9861_s24  }
 0x100   : > { %s51_s21 = ssub.s32 %s9861_s24, %s10222_s27  ;;  %s54_s8 = sadd.s32 1, %s9857_s23 }
 0x101   : > { %p52_p8 = scmp.eq.s32.totalorder %s51_s21, 0  ;;  %p61_p1 = scmp.ne.s32.totalorder %s9857_s23, %s9853_s22 }
 0x102   : > { %p62_p3 = scmp.eq.s32.totalorder %s9861_s24, 0  ;;  %p67_p11 = scmp.ne.s32.totalorder %s9853_s22, %s9849_s1 }
 0x103   : > { %s10233_s2 = scalar_select %p52_p8, %s9857_s23, %s54_s8  }
 0x104   : > { %p10235_p12 = por %p62_p3, %p61_p1  ;;  %p11542_p13 = scmp.eq.s32.totalorder %s10011_s3, 0 }
 0x105   : > { %p453_p0 = scmp.eq.s32.totalorder %s10011_s3, 1  ;;  %p459_p2 = scmp.eq.s32.totalorder %s11505_s4, 1 }
 0x106   : > { %p10241_p6 = por %p11542_p13, %p67_p11  ;;  %p8496_p5 = scmp.lt.s32.totalorder %s9861_s24, 2 }
 0x107   : > { %s10250_s0 = sand.u32 1, %s9857_s23   ;;  %p10252_p7 = por %p453_p0, %p61_p1 }
 0x108   : > { %p10256_p9 = por %p459_p2, %p67_p11  ;;  %s7420_s25 = sshll.u32 %s10250_s0, 8 }
 0x109   : > { %s11544_s29 = scalar_select %p10252_p7, 1, 0 }
 0x10a   : > { %s11545_s17 = scalar_select %p10256_p9, 1, 0 }
 0x10b   : > { %s8014_s30 = sshll.u32 %s9861_s24, 12  ;;  %s11546_s9 = sld [smem:[#allocation32_spill]] }
 0x10c   : > { %s663_s8 = scalar_lea.vmem [#allocation2], %s7420_s25  ;;  %p10271_p4 = pnand %p8496_p5, %p10235_p12 }
 0x10d   : > { %s671_s4 = sshll.u32 %s663_s8, 4  ;;  %s7424_s6 = sshll.u32 %s10250_s0, 7  ;;  %s10267_s4 = int_to_ptr.vmem [resolvable:$true] %s671_s4 }
 0x10e   : > { %s660_s13 = scalar_lea.sflag [#allocation3], %s10250_s0  ;;  %p9653_p8 = pneg %p10271_p4 }
 0x111   : > { %s10265_s21 = scalar_lea.hbm %s11546_s9, %s8014_s30  ;;  %s9656_s11 = scalar_lea.hbm %s11546_s9, 8192 }
 0x112   : > { %s9651_s30 = scalar_lea.hbm %s10265_s21, 4096  ;;  %p9657_p11 = scmp.lt.u32.totalorder %s10265_s21, %s11546_s9 }
 0x113   : > { %p9652_p10 = scmp.ne.s32.totalorder %s10265_s21, %s9651_s30  ;;  %p9658_p12 = scmp.lt.u32.totalorder %s9656_s11, %s9651_s30 }
 0x114   : > { %p9660_p0 = scmp.lt.u32.totalorder %s9651_s30, %s10265_s21 }
 0x115   : > { %p9654_p1 = pnand %p9653_p8, %p9652_p10  ;;  %p9659_p13 = por %p9658_p12, %p9657_p11 }
 0x117   : > { %p9655_p3 = pneg %p9654_p1  ;;  %p9661_p2 = por %p9660_p0, %p9659_p13 }
 0x119   : > { %p9662_p5 = pnand %p9661_p2, %p9655_p3 }
 0x11b   : > { %9665 = shalt.err (!%p9662_p5)
}
 0x11c   : > { %s9666_s7 = scalar_lea.vmem %s10267_s4, 4096  ;;  %s9875_s25 = smov [#allocation2]  }
 0x11d   : > { %p9667_p10 = scmp.ne.s32.totalorder %s10267_s4, %s9666_s7  ;;  %s9671_s19 = sshll.u32 %s9875_s25, 4  ;;  %s9672_s19 = int_to_ptr.vmem [resolvable:$false] %s9671_s19 }
 0x11e   : > { %s9673_s10 = scalar_lea.vmem %s9672_s19, 8192  ;;  %p9674_p7 = scmp.lt.s32.totalorder %s10267_s4, %s9672_s19 }
 0x11f   : > { %p9669_p1 = pnand %p9667_p10, %p9653_p8  ;;  %p9675_p11 = scmp.lt.s32.totalorder %s9673_s10, %s9666_s7 }
 0x121   : > { %p9670_p9 = pneg %p9669_p1  ;;  %p9676_p12 = por %p9675_p11, %p9674_p7 }
 0x123   : > { %p9677_p13 = pnand %p9676_p12, %p9670_p9 }
 0x125   : > { %9680 = shalt.err (!%p9677_p13)
}
 0x126   : > { %8474 = dma.hbm_to_vmem [thread:$0]  (!%p10271_p4), %s10265_s21, 4096, %s10267_s4, %s660_s13, %s11537_s18, %s11537_s18, %s11536_s20  }
 0x127   : > { %s8015_s30 = sshll.u32 %s9861_s24, 11  ;;  %s11548_s8 = sld [smem:[#allocation33_spill]] }
 0x128   : > { %s685_s19 = scalar_lea.vmem [#allocation5], %s7424_s6  ;;  %s11549_s9 = sand.u32 1, %s9861_s24  }
 0x129   : > { %s692_s10 = sshll.u32 %s685_s19, 4  ;;  %s10320_s12 = scalar_lea.sflag [#allocation6], %s11549_s9  ;;  %s10316_s10 = int_to_ptr.vmem [resolvable:$true] %s692_s10 }
 0x12d   : > { %s10312_s25 = scalar_lea.hbm %s11548_s8, %s8015_s30  ;;  %s9686_s4 = scalar_lea.hbm %s11548_s8, 4096 }
 0x12e   : > { %s9681_s14 = scalar_lea.hbm %s10312_s25, 2048  ;;  %p9687_p0 = scmp.lt.u32.totalorder %s10312_s25, %s11548_s8 }
 0x12f   : > { %p9682_p7 = scmp.ne.s32.totalorder %s10312_s25, %s9681_s14  ;;  %p9688_p2 = scmp.lt.u32.totalorder %s9686_s4, %s9681_s14 }
 0x130   : > { %p9690_p10 = scmp.lt.u32.totalorder %s9681_s14, %s10312_s25 }
 0x131   : > { %p9684_p9 = pnand %p9682_p7, %p9653_p8  ;;  %p9689_p5 = por %p9688_p2, %p9687_p0 }
 0x133   : > { %p9685_p3 = pneg %p9684_p9  ;;  %p9691_p1 = por %p9690_p10, %p9689_p5 }
 0x135   : > { %p9692_p11 = pnand %p9691_p1, %p9685_p3 }
 0x137   : > { %9695 = shalt.err (!%p9692_p11)
}
 0x138   : > { %s9696_s6 = scalar_lea.vmem %s10316_s10, 2048  ;;  %s9876_s9 = smov [#allocation5]  }
 0x139   : > { %p9697_p12 = scmp.ne.s32.totalorder %s10316_s10, %s9696_s6  ;;  %s9701_s13 = sshll.u32 %s9876_s9, 4  ;;  %s9702_s13 = int_to_ptr.vmem [resolvable:$false] %s9701_s13 }
 0x13a   : > { %s9703_s30 = scalar_lea.vmem %s9702_s13, 4096  ;;  %p9704_p9 = scmp.lt.s32.totalorder %s10316_s10, %s9702_s13 }
 0x13b   : > { %p9699_p13 = pnand %p9697_p12, %p9653_p8  ;;  %p9705_p0 = scmp.lt.s32.totalorder %s9703_s30, %s9696_s6 }
 0x13d   : > { %p9700_p7 = pneg %p9699_p13  ;;  %p9706_p2 = por %p9705_p0, %p9704_p9 }
 0x13f   : > { %p9707_p5 = pnand %p9706_p2, %p9700_p7 }
 0x141   : > { %9710 = shalt.err (!%p9707_p5)
}
 0x142   : > { %s11550_s14 = smov 8   ;;  %s11551_s11 = smov 128  }
 0x143   : > { %8477 = dma.hbm_to_vmem [thread:$0]  (!%p10271_p4), %s10312_s25, 2048, %s10316_s10, %s10320_s12, %s11551_s11, %s11551_s11, %s11550_s14  }
 0x144   : > { %p11552_p8 = scmp.ne.s32.totalorder %s11529_s26, 0 }
 0x145   : > { %s10352_s7 = sand.u32 (!%p11552_p8), 1, %s9853_s22  }
 0x146   : > { %704 = sbr.rel (%p11552_p8) target bundleno = 2536 (0x9e8), region = 92  ;;  %s7428_s19 = sshll.u32 (!%p11552_p8), %s10352_s7, 8 }
 0x147   : > { %s707_s20 = scalar_lea.sflag (!%p11552_p8), [#allocation3], %s10352_s7  ;;  %s10358_s28 = scalar_lea.vmem (!%p11552_p8), [#allocation2], %s7428_s19 }
 0x14d   : > { %9812 = dma.done.wait (%p10241_p6), %s707_s20, 4096  }
 0x14e   : > { %9814 = vsyncadd (%p10241_p6), %s707_s20, 4294963200  ;;  %s715_s12 = sand.u32 1, %s10011_s3   ;;  %s10366_s26 = sshll.u32 %s10352_s7, 7 }
 0x14f   : > { %s716_s25 = scalar_lea.sflag [#allocation6], %s715_s12  ;;  %s10371_s10 = scalar_lea.vmem [#allocation5], %s10366_s26 }
 0x150   : > { %9816 = dma.done.wait (%p10241_p6), %s716_s25, 2048  }
 0x151   : > { %9818 = vsyncadd (%p10241_p6), %s716_s25, 4294965248  ;;  %p11553_p4 = scmp.eq.s32.totalorder %s10011_s3, 0 }
 0x153   : > { %9820 = dma.done.wait (%p11553_p4), [#allocation6], 8192   ;;  %p11554_p3 = pmov %p11553_p4 }
 0x155   : > { %9822 = vsyncadd (%p11554_p3), [#allocation6], 4294959104  ;;  %p11555_p10 = pmov %p11554_p3 }
 0x156   : > { %p11556_p1 = pmov %p11554_p3 }
 0x157   : > { %9824 = dma.done.wait (%p11555_p10), [#allocation9], 24576  }
 0x158   : > { %9826 = vsyncadd (%p11556_p1), [#allocation9], 4294942720  ;;  %p11557_p11 = pmov %p11556_p1 }
 0x159   : > { %p11558_p12 = pmov %p11556_p1 }
 0x15a   : > { %9828 = dma.done.wait (%p11557_p11), [#allocation12], 6144  }
 0x15b   : > { %9830 = vsyncadd (%p11558_p12), [#allocation12], 4294961152  ;;  %p11559_p6 = pmov %p11556_p1 }
 0x15c   : > { %p11560_p13 = pmov %p11556_p1 }
 0x15d   : > { %9832 = dma.done.wait (%p11559_p6), [#allocation15], 24576  }
 0x15e   : > { %9834 = vsyncadd (%p11560_p13), [#allocation15], 4294942720  ;;  %p11561_p7 = pmov %p11556_p1 }
 0x15f   : > { %p11562_p9 = pmov %p11556_p1 }
 0x160   : > { %9836 = dma.done.wait (%p11561_p7), [#allocation18], 8192  }
 0x161   : > { %9838 = vsyncadd (%p11562_p9), [#allocation18], 4294959104  ;;  %v8555_v0 = vld [vmem:[#allocation7 + $0x4] ss:$16 sps:$4 sm:$0xff]   ;;  %v8557_v1 = vld [vmem:[#allocation7] ss:$16 sps:$4 sm:$0xff]  }
 0x162   : > { %1283 = vmatprep.subr.bf16.mxu1 %v8555_v0  ;;  %v8558_v2 = vld [vmem:[#allocation7 + $0x24] ss:$16 sps:$4 sm:$0xff]   ;;  %v8560_v3 = vld [vmem:[#allocation7 + $0x20] ss:$16 sps:$4 sm:$0xff]   ;;  %v830_v13 = vld [vmem:[%s10358_s28 + $0x8] sm:$0xff]  ;;  %s11563_s4 = sld [smem:[#allocation35_spill]] }
 0x163   : > { %1284 = vmatpush1.bf16.msra.mxu1 %v8557_v1  ;;  %v8561_v4 = vld [vmem:[#allocation7 + $0x44] ss:$16 sps:$4 sm:$0xff]   ;;  %v8563_v5 = vld [vmem:[#allocation7 + $0x40] ss:$16 sps:$4 sm:$0xff]   ;;  %v832_v14 = vld [vmem:[%s10358_s28 + $0x18] sm:$0xff]  ;;  %s11564_s13 = sld [smem:[#allocation38_spill]] }
 0x164   : > { %1285 = vmatprep.subr.bf16.mxu1 %v8558_v2  ;;  %v8564_v6 = vld [vmem:[#allocation7 + $0x64] ss:$16 sps:$4 sm:$0xff]   ;;  %v8566_v7 = vld [vmem:[#allocation7 + $0x60] ss:$16 sps:$4 sm:$0xff]   ;;  %v10399_v15 = vpack.c.bf16 %v832_v14, %v830_v13  ;;  %v8605_v40 = vld [vmem:[#allocation7 + $0xc] ss:$16 sps:$4 sm:$0xff]  }
 0x165   : > { %v8567_v8 = vld [vmem:[#allocation7 + $0x84] ss:$16 sps:$4 sm:$0xff]   ;;  %v8569_v9 = vld [vmem:[#allocation7 + $0x80] ss:$16 sps:$4 sm:$0xff]   ;;  %v834_v41 = vld [vmem:[%s10358_s28 + $0x28] sm:$0xff]  ;;  %s11565_s11 = sld [smem:[#allocation40_spill]] }
 0x166   : > { %v8570_v10 = vld [vmem:[#allocation7 + $0xa4] ss:$16 sps:$4 sm:$0xff]   ;;  %v8572_v11 = vld [vmem:[#allocation7 + $0xa0] ss:$16 sps:$4 sm:$0xff]   ;;  %1315 = vmatprep.mubr.bf16.mxu1 %v10399_v15  ;;  %v836_v42 = vld [vmem:[%s10358_s28 + $0x38] sm:$0xff]  ;;  %s10771_s20 = scalar_lea.vmem [#allocation20], %s10366_s26 }
 0x167   : > { %1286 = vmatpush1.bf16.msra.mxu1 %v8560_v3  ;;  %v8573_v12 = vld [vmem:[#allocation7 + $0xc4] ss:$16 sps:$4 sm:$0xff]   ;;  %v8575_v16 = vld [vmem:[#allocation7 + $0xc0] ss:$16 sps:$4 sm:$0xff]   ;;  %v8603_v46 = vld [vmem:[#allocation7 + $0x8] ss:$16 sps:$4 sm:$0xff]   ;;  %v10408_v47 = vpack.c.bf16 %v836_v42, %v834_v41 }
 0x168   : > { %1287 = vmatprep.subr.bf16.mxu1 %v8561_v4  ;;  %v8576_v17 = vld [vmem:[#allocation7 + $0xe4] ss:$16 sps:$4 sm:$0xff]   ;;  %v8578_v18 = vld [vmem:[#allocation7 + $0xe0] ss:$16 sps:$4 sm:$0xff]   ;;  %v8608_v48 = vld [vmem:[#allocation7 + $0x2c] ss:$16 sps:$4 sm:$0xff]  }
 0x169   : > { %v8579_v19 = vld [vmem:[#allocation7 + $0x104] ss:$16 sps:$4 sm:$0xff]   ;;  %v8581_v20 = vld [vmem:[#allocation7 + $0x100] ss:$16 sps:$4 sm:$0xff]   ;;  %v8606_v49 = vld [vmem:[#allocation7 + $0x28] ss:$16 sps:$4 sm:$0xff]  }
 0x16a   : > { %v8582_v21 = vld [vmem:[#allocation7 + $0x124] ss:$16 sps:$4 sm:$0xff]   ;;  %v8584_v22 = vld [vmem:[#allocation7 + $0x120] ss:$16 sps:$4 sm:$0xff]   ;;  %v8611_v54 = vld [vmem:[#allocation7 + $0x4c] ss:$16 sps:$4 sm:$0xff]  }
 0x16b   : > { %1288 = vmatpush1.bf16.msra.mxu1 %v8563_v5  ;;  %v8585_v23 = vld [vmem:[#allocation7 + $0x144] ss:$16 sps:$4 sm:$0xff]   ;;  %v8587_v24 = vld [vmem:[#allocation7 + $0x140] ss:$16 sps:$4 sm:$0xff]   ;;  %v838_v55 = vld [vmem:[%s10358_s28 + $0x48] sm:$0xff]  ;;  %s11568_s6 = sld [smem:[#allocation46_spill]] }
 0x16c   : > { %1289 = vmatprep.subr.bf16.mxu1 %v8564_v6  ;;  %v8588_v25 = vld [vmem:[#allocation7 + $0x164] ss:$16 sps:$4 sm:$0xff]   ;;  %v8590_v26 = vld [vmem:[#allocation7 + $0x160] ss:$16 sps:$4 sm:$0xff]   ;;  %v840_v56 = vld [vmem:[%s10358_s28 + $0x58] sm:$0xff]  ;;  %s8018_s9 = sshll.u32 %s10011_s3, 11 }
 0x16d   : > { %v8591_v27 = vld [vmem:[#allocation7 + $0x184] ss:$16 sps:$4 sm:$0xff]   ;;  %v8593_v28 = vld [vmem:[#allocation7 + $0x180] ss:$16 sps:$4 sm:$0xff]   ;;  %v8609_v60 = vld [vmem:[#allocation7 + $0x48] ss:$16 sps:$4 sm:$0xff]   ;;  %v10418_v61 = vpack.c.bf16 %v840_v56, %v838_v55 }
 0x16e   : > { %v8594_v29 = vld [vmem:[#allocation7 + $0x1a4] ss:$16 sps:$4 sm:$0xff]   ;;  %v8596_v30 = vld [vmem:[#allocation7 + $0x1a0] ss:$16 sps:$4 sm:$0xff]   ;;  %v8614_v62 = vld [vmem:[#allocation7 + $0x6c] ss:$16 sps:$4 sm:$0xff]  }
 0x16f   : > { %1290 = vmatpush1.bf16.msra.mxu1 %v8566_v7  ;;  %v8597_v31 = vld [vmem:[#allocation7 + $0x1c4] ss:$16 sps:$4 sm:$0xff]   ;;  %v8599_v32 = vld [vmem:[#allocation7 + $0x1c0] ss:$16 sps:$4 sm:$0xff]   ;;  %v8612_v63 = vld [vmem:[#allocation7 + $0x68] ss:$16 sps:$4 sm:$0xff]  }
 0x170   : > { %1291 = vmatprep.subr.bf16.mxu1 %v8567_v8  ;;  %v8600_v33 = vld [vmem:[#allocation7 + $0x1e4] ss:$16 sps:$4 sm:$0xff]   ;;  %v8602_v34 = vld [vmem:[#allocation7 + $0x1e0] ss:$16 sps:$4 sm:$0xff]   ;;  %v8617_v4 = vld [vmem:[#allocation7 + $0x8c] ss:$16 sps:$4 sm:$0xff]  }
 0x171   : > { %v829_v35 = vld [vmem:[%s10358_s28] sm:$0xff]  ;;  %v831_v37 = vld [vmem:[%s10358_s28 + $0x10] sm:$0xff]  ;;  %v842_v5 = vld [vmem:[%s10358_s28 + $0x68] sm:$0xff]  ;;  %s11277_s25 = scalar_lea.sflag [#allocation21], %s715_s12  ;;  %p11570_p2 = scmp.ne.s32.totalorder %s11544_s29, 0 }
 0x172   : > { %v8651_v36 = vld [vmem:[#allocation8 + $0x4] ss:$16 sps:$4 sm:$0xff]   ;;  %v8656_v38 = vld [vmem:[#allocation8] ss:$16 sps:$4 sm:$0xff]   ;;  %v10406_v44 = vpack.c.bf16 %v831_v37, %v829_v35  ;;  %v844_v6 = vld [vmem:[%s10358_s28 + $0x78] sm:$0xff] }
 0x173   : > { %1292 = vmatpush1.bf16.msra.mxu1 %v8569_v9  ;;  %v8657_v39 = vld [vmem:[#allocation8 + $0x24] ss:$16 sps:$4 sm:$0xff]   ;;  %2395 = vmatprep.subr.bf16.mxu0 %v8651_v36  ;;  %v8662_v43 = vld [vmem:[#allocation8 + $0x20] ss:$16 sps:$4 sm:$0xff]   ;;  %v8618_v13 = vld [vmem:[#allocation7 + $0xa8] ss:$16 sps:$4 sm:$0xff]  }
 0x174   : > { %1293 = vmatprep.subr.bf16.mxu1 %v8570_v10  ;;  %2396 = vmatpush1.bf16.msra.mxu0 %v8656_v38  ;;  %v8663_v45 = vld [vmem:[#allocation8 + $0x44] ss:$16 sps:$4 sm:$0xff]   ;;  %v8668_v51 = vld [vmem:[#allocation8 + $0x40] ss:$16 sps:$4 sm:$0xff]   ;;  %v8615_v10 = vld [vmem:[#allocation7 + $0x88] ss:$16 sps:$4 sm:$0xff]  }
 0x175   : > { %2397 = vmatprep.subr.bf16.mxu0 %v8657_v39  ;;  %v833_v50 = vld [vmem:[%s10358_s28 + $0x20] sm:$0xff]  ;;  %v835_v52 = vld [vmem:[%s10358_s28 + $0x30] sm:$0xff]  ;;  %v8627_v38 = vld [vmem:[#allocation7 + $0x108] ss:$16 sps:$4 sm:$0xff]  }
 0x176   : > { %v8669_v53 = vld [vmem:[#allocation8 + $0x64] ss:$16 sps:$4 sm:$0xff]   ;;  %v8674_v57 = vld [vmem:[#allocation8 + $0x60] ss:$16 sps:$4 sm:$0xff]   ;;  %v10416_v58 = vpack.c.bf16 %v835_v52, %v833_v50  ;;  %v854_v50 = vld [vmem:[%s10358_s28 + $0xc8] sm:$0xff] }
 0x177   : > { %1294 = vmatpush1.bf16.msra.mxu1 %v8572_v11  ;;  %v8675_v59 = vld [vmem:[#allocation8 + $0x84] ss:$16 sps:$4 sm:$0xff]   ;;  %v8680_v1 = vld [vmem:[#allocation8 + $0x80] ss:$16 sps:$4 sm:$0xff]   ;;  %v10428_v11 = vpack.c.bf16 %v844_v6, %v842_v5  ;;  %v8638_v56 = vld [vmem:[#allocation7 + $0x16c] ss:$16 sps:$4 sm:$0xff]  }
 0x178   : > { %1295 = vmatprep.subr.bf16.mxu1 %v8573_v12  ;;  %2398 = vmatpush1.bf16.msra.mxu0 %v8662_v43  ;;  %v837_v0 = vld [vmem:[%s10358_s28 + $0x40] sm:$0xff]  ;;  %v839_v2 = vld [vmem:[%s10358_s28 + $0x50] sm:$0xff]  ;;  %v8620_v12 = vld [vmem:[#allocation7 + $0xac] ss:$16 sps:$4 sm:$0xff]  }
 0x179   : > { %2399 = vmatprep.subr.bf16.mxu0 %v8663_v45  ;;  %v8681_v3 = vld [vmem:[#allocation8 + $0xa4] ss:$16 sps:$4 sm:$0xff]   ;;  %v8686_v7 = vld [vmem:[#allocation8 + $0xa0] ss:$16 sps:$4 sm:$0xff]   ;;  %v10426_v8 = vpack.c.bf16 %v839_v2, %v837_v0  ;;  %v8630_v45 = vld [vmem:[#allocation7 + $0x128] ss:$16 sps:$4 sm:$0xff]  }
 0x17a   : > { %v8687_v9 = vld [vmem:[#allocation8 + $0xc4] ss:$16 sps:$4 sm:$0xff]   ;;  %v8710_v36 = vld [vmem:[#allocation8 + $0x120] ss:$16 sps:$4 sm:$0xff]   ;;  %v858_v2 = vld [vmem:[%s10358_s28 + $0xe8] sm:$0xff] }
 0x17b   : > { %1296 = vmatpush1.bf16.msra.mxu1 %v8575_v16  ;;  %v841_v14 = vld [vmem:[%s10358_s28 + $0x60] sm:$0xff]  ;;  %v855_v0 = vld [vmem:[%s10358_s28 + $0xd0] sm:$0xff]  ;;  %v8644_v6 = vld [vmem:[#allocation7 + $0x1ac] ss:$16 sps:$4 sm:$0xff]  }
 0x17c   : > { %1297 = vmatprep.subr.bf16.mxu1 %v8576_v17  ;;  %2400 = vmatpush1.bf16.msra.mxu0 %v8668_v51  ;;  %v8692_v16 = vld [vmem:[#allocation8 + $0xc0] ss:$16 sps:$4 sm:$0xff]   ;;  %v8705_v35 = vld [vmem:[#allocation8 + $0x124] ss:$16 sps:$4 sm:$0xff]   ;;  %v856_v51 = vld [vmem:[%s10358_s28 + $0xd8] sm:$0xff] }
 0x17d   : > { %2401 = vmatprep.subr.bf16.mxu0 %v8669_v53  ;;  %v843_v17 = vld [vmem:[%s10358_s28 + $0x70] sm:$0xff] }
 0x17e   : > { %v8711_v37 = vld [vmem:[#allocation8 + $0x144] ss:$16 sps:$4 sm:$0xff]   ;;  %v8716_v42 = vld [vmem:[#allocation8 + $0x140] ss:$16 sps:$4 sm:$0xff]  }
 0x17f   : > { %1298 = vmatpush1.bf16.msra.mxu1 %v8578_v18  ;;  %v8693_v18 = vld [vmem:[#allocation8 + $0xe4] ss:$16 sps:$4 sm:$0xff]   ;;  %v8722_v52 = vld [vmem:[#allocation8 + $0x160] ss:$16 sps:$4 sm:$0xff]  }
 0x180   : > { %1299 = vmatprep.subr.bf16.mxu1 %v8579_v19  ;;  %2402 = vmatpush1.bf16.msra.mxu0 %v8674_v57  ;;  %v8623_v19 = vld [vmem:[#allocation7 + $0xcc] ss:$16 sps:$4 sm:$0xff]   ;;  %v8717_v43 = vld [vmem:[#allocation8 + $0x164] ss:$16 sps:$4 sm:$0xff]   ;;  %v10458_v57 = vpack.c.bf16 %v856_v51, %v854_v50  ;;  %v8743_v51 = vld [vmem:[#allocation8 + $0x1e8] ss:$16 sps:$4 sm:$0xff]  }
 0x181   : > { %2403 = vmatprep.subr.bf16.mxu0 %v8675_v59  ;;  %v8723_v53 = vld [vmem:[#allocation8 + $0x184] ss:$16 sps:$4 sm:$0xff]   ;;  %v8728_v59 = vld [vmem:[#allocation8 + $0x180] ss:$16 sps:$4 sm:$0xff]   ;;  %v8745_v50 = vld [vmem:[#allocation8 + $0x1ec] ss:$16 sps:$4 sm:$0xff]  }
 0x183   : > { %1300 = vmatpush1.bf16.msra.mxu1 %v8581_v20  ;;  %v846_v20 = vld [vmem:[%s10358_s28 + $0x88] sm:$0xff] }
 0x184   : > { %1301 = vmatprep.subr.bf16.mxu1 %v8582_v21  ;;  %2404 = vmatpush1.bf16.msra.mxu0 %v8680_v1  ;;  %v848_v21 = vld [vmem:[%s10358_s28 + $0x98] sm:$0xff] }
 0x185   : > { %2405 = vmatprep.subr.bf16.mxu0 %v8681_v3  ;;  %v8641_v1 = vld [vmem:[#allocation7 + $0x18c] ss:$16 sps:$4 sm:$0xff]  }
 0x186   : > { %v860_v3 = vld [vmem:[%s10358_s28 + $0xf8] sm:$0xff] }
 0x187   : > { %1302 = vmatpush1.bf16.msra.mxu1 %v8584_v22  ;;  %v8698_v22 = vld [vmem:[#allocation8 + $0xe0] ss:$16 sps:$4 sm:$0xff]  }
 0x188   : > { %1303 = vmatprep.subr.bf16.mxu1 %v8585_v23  ;;  %2406 = vmatpush1.bf16.msra.mxu0 %v8686_v7  ;;  %v10436_v23 = vpack.c.bf16 %v843_v17, %v841_v14  ;;  %v10468_v7 = vpack.c.bf16 %v860_v3, %v858_v2  ;;  %v8645_v14 = vld [vmem:[#allocation7 + $0x1c8] ss:$16 sps:$4 sm:$0xff]   ;;  %v8650_v17 = vld [vmem:[#allocation7 + $0x1ec] ss:$16 sps:$4 sm:$0xff]  }
 0x189   : > { %2407 = vmatprep.subr.bf16.mxu0 %v8687_v9  ;;  %v8642_v9 = vld [vmem:[#allocation7 + $0x1a8] ss:$16 sps:$4 sm:$0xff]  }
 0x18b   : > { %1304 = vmatpush1.bf16.msra.mxu1 %v8587_v24  ;;  %v8699_v24 = vld [vmem:[#allocation8 + $0x104] ss:$16 sps:$4 sm:$0xff]  }
 0x18c   : > { %1305 = vmatprep.subr.bf16.mxu1 %v8588_v25  ;;  %2408 = vmatpush1.bf16.msra.mxu0 %v8692_v16  ;;  %v8621_v25 = vld [vmem:[#allocation7 + $0xc8] ss:$16 sps:$4 sm:$0xff]  }
 0x18d   : > { %2409 = vmatprep.subr.bf16.mxu0 %v8693_v18  ;;  %v8648_v18 = vld [vmem:[#allocation7 + $0x1e8] ss:$16 sps:$4 sm:$0xff]  }
 0x18f   : > { %1306 = vmatpush1.bf16.msra.mxu1 %v8590_v26  ;;  %v10438_v26 = vpack.c.bf16 %v848_v21, %v846_v20  ;;  %v8653_v20 = vld [vmem:[#allocation8 + $0x8] ss:$16 sps:$4 sm:$0xff]   ;;  %v8661_v21 = vld [vmem:[#allocation8 + $0x2c] ss:$16 sps:$4 sm:$0xff]  }
 0x190   : > { %1307 = vmatprep.subr.bf16.mxu1 %v8591_v27  ;;  %v8626_v27 = vld [vmem:[#allocation7 + $0xec] ss:$16 sps:$4 sm:$0xff]   ;;  %2410 = vmatpush1.bf16.msra.mxu0 %v8698_v22  ;;  %v8659_v22 = vld [vmem:[#allocation8 + $0x28] ss:$16 sps:$4 sm:$0xff]  }
 0x191   : > { %2411 = vmatprep.subr.bf16.mxu0 %v8699_v24  ;;  %v8667_v24 = vld [vmem:[#allocation8 + $0x4c] ss:$16 sps:$4 sm:$0xff]  }
 0x193   : > { %1308 = vmatpush1.bf16.msra.mxu1 %v8593_v28  ;;  %v8624_v28 = vld [vmem:[#allocation7 + $0xe8] ss:$16 sps:$4 sm:$0xff]  }
 0x194   : > { %1309 = vmatprep.subr.bf16.mxu1 %v8594_v29  ;;  %v845_v29 = vld [vmem:[%s10358_s28 + $0x80] sm:$0xff] }
 0x197   : > { %1310 = vmatpush1.bf16.msra.mxu1 %v8596_v30  ;;  %v847_v30 = vld [vmem:[%s10358_s28 + $0x90] sm:$0xff] }
 0x198   : > { %1311 = vmatprep.subr.bf16.mxu1 %v8597_v31  ;;  %v8704_v31 = vld [vmem:[#allocation8 + $0x100] ss:$16 sps:$4 sm:$0xff]   ;;  %v10446_v39 = vpack.c.bf16 %v847_v30, %v845_v29  ;;  %v8677_v29 = vld [vmem:[#allocation8 + $0x88] ss:$16 sps:$4 sm:$0xff]   ;;  %v8685_v30 = vld [vmem:[#allocation8 + $0xac] ss:$16 sps:$4 sm:$0xff]  }
 0x199   : > { %2412 = vmatpush1.bf16.msra.mxu0 %v8704_v31  ;;  %v8734_v31 = vld [vmem:[#allocation8 + $0x1a0] ss:$16 sps:$4 sm:$0xff]  }
 0x19a   : > { %2413 = vmatprep.subr.bf16.mxu0 %v8705_v35  ;;  %v8741_v35 = vld [vmem:[#allocation8 + $0x1e4] ss:$16 sps:$4 sm:$0xff]  }
 0x19b   : > { %1312 = vmatpush1.bf16.msra.mxu1 %v8599_v32  ;;  %v8629_v32 = vld [vmem:[#allocation7 + $0x10c] ss:$16 sps:$4 sm:$0xff]  }
 0x19c   : > { %1313 = vmatprep.subr.bf16.mxu1 %v8600_v33  ;;  %v850_v33 = vld [vmem:[%s10358_s28 + $0xa8] sm:$0xff] }
 0x19d   : > { %2414 = vmatpush1.bf16.msra.mxu0 %v8710_v36  ;;  %v8749_v36 = vld [vmem:[#allocation8 + $0x204] ss:$16 sps:$4 sm:$0xff]  }
 0x19e   : > { %2415 = vmatprep.subr.bf16.mxu0 %v8711_v37  ;;  %v8701_v37 = vld [vmem:[#allocation8 + $0x108] ss:$16 sps:$4 sm:$0xff]  }
 0x19f   : > { %1314 = vmatpush1.bf16.msra.mxu1 %v8602_v34  ;;  %v852_v34 = vld [vmem:[%s10358_s28 + $0xb8] sm:$0xff] }
 0x1a0   : > { %1396 = vmatprep.subr.bf16.mxu1 %v8605_v40  ;;  %v8632_v40 = vld [vmem:[#allocation7 + $0x12c] ss:$16 sps:$4 sm:$0xff]   ;;  %v10448_v41 = vpack.c.bf16 %v852_v34, %v850_v33  ;;  %v8740_v33 = vld [vmem:[#allocation8 + $0x1c0] ss:$16 sps:$4 sm:$0xff]   ;;  %v8695_v34 = vld [vmem:[#allocation8 + $0xe8] ss:$16 sps:$4 sm:$0xff]  }
 0x1a1   : > { %2416 = vmatpush1.bf16.msra.mxu0 %v8716_v42  ;;  %v8721_v42 = vld [vmem:[#allocation8 + $0x16c] ss:$16 sps:$4 sm:$0xff]  }
 0x1a2   : > { %1316 = vmatmul.mubr.bf16.vlgmr.msra.gmra.mrb[0].mxu1 %v10406_v44  ;;  %2417 = vmatprep.subr.bf16.mxu0 %v8717_v43  ;;  %v8719_v43 = vld [vmem:[#allocation8 + $0x168] ss:$16 sps:$4 sm:$0xff]  }
 0x1a3   : > { %1397 = vmatpush1.bf16.msra.mxu1 %v8603_v46  ;;  %1325 = vmatprep.mubr.bf16.mxu1 %v10408_v47  ;;  %v849_v46 = vld [vmem:[%s10358_s28 + $0xa0] sm:$0xff] }
 0x1a4   : > { %1398 = vmatprep.subr.bf16.mxu1 %v8608_v48  ;;  %v851_v48 = vld [vmem:[%s10358_s28 + $0xb0] sm:$0xff] }
 0x1a5   : > { %v10456_v55 = vpack.c.bf16 %v851_v48, %v849_v46  ;;  %2418 = vmatpush1.bf16.msra.mxu0 %v8722_v52  ;;  %v8733_v46 = vld [vmem:[#allocation8 + $0x1ac] ss:$16 sps:$4 sm:$0xff]  }
 0x1a6   : > { %2419 = vmatprep.subr.bf16.mxu0 %v8723_v53  ;;  %v8739_v48 = vld [vmem:[#allocation8 + $0x1cc] ss:$16 sps:$4 sm:$0xff]   ;;  %v943_v53 = vlaneseq }
 0x1a7   : > { %1399 = vmatpush1.bf16.msra.mxu1 %v8606_v49  ;;  %v8635_v49 = vld [vmem:[#allocation7 + $0x14c] ss:$16 sps:$4 sm:$0xff]  }
 0x1a8   : > { %1400 = vmatprep.subr.bf16.mxu1 %v8611_v54  ;;  %v8633_v54 = vld [vmem:[#allocation7 + $0x148] ss:$16 sps:$4 sm:$0xff]   ;;  %v8752_v52 = vld [vmem:[#allocation8 + $0x20c] ss:$16 sps:$4 sm:$0xff]  }
 0x1a9   : > { %2420 = vmatpush1.bf16.msra.mxu0 %v8728_v59 }
 0x1aa   : > { %1326 = vmatmul.mubr.bf16.gmra.mrb[4].mxu1 %v10416_v58 }
 0x1ab   : > { %1401 = vmatpush1.bf16.msra.mxu1 %v8609_v60  ;;  %1335 = vmatprep.mubr.bf16.mxu1 %v10418_v61  ;;  %v8729_v60 = vld [vmem:[#allocation8 + $0x1a4] ss:$16 sps:$4 sm:$0xff]  }
 0x1ac   : > { %1402 = vmatprep.subr.bf16.mxu1 %v8614_v62  ;;  %v8636_v62 = vld [vmem:[#allocation7 + $0x168] ss:$16 sps:$4 sm:$0xff]   ;;  %2421 = vmatprep.subr.bf16.mxu0 %v8729_v60 }
 0x1ad   : > { %2422 = vmatpush1.bf16.msra.mxu0 %v8734_v31  ;;  %v8764_v31 = vld [vmem:[#allocation8 + $0x24c] ss:$16 sps:$4 sm:$0xff]  }
 0x1af   : > { %1403 = vmatpush1.bf16.msra.mxu1 %v8612_v63  ;;  %v853_v63 = vld [vmem:[%s10358_s28 + $0xc0] sm:$0xff] }
 0x1b0   : > { %1404 = vmatprep.subr.bf16.mxu1 %v8617_v4  ;;  %v8639_v4 = vld [vmem:[#allocation7 + $0x188] ss:$16 sps:$4 sm:$0xff]   ;;  %v10466_v5 = vpack.c.bf16 %v855_v0, %v853_v63 }
 0x1b2   : > { %1336 = vmatmul.mubr.bf16.gmra.mrb[8].mxu1 %v10426_v8 }
 0x1b3   : > { %1405 = vmatpush1.bf16.msra.mxu1 %v8615_v10  ;;  %1345 = vmatprep.mubr.bf16.mxu1 %v10428_v11  ;;  %v857_v10 = vld [vmem:[%s10358_s28 + $0xe0] sm:$0xff] }
 0x1b4   : > { %1406 = vmatprep.subr.bf16.mxu1 %v8620_v12  ;;  %v859_v12 = vld [vmem:[%s10358_s28 + $0xf0] sm:$0xff]  ;;  %s10778_s28 = scalar_lea.vmem [#allocation22], %s10366_s26 }
 0x1b5   : > { %v10474_v16 = vpack.c.bf16 %v859_v12, %v857_v10 }
 0x1b7   : > { %1407 = vmatpush1.bf16.msra.mxu1 %v8618_v13  ;;  %v8647_v13 = vld [vmem:[#allocation7 + $0x1cc] ss:$16 sps:$4 sm:$0xff]  }
 0x1b8   : > { %1408 = vmatprep.subr.bf16.mxu1 %v8623_v19  ;;  %v8655_v19 = vld [vmem:[#allocation8 + $0xc] ss:$16 sps:$4 sm:$0xff]  }
 0x1ba   : > { %1346 = vmatmul.mubr.bf16.gmra.mrb[12].mxu1 %v10436_v23 }
 0x1bb   : > { %1409 = vmatpush1.bf16.msra.mxu1 %v8621_v25  ;;  %1355 = vmatprep.mubr.bf16.mxu1 %v10438_v26  ;;  %v8665_v25 = vld [vmem:[#allocation8 + $0x48] ss:$16 sps:$4 sm:$0xff]  }
 0x1bc   : > { %1410 = vmatprep.subr.bf16.mxu1 %v8626_v27  ;;  %v8673_v27 = vld [vmem:[#allocation8 + $0x6c] ss:$16 sps:$4 sm:$0xff]  }
 0x1bf   : > { %1411 = vmatpush1.bf16.msra.mxu1 %v8624_v28  ;;  %v8671_v28 = vld [vmem:[#allocation8 + $0x68] ss:$16 sps:$4 sm:$0xff]  }
 0x1c0   : > { %1412 = vmatprep.subr.bf16.mxu1 %v8629_v32  ;;  %v8735_v32 = vld [vmem:[#allocation8 + $0x1c4] ss:$16 sps:$4 sm:$0xff]  }
 0x1c1   : > { %2423 = vmatprep.subr.bf16.mxu0 %v8735_v32 }
 0x1c2   : > { %1356 = vmatmul.mubr.bf16.gmra.mrb[16].mxu1 %v10446_v39  ;;  %2424 = vmatpush1.bf16.msra.mxu0 %v8740_v33 }
 0x1c3   : > { %1413 = vmatpush1.bf16.msra.mxu1 %v8627_v38  ;;  %1365 = vmatprep.mubr.bf16.mxu1 %v10448_v41  ;;  %v8709_v38 = vld [vmem:[#allocation8 + $0x12c] ss:$16 sps:$4 sm:$0xff]  }
 0x1c4   : > { %1414 = vmatprep.subr.bf16.mxu1 %v8632_v40  ;;  %2425 = vmatprep.subr.bf16.mxu0 %v8741_v35  ;;  %v8715_v40 = vld [vmem:[#allocation8 + $0x14c] ss:$16 sps:$4 sm:$0xff]   ;;  %v8759_v35 = vld [vmem:[#allocation8 + $0x240] ss:$16 sps:$4 sm:$0xff]  }
 0x1c7   : > { %1415 = vmatpush1.bf16.msra.mxu1 %v8630_v45  ;;  %v8727_v45 = vld [vmem:[#allocation8 + $0x18c] ss:$16 sps:$4 sm:$0xff]  }
 0x1c8   : > { %1416 = vmatprep.subr.bf16.mxu1 %v8635_v49  ;;  %v8737_v49 = vld [vmem:[#allocation8 + $0x1c8] ss:$16 sps:$4 sm:$0xff]  }
 0x1ca   : > { %1366 = vmatmul.mubr.bf16.gmra.mrb[20].mxu1 %v10456_v55 }
 0x1cb   : > { %1417 = vmatpush1.bf16.msra.mxu1 %v8633_v54  ;;  %1375 = vmatprep.mubr.bf16.mxu1 %v10458_v57  ;;  %v10493_v54 = vshrl.u32 %v943_v53, 7 }
 0x1cc   : > { %1418 = vmatprep.subr.bf16.mxu1 %v8638_v56  ;;  %v10501_v56 = vld [vmem:[%s11563_s4] sm:$0xf]  ;;  %s11567_s4 = sld [smem:[#allocation44_spill]] }
 0x1cf   : > { %1419 = vmatpush1.bf16.msra.mxu1 %v8636_v62 }
 0x1d0   : > { %1420 = vmatprep.subr.bf16.mxu1 %v8641_v1 }
 0x1d2   : > { %1376 = vmatmul.mubr.bf16.gmra.mrb[24].mxu1 %v10466_v5 }
 0x1d3   : > { %1421 = vmatpush1.bf16.msra.mxu1 %v8639_v4  ;;  %1385 = vmatprep.mubr.bf16.mxu1 %v10468_v7 }
 0x1d4   : > { %1422 = vmatprep.subr.bf16.mxu1 %v8644_v6 }
 0x1d7   : > { %1423 = vmatpush1.bf16.msra.mxu1 %v8642_v9 }
 0x1d8   : > { %1424 = vmatprep.subr.bf16.mxu1 %v8647_v13 }
 0x1da   : > { %1386 = vmatmul.mubr.bf16.gmra.mrb[28].mxu1 %v10474_v16 }
 0x1db   : > { %1425 = vmatpush1.bf16.msra.mxu1 %v8645_v14  ;;  %1428 = vmatprep.mubr.bf16.mxu1 %v10399_v15  ;;  %v8679_v15 = vld [vmem:[#allocation8 + $0x8c] ss:$16 sps:$4 sm:$0xff]  }
 0x1dc   : > { %1426 = vmatprep.subr.bf16.mxu1 %v8650_v17  ;;  %v8750_v17 = vld [vmem:[#allocation8 + $0x208] ss:$16 sps:$4 sm:$0xff]  }
 0x1df   : > { %1427 = vmatpush1.bf16.msra.mxu1 %v8648_v18 }
 0x1e0   : > { %2621 = vmatprep.subr.bf16.mxu1 %v8655_v19 }
 0x1e2   : > { %1429 = vmatmul.mubr.bf16.vlgmr.msra.gmra.mrb[32].mxu1 %v10406_v44  ;;  %v8683_v44 = vld [vmem:[#allocation8 + $0xa8] ss:$16 sps:$4 sm:$0xff]  }
 0x1e3   : > { %1438 = vmatprep.mubr.bf16.mxu1 %v10408_v47  ;;  %2622 = vmatpush1.bf16.msra.mxu1 %v8653_v20  ;;  %v8691_v47 = vld [vmem:[#allocation8 + $0xcc] ss:$16 sps:$4 sm:$0xff]   ;;  %v8755_v20 = vld [vmem:[#allocation8 + $0x224] ss:$16 sps:$4 sm:$0xff]  }
 0x1e4   : > { %2623 = vmatprep.subr.bf16.mxu1 %v8661_v21  ;;  %v8758_v21 = vld [vmem:[#allocation8 + $0x22c] ss:$16 sps:$4 sm:$0xff]  }
 0x1e7   : > { %2624 = vmatpush1.bf16.msra.mxu1 %v8659_v22 }
 0x1e8   : > { %2625 = vmatprep.subr.bf16.mxu1 %v8667_v24 }
 0x1ea   : > { %1439 = vmatmul.mubr.bf16.gmra.mrb[36].mxu1 %v10416_v58  ;;  %v8689_v58 = vld [vmem:[#allocation8 + $0xc8] ss:$16 sps:$4 sm:$0xff]  }
 0x1eb   : > { %1448 = vmatprep.mubr.bf16.mxu1 %v10418_v61  ;;  %2626 = vmatpush1.bf16.msra.mxu1 %v8665_v25  ;;  %v8697_v61 = vld [vmem:[#allocation8 + $0xec] ss:$16 sps:$4 sm:$0xff]  }
 0x1ec   : > { %2627 = vmatprep.subr.bf16.mxu1 %v8673_v27 }
 0x1ef   : > { %2628 = vmatpush1.bf16.msra.mxu1 %v8671_v28 }
 0x1f0   : > { %2629 = vmatprep.subr.bf16.mxu1 %v8679_v15  ;;  %v8753_v15 = vld [vmem:[#allocation8 + $0x220] ss:$16 sps:$4 sm:$0xff]  }
 0x1f2   : > { %1449 = vmatmul.mubr.bf16.gmra.mrb[40].mxu1 %v10426_v8  ;;  %v8703_v8 = vld [vmem:[#allocation8 + $0x10c] ss:$16 sps:$4 sm:$0xff]  }
 0x1f3   : > { %1458 = vmatprep.mubr.bf16.mxu1 %v10428_v11  ;;  %2630 = vmatpush1.bf16.msra.mxu1 %v8677_v29  ;;  %v8746_v11 = vld [vmem:[#allocation8 + $0x1e0] ss:$16 sps:$4 sm:$0xff]   ;;  %v8756_v29 = vld [vmem:[#allocation8 + $0x228] ss:$16 sps:$4 sm:$0xff]  }
 0x1f4   : > { %2631 = vmatprep.subr.bf16.mxu1 %v8685_v30  ;;  %2426 = vmatpush1.bf16.msra.mxu0 %v8746_v11 }
 0x1f5   : > { %2508 = vmatprep.subr.bf16.mxu0 %v8749_v36 }
 0x1f7   : > { %2632 = vmatpush1.bf16.msra.mxu1 %v8683_v44 }
 0x1f8   : > { %2633 = vmatprep.subr.bf16.mxu1 %v8691_v47  ;;  %v8761_v47 = vld [vmem:[#allocation8 + $0x244] ss:$16 sps:$4 sm:$0xff]  }
 0x1fa   : > { %1459 = vmatmul.mubr.bf16.gmra.mrb[44].mxu1 %v10436_v23  ;;  %v8707_v23 = vld [vmem:[#allocation8 + $0x128] ss:$16 sps:$4 sm:$0xff]  }
 0x1fb   : > { %1468 = vmatprep.mubr.bf16.mxu1 %v10438_v26  ;;  %2634 = vmatpush1.bf16.msra.mxu1 %v8689_v58  ;;  %v8713_v26 = vld [vmem:[#allocation8 + $0x148] ss:$16 sps:$4 sm:$0xff]  }
 0x1fc   : > { %2635 = vmatprep.subr.bf16.mxu1 %v8697_v61 }
 0x1ff   : > { %2636 = vmatpush1.bf16.msra.mxu1 %v8695_v34 }
 0x200   : > { %2637 = vmatprep.subr.bf16.mxu1 %v8703_v8  ;;  %v8762_v8 = vld [vmem:[#allocation8 + $0x248] ss:$16 sps:$4 sm:$0xff]  }
 0x202   : > { %1469 = vmatmul.mubr.bf16.gmra.mrb[48].mxu1 %v10446_v39  ;;  %v8725_v39 = vld [vmem:[#allocation8 + $0x188] ss:$16 sps:$4 sm:$0xff]  }
 0x203   : > { %1478 = vmatprep.mubr.bf16.mxu1 %v10448_v41  ;;  %2638 = vmatpush1.bf16.msra.mxu1 %v8701_v37  ;;  %v8731_v41 = vld [vmem:[#allocation8 + $0x1a8] ss:$16 sps:$4 sm:$0xff]   ;;  %v8767_v37 = vld [vmem:[#allocation8 + $0x264] ss:$16 sps:$4 sm:$0xff]  }
 0x204   : > { %2639 = vmatprep.subr.bf16.mxu1 %v8709_v38  ;;  %v8770_v38 = vld [vmem:[#allocation8 + $0x26c] ss:$16 sps:$4 sm:$0xff]  }
 0x207   : > { %2640 = vmatpush1.bf16.msra.mxu1 %v8707_v23 }
 0x208   : > { %2641 = vmatprep.subr.bf16.mxu1 %v8715_v40 }
 0x20a   : > { %1479 = vmatmul.mubr.bf16.gmra.mrb[52].mxu1 %v10456_v55  ;;  %v10496_v55 = vsub.s32 0, %v10493_v54 }
 0x20b   : > { %1488 = vmatprep.mubr.bf16.mxu1 %v10458_v57  ;;  %2642 = vmatpush1.bf16.msra.mxu1 %v8713_v26  ;;  %v10504_v57 = vsub.s32 1, %v10493_v54 }
 0x20c   : > { %2643 = vmatprep.subr.bf16.mxu1 %v8721_v42  ;;  %v10508_v59 = vrot.slane %v10501_v56, %v10496_v55 }
 0x20d   : > { %v10512_v60 = vrot.slane %v10501_v56, %v10504_v57 }
 0x20f   : > { %2644 = vmatpush1.bf16.msra.mxu1 %v8719_v43 }
 0x210   : > { %2645 = vmatprep.subr.bf16.mxu1 %v8727_v45  ;;  %v8765_v45 = vld [vmem:[#allocation8 + $0x260] ss:$16 sps:$4 sm:$0xff]  }
 0x212   : > { %1489 = vmatmul.mubr.bf16.gmra.mrb[56].mxu1 %v10466_v5 }
 0x213   : > { %1498 = vmatprep.mubr.bf16.mxu1 %v10468_v7  ;;  %2646 = vmatpush1.bf16.msra.mxu1 %v8725_v39  ;;  %v8768_v39 = vld [vmem:[#allocation8 + $0x268] ss:$16 sps:$4 sm:$0xff]  }
 0x214   : > { %2647 = vmatprep.subr.bf16.mxu1 %v8733_v46 }
 0x217   : > { %2648 = vmatpush1.bf16.msra.mxu1 %v8731_v41 }
 0x218   : > { %2649 = vmatprep.subr.bf16.mxu1 %v8739_v48  ;;  %v8773_v48 = vld [vmem:[#allocation8 + $0x284] ss:$16 sps:$4 sm:$0xff]  }
 0x21a   : > { %1499 = vmatmul.mubr.bf16.gmra.mrb[60].mxu1 %v10474_v16  ;;  %v8747_v16 = vld [vmem:[#allocation8 + $0x200] ss:$16 sps:$4 sm:$0xff]  }
 0x21b   : > { %2650 = vmatpush1.bf16.msra.mxu1 %v8737_v49  ;;  %v8776_v49 = vld [vmem:[#allocation8 + $0x28c] ss:$16 sps:$4 sm:$0xff]  }
 0x21c   : > { %2651 = vmatprep.subr.bf16.mxu1 %v8745_v50 }
 0x21f   : > { %2652 = vmatpush1.bf16.msra.mxu1 %v8743_v51 }
 0x220   : > { %2734 = vmatprep.subr.bf16.mxu1 %v8752_v52 }
 0x275   : > { %v1317_v62 = vpop.f32.mrb[0].mxu1 }
 0x276   : > { %v1318_v63 = vadd.f32 %v1317_v62, %v10508_v59  ;;  %v1319_v0 = vpop.f32.mrb[1].mxu1 }
 0x277   : > { %v1320_v1 = vadd.f32 %v1319_v0, %v10512_v60  ;;  %v1321_v2 = vpop.f32.mrb[2].mxu1  ;;  %v8774_v0 = vld [vmem:[#allocation8 + $0x288] ss:$16 sps:$4 sm:$0xff]  }
 0x278   : > { %v1322_v3 = vadd.f32 %v1321_v2, %v10508_v59  ;;  %v1323_v4 = vpop.f32.mrb[3].mxu1  ;;  %v1509_v6 = vmax.f32 %v1318_v63, 0.0  ;;  %v8771_v63 = vld [vmem:[#allocation8 + $0x280] ss:$16 sps:$4 sm:$0xff]  }
 0x279   : > { %v1324_v5 = vadd.f32 %v1323_v4, %v10512_v60  ;;  %v1510_v9 = vmax.f32 %v1320_v1, 0.0  ;;  %v8782_v4 = vld [vmem:[#allocation8 + $0x2ac] ss:$16 sps:$4 sm:$0xff]  }
 0x27a   : > { %v1513_v7 = vmax.f32 %v1322_v3, 0.0  ;;  %v8779_v3 = vld [vmem:[#allocation8 + $0x2a4] ss:$16 sps:$4 sm:$0xff]  }
 0x27b   : > { %v1514_v10 = vmax.f32 %v1324_v5, 0.0 }
 0x27c   : > { %v1573_v12 = vpack.c.bf16 %v1513_v7, %v1509_v6 }
 0x27d   : > { %v1327_v13 = vpop.f32.mrb[4].mxu1  ;;  %v1574_v14 = vpack.c.bf16 %v1514_v10, %v1510_v9 }
 0x27e   : > { %v1328_v18 = vadd.f32 %v1327_v13, %v10508_v59  ;;  %v1329_v19 = vpop.f32.mrb[5].mxu1  ;;  %v8780_v13 = vld [vmem:[#allocation8 + $0x2a8] ss:$16 sps:$4 sm:$0xff]  }
 0x27f   : > { %v1330_v22 = vadd.f32 %v1329_v19, %v10512_v60  ;;  %v1331_v24 = vpop.f32.mrb[6].mxu1  ;;  %2427 = vmatprep.mubr.bf16.mxu0 %v1574_v14  ;;  %2653 = vmatprep.mubr.bf16.mxu1 %v1574_v14 }
 0x280   : > { %v1332_v25 = vadd.f32 %v1331_v24, %v10508_v59  ;;  %v1333_v27 = vpop.f32.mrb[7].mxu1  ;;  %2428 = vmatmul.mubr.bf16.vlgmr.msra.gmra.mrb[0].mxu0 %v1573_v12  ;;  %2654 = vmatmul.mubr.bf16.vlgmr.msra.gmra.mrb[64].mxu1 %v1573_v12  ;;  %v1517_v30 = vmax.f32 %v1328_v18, 0.0  ;;  %v8777_v12 = vld [vmem:[#allocation8 + $0x2a0] ss:$16 sps:$4 sm:$0xff]   ;;  %v8788_v18 = vld [vmem:[#allocation8 + $0x2cc] ss:$16 sps:$4 sm:$0xff]  }
 0x281   : > { %v1334_v28 = vadd.f32 %v1333_v27, %v10512_v60  ;;  %2509 = vmatpush1.bf16.msra.mxu0 %v8747_v16  ;;  %2735 = vmatpush1.bf16.msra.mxu1 %v8750_v17  ;;  %v1518_v58 = vmax.f32 %v1330_v22, 0.0  ;;  %v8785_v17 = vld [vmem:[#allocation8 + $0x2c4] ss:$16 sps:$4 sm:$0xff]   ;;  %v8786_v27 = vld [vmem:[#allocation8 + $0x2c8] ss:$16 sps:$4 sm:$0xff]  }
 0x282   : > { %v1521_v44 = vmax.f32 %v1332_v25, 0.0  ;;  %2510 = vmatprep.subr.bf16.mxu0 %v8755_v20  ;;  %2736 = vmatprep.subr.bf16.mxu1 %v8758_v21  ;;  %v8783_v25 = vld [vmem:[#allocation8 + $0x2c0] ss:$16 sps:$4 sm:$0xff]  }
 0x283   : > { %v1522_v32 = vmax.f32 %v1334_v28, 0.0 }
 0x284   : > { %v1577_v61 = vpack.c.bf16 %v1521_v44, %v1517_v30  ;;  %v8794_v30 = vld [vmem:[#allocation8 + $0x2ec] ss:$16 sps:$4 sm:$0xff]  }
 0x285   : > { %v1578_v33 = vpack.c.bf16 %v1522_v32, %v1518_v58  ;;  %v1337_v34 = vpop.f32.mrb[8].mxu1  ;;  %2511 = vmatpush1.bf16.msra.mxu0 %v8753_v15  ;;  %2737 = vmatpush1.bf16.msra.mxu1 %v8756_v29  ;;  %v8791_v29 = vld [vmem:[#allocation8 + $0x2e4] ss:$16 sps:$4 sm:$0xff]  }
 0x286   : > { %v1338_v11 = vadd.f32 %v1337_v34, %v10508_v59  ;;  %v1339_v36 = vpop.f32.mrb[9].mxu1  ;;  %2512 = vmatprep.subr.bf16.mxu0 %v8761_v47  ;;  %2738 = vmatprep.subr.bf16.mxu1 %v8764_v31 }
 0x287   : > { %v1340_v23 = vadd.f32 %v1339_v36, %v10512_v60  ;;  %v1341_v40 = vpop.f32.mrb[10].mxu1  ;;  %2437 = vmatprep.mubr.bf16.mxu0 %v1578_v33  ;;  %2663 = vmatprep.mubr.bf16.mxu1 %v1578_v33  ;;  %v8792_v33 = vld [vmem:[#allocation8 + $0x2e8] ss:$16 sps:$4 sm:$0xff]  }
 0x288   : > { %v1342_v26 = vadd.f32 %v1341_v40, %v10508_v59  ;;  %v1343_v42 = vpop.f32.mrb[11].mxu1  ;;  %2438 = vmatmul.mubr.bf16.gmra.mrb[4].mxu0 %v1577_v61  ;;  %2664 = vmatmul.mubr.bf16.gmra.mrb[68].mxu1 %v1577_v61  ;;  %v1525_v46 = vmax.f32 %v1338_v11, 0.0  ;;  %v8789_v61 = vld [vmem:[#allocation8 + $0x2e0] ss:$16 sps:$4 sm:$0xff]   ;;  %v8800_v11 = vld [vmem:[#allocation8 + $0x30c] ss:$16 sps:$4 sm:$0xff]  }
 0x289   : > { %v1344_v43 = vadd.f32 %v1343_v42, %v10512_v60  ;;  %2513 = vmatpush1.bf16.msra.mxu0 %v8759_v35  ;;  %2739 = vmatpush1.bf16.msra.mxu1 %v8762_v8  ;;  %v1526_v50 = vmax.f32 %v1340_v23, 0.0  ;;  %v8797_v8 = vld [vmem:[#allocation8 + $0x304] ss:$16 sps:$4 sm:$0xff]   ;;  %v8798_v42 = vld [vmem:[#allocation8 + $0x308] ss:$16 sps:$4 sm:$0xff]  }
 0x28a   : > { %v1529_v41 = vmax.f32 %v1342_v26, 0.0  ;;  %2514 = vmatprep.subr.bf16.mxu0 %v8767_v37  ;;  %2740 = vmatprep.subr.bf16.mxu1 %v8770_v38  ;;  %v8795_v26 = vld [vmem:[#allocation8 + $0x300] ss:$16 sps:$4 sm:$0xff]  }
 0x28b   : > { %v1530_v51 = vmax.f32 %v1344_v43, 0.0 }
 0x28c   : > { %v1581_v52 = vpack.c.bf16 %v1529_v41, %v1525_v46  ;;  %v8806_v46 = vld [vmem:[#allocation8 + $0x32c] ss:$16 sps:$4 sm:$0xff]  }
 0x28d   : > { %v1582_v53 = vpack.c.bf16 %v1530_v51, %v1526_v50  ;;  %v1347_v62 = vpop.f32.mrb[12].mxu1  ;;  %2515 = vmatpush1.bf16.msra.mxu0 %v8765_v45  ;;  %2741 = vmatpush1.bf16.msra.mxu1 %v8768_v39  ;;  %v8803_v39 = vld [vmem:[#allocation8 + $0x324] ss:$16 sps:$4 sm:$0xff]  }
 0x28e   : > { %v1348_v1 = vadd.f32 %v1347_v62, %v10508_v59  ;;  %v1349_v2 = vpop.f32.mrb[13].mxu1  ;;  %2516 = vmatprep.subr.bf16.mxu0 %v8773_v48  ;;  %2742 = vmatprep.subr.bf16.mxu1 %v8776_v49 }
 0x28f   : > { %v1350_v5 = vadd.f32 %v1349_v2, %v10512_v60  ;;  %v1351_v6 = vpop.f32.mrb[14].mxu1  ;;  %2447 = vmatprep.mubr.bf16.mxu0 %v1582_v53  ;;  %2673 = vmatprep.mubr.bf16.mxu1 %v1582_v53  ;;  %v8804_v53 = vld [vmem:[#allocation8 + $0x328] ss:$16 sps:$4 sm:$0xff]  }
 0x290   : > { %v1352_v7 = vadd.f32 %v1351_v6, %v10508_v59  ;;  %v1353_v9 = vpop.f32.mrb[15].mxu1  ;;  %2448 = vmatmul.mubr.bf16.gmra.mrb[8].mxu0 %v1581_v52  ;;  %2674 = vmatmul.mubr.bf16.gmra.mrb[72].mxu1 %v1581_v52  ;;  %v1533_v14 = vmax.f32 %v1348_v1, 0.0  ;;  %v8801_v52 = vld [vmem:[#allocation8 + $0x320] ss:$16 sps:$4 sm:$0xff]   ;;  %v8812_v1 = vld [vmem:[#allocation8 + $0x34c] ss:$16 sps:$4 sm:$0xff]  }
 0x291   : > { %v1354_v10 = vadd.f32 %v1353_v9, %v10512_v60  ;;  %2517 = vmatpush1.bf16.msra.mxu0 %v8771_v63  ;;  %2743 = vmatpush1.bf16.msra.mxu1 %v8774_v0  ;;  %v1534_v19 = vmax.f32 %v1350_v5, 0.0  ;;  %v8809_v0 = vld [vmem:[#allocation8 + $0x344] ss:$16 sps:$4 sm:$0xff]   ;;  %v8810_v9 = vld [vmem:[#allocation8 + $0x348] ss:$16 sps:$4 sm:$0xff]  }
 0x292   : > { %v1537_v16 = vmax.f32 %v1352_v7, 0.0  ;;  %2518 = vmatprep.subr.bf16.mxu0 %v8779_v3  ;;  %2744 = vmatprep.subr.bf16.mxu1 %v8782_v4  ;;  %v8807_v7 = vld [vmem:[#allocation8 + $0x340] ss:$16 sps:$4 sm:$0xff]  }
 0x293   : > { %v1538_v20 = vmax.f32 %v1354_v10, 0.0 }
 0x294   : > { %v1585_v21 = vpack.c.bf16 %v1537_v16, %v1533_v14  ;;  %v8818_v14 = vld [vmem:[#allocation8 + $0x36c] ss:$16 sps:$4 sm:$0xff]  }
 0x295   : > { %v1586_v22 = vpack.c.bf16 %v1538_v20, %v1534_v19  ;;  %v1357_v24 = vpop.f32.mrb[16].mxu1  ;;  %2519 = vmatpush1.bf16.msra.mxu0 %v8777_v12  ;;  %2745 = vmatpush1.bf16.msra.mxu1 %v8780_v13  ;;  %v8815_v13 = vld [vmem:[#allocation8 + $0x364] ss:$16 sps:$4 sm:$0xff]  }
 0x296   : > { %v1358_v28 = vadd.f32 %v1357_v24, %v10508_v59  ;;  %v1359_v15 = vpop.f32.mrb[17].mxu1  ;;  %2520 = vmatprep.subr.bf16.mxu0 %v8785_v17  ;;  %2746 = vmatprep.subr.bf16.mxu1 %v8788_v18 }
 0x297   : > { %v1360_v44 = vadd.f32 %v1359_v15, %v10512_v60  ;;  %v1361_v47 = vpop.f32.mrb[18].mxu1  ;;  %2457 = vmatprep.mubr.bf16.mxu0 %v1586_v22  ;;  %2683 = vmatprep.mubr.bf16.mxu1 %v1586_v22  ;;  %v8816_v22 = vld [vmem:[#allocation8 + $0x368] ss:$16 sps:$4 sm:$0xff]  }
 0x298   : > { %v1362_v31 = vadd.f32 %v1361_v47, %v10508_v59  ;;  %v1363_v58 = vpop.f32.mrb[19].mxu1  ;;  %2458 = vmatmul.mubr.bf16.gmra.mrb[12].mxu0 %v1585_v21  ;;  %2684 = vmatmul.mubr.bf16.gmra.mrb[76].mxu1 %v1585_v21  ;;  %v1541_v34 = vmax.f32 %v1358_v28, 0.0  ;;  %v8813_v21 = vld [vmem:[#allocation8 + $0x360] ss:$16 sps:$4 sm:$0xff]   ;;  %v8824_v28 = vld [vmem:[#allocation8 + $0x38c] ss:$16 sps:$4 sm:$0xff]  }
 0x299   : > { %v1364_v32 = vadd.f32 %v1363_v58, %v10512_v60  ;;  %2521 = vmatpush1.bf16.msra.mxu0 %v8783_v25  ;;  %2747 = vmatpush1.bf16.msra.mxu1 %v8786_v27  ;;  %v1542_v36 = vmax.f32 %v1360_v44, 0.0  ;;  %v8821_v27 = vld [vmem:[#allocation8 + $0x384] ss:$16 sps:$4 sm:$0xff]   ;;  %v8822_v58 = vld [vmem:[#allocation8 + $0x388] ss:$16 sps:$4 sm:$0xff]  }
 0x29a   : > { %v1545_v35 = vmax.f32 %v1362_v31, 0.0  ;;  %2522 = vmatprep.subr.bf16.mxu0 %v8791_v29  ;;  %2748 = vmatprep.subr.bf16.mxu1 %v8794_v30  ;;  %v8819_v31 = vld [vmem:[#allocation8 + $0x380] ss:$16 sps:$4 sm:$0xff]  }
 0x29b   : > { %v1546_v37 = vmax.f32 %v1364_v32, 0.0 }
 0x29c   : > { %v1589_v38 = vpack.c.bf16 %v1545_v35, %v1541_v34  ;;  %v8830_v34 = vld [vmem:[#allocation8 + $0x3ac] ss:$16 sps:$4 sm:$0xff]   ;;  %v10544_v35 = vsub.s32 2, %v10493_v54 }
 0x29d   : > { %v1590_v23 = vpack.c.bf16 %v1546_v37, %v1542_v36  ;;  %v1367_v40 = vpop.f32.mrb[20].mxu1  ;;  %2523 = vmatpush1.bf16.msra.mxu0 %v8789_v61  ;;  %2749 = vmatpush1.bf16.msra.mxu1 %v8792_v33  ;;  %v8827_v33 = vld [vmem:[#allocation8 + $0x3a4] ss:$16 sps:$4 sm:$0xff]   ;;  %v10548_v36 = vsub.s32 3, %v10493_v54 }
 0x29e   : > { %v1368_v43 = vadd.f32 %v1367_v40, %v10508_v59  ;;  %v1369_v45 = vpop.f32.mrb[21].mxu1  ;;  %2524 = vmatprep.subr.bf16.mxu0 %v8797_v8  ;;  %2750 = vmatprep.subr.bf16.mxu1 %v8800_v11  ;;  %v8825_v40 = vld [vmem:[#allocation8 + $0x3a0] ss:$16 sps:$4 sm:$0xff]   ;;  %v8833_v54 = vld [vmem:[#allocation8 + $0x3c4] ss:$16 sps:$4 sm:$0xff]  }
 0x29f   : > { %v1370_v41 = vadd.f32 %v1369_v45, %v10512_v60  ;;  %v1371_v48 = vpop.f32.mrb[22].mxu1  ;;  %2467 = vmatprep.mubr.bf16.mxu0 %v1590_v23  ;;  %2693 = vmatprep.mubr.bf16.mxu1 %v1590_v23  ;;  %v10554_v45 = vrot.slane %v10501_v56, %v10544_v35 }
 0x2a0   : > { %v1372_v49 = vadd.f32 %v1371_v48, %v10508_v59  ;;  %v1373_v50 = vpop.f32.mrb[23].mxu1  ;;  %2468 = vmatmul.mubr.bf16.gmra.mrb[16].mxu0 %v1589_v38  ;;  %2694 = vmatmul.mubr.bf16.gmra.mrb[80].mxu1 %v1589_v38  ;;  %v1549_v62 = vmax.f32 %v1368_v43, 0.0 }
 0x2a1   : > { %v1374_v51 = vadd.f32 %v1373_v50, %v10512_v60  ;;  %2525 = vmatpush1.bf16.msra.mxu0 %v8795_v26  ;;  %2751 = vmatpush1.bf16.msra.mxu1 %v8798_v42  ;;  %v1550_v2 = vmax.f32 %v1370_v41, 0.0  ;;  %v8828_v26 = vld [vmem:[#allocation8 + $0x3a8] ss:$16 sps:$4 sm:$0xff]   ;;  %v10558_v41 = vrot.slane %v10501_v56, %v10548_v36  ;;  %v8831_v50 = vld [vmem:[#allocation8 + $0x3c0] ss:$16 sps:$4 sm:$0xff]  }
 0x2a2   : > { %v1553_v63 = vmax.f32 %v1372_v49, 0.0  ;;  %2526 = vmatprep.subr.bf16.mxu0 %v8803_v39  ;;  %2752 = vmatprep.subr.bf16.mxu1 %v8806_v46  ;;  %v8836_v39 = vld [vmem:[#allocation8 + $0x3cc] ss:$16 sps:$4 sm:$0xff]  }
 0x2a3   : > { %v1554_v3 = vmax.f32 %v1374_v51, 0.0  ;;  %v8834_v51 = vld [vmem:[#allocation8 + $0x3c8] ss:$16 sps:$4 sm:$0xff]  }
 0x2a4   : > { %v1593_v4 = vpack.c.bf16 %v1553_v63, %v1549_v62  ;;  %v8839_v62 = vld [vmem:[#allocation8 + $0x3e4] ss:$16 sps:$4 sm:$0xff]   ;;  %v8842_v63 = vld [vmem:[#allocation8 + $0x3ec] ss:$16 sps:$4 sm:$0xff]  }
 0x2a5   : > { %v1594_v5 = vpack.c.bf16 %v1554_v3, %v1550_v2  ;;  %v1377_v6 = vpop.f32.mrb[24].mxu1  ;;  %2527 = vmatpush1.bf16.msra.mxu0 %v8801_v52  ;;  %2753 = vmatpush1.bf16.msra.mxu1 %v8804_v53 }
 0x2a6   : > { %v1378_v10 = vadd.f32 %v1377_v6, %v10508_v59  ;;  %v1379_v12 = vpop.f32.mrb[25].mxu1  ;;  %2528 = vmatprep.subr.bf16.mxu0 %v8809_v0  ;;  %2754 = vmatprep.subr.bf16.mxu1 %v8812_v1 }
 0x2a7   : > { %v1380_v16 = vadd.f32 %v1379_v12, %v10512_v60  ;;  %v1381_v17 = vpop.f32.mrb[26].mxu1  ;;  %2477 = vmatprep.mubr.bf16.mxu0 %v1594_v5  ;;  %2703 = vmatprep.mubr.bf16.mxu1 %v1594_v5  ;;  %v8840_v5 = vld [vmem:[#allocation8 + $0x3e8] ss:$16 sps:$4 sm:$0xff]  }
 0x2a8   : > { %v1382_v18 = vadd.f32 %v1381_v17, %v10508_v59  ;;  %v1383_v19 = vpop.f32.mrb[27].mxu1  ;;  %2478 = vmatmul.mubr.bf16.gmra.mrb[20].mxu0 %v1593_v4  ;;  %2704 = vmatmul.mubr.bf16.gmra.mrb[84].mxu1 %v1593_v4  ;;  %v1557_v24 = vmax.f32 %v1378_v10, 0.0  ;;  %v8837_v4 = vld [vmem:[#allocation8 + $0x3e0] ss:$16 sps:$4 sm:$0xff]  }
 0x2a9   : > { %v1384_v20 = vadd.f32 %v1383_v19, %v10512_v60  ;;  %2529 = vmatpush1.bf16.msra.mxu0 %v8807_v7  ;;  %2755 = vmatpush1.bf16.msra.mxu1 %v8810_v9  ;;  %v1558_v15 = vmax.f32 %v1380_v16, 0.0  ;;  %v8845_v9 = vld [vmem:[#allocation10 + $0x4] ss:$8 sps:$4 sm:$0xff]   ;;  %v8843_v17 = vld [vmem:[#allocation10] ss:$8 sps:$4 sm:$0xff]  }
 0x2aa   : > { %v1561_v25 = vmax.f32 %v1382_v18, 0.0  ;;  %2530 = vmatprep.subr.bf16.mxu0 %v8815_v13  ;;  %2756 = vmatprep.subr.bf16.mxu1 %v8818_v14 }
 0x2ab   : > { %v1562_v29 = vmax.f32 %v1384_v20, 0.0  ;;  %v8848_v20 = vld [vmem:[#allocation10 + $0x14] ss:$8 sps:$4 sm:$0xff]  }
 0x2ac   : > { %v1597_v30 = vpack.c.bf16 %v1561_v25, %v1557_v24 }
 0x2ad   : > { %v1598_v44 = vpack.c.bf16 %v1562_v29, %v1558_v15  ;;  %v1387_v47 = vpop.f32.mrb[28].mxu1  ;;  %2531 = vmatpush1.bf16.msra.mxu0 %v8813_v21  ;;  %2757 = vmatpush1.bf16.msra.mxu1 %v8816_v22 }
 0x2ae   : > { %v1388_v32 = vadd.f32 %v1387_v47, %v10508_v59  ;;  %v1389_v61 = vpop.f32.mrb[29].mxu1  ;;  %2532 = vmatprep.subr.bf16.mxu0 %v8821_v27  ;;  %2758 = vmatprep.subr.bf16.mxu1 %v8824_v28  ;;  %v8846_v28 = vld [vmem:[#allocation10 + $0x10] ss:$8 sps:$4 sm:$0xff]  }
 0x2af   : > { %v1390_v8 = vadd.f32 %v1389_v61, %v10512_v60  ;;  %v1391_v11 = vpop.f32.mrb[30].mxu1  ;;  %2487 = vmatprep.mubr.bf16.mxu0 %v1598_v44  ;;  %2713 = vmatprep.mubr.bf16.mxu1 %v1598_v44  ;;  %v8849_v61 = vld [vmem:[#allocation10 + $0x20] ss:$8 sps:$4 sm:$0xff]  }
 0x2b0   : > { %v1392_v37 = vadd.f32 %v1391_v11, %v10508_v59  ;;  %v1393_v38 = vpop.f32.mrb[31].mxu1  ;;  %2488 = vmatmul.mubr.bf16.gmra.mrb[24].mxu0 %v1597_v30  ;;  %2714 = vmatmul.mubr.bf16.gmra.mrb[88].mxu1 %v1597_v30  ;;  %v1565_v42 = vmax.f32 %v1388_v32, 0.0  ;;  %v8851_v30 = vld [vmem:[#allocation10 + $0x24] ss:$8 sps:$4 sm:$0xff]  }
 0x2b1   : > { %v1394_v23 = vadd.f32 %v1393_v38, %v10512_v60  ;;  %2533 = vmatpush1.bf16.msra.mxu0 %v8819_v31  ;;  %2759 = vmatpush1.bf16.msra.mxu1 %v8822_v58  ;;  %v1566_v59 = vmax.f32 %v1390_v8, 0.0  ;;  %v8854_v8 = vld [vmem:[#allocation10 + $0x34] ss:$8 sps:$4 sm:$0xff]  }
 0x2b2   : > { %v1569_v43 = vmax.f32 %v1392_v37, 0.0  ;;  %2534 = vmatprep.subr.bf16.mxu0 %v8827_v33  ;;  %2760 = vmatprep.subr.bf16.mxu1 %v8830_v34 }
 0x2b3   : > { %v1570_v46 = vmax.f32 %v1394_v23, 0.0 }
 0x2b4   : > { %v1601_v60 = vpack.c.bf16 %v1569_v43, %v1565_v42 }
 0x2b5   : > { %v1602_v48 = vpack.c.bf16 %v1570_v46, %v1566_v59  ;;  %v1430_v49 = vpop.f32.mrb[32].mxu1  ;;  %2535 = vmatpush1.bf16.msra.mxu0 %v8825_v40  ;;  %2761 = vmatpush1.bf16.msra.mxu1 %v8828_v26  ;;  %v8852_v26 = vld [vmem:[#allocation10 + $0x30] ss:$8 sps:$4 sm:$0xff]  }
 0x2b6   : > { %v1431_v52 = vadd.f32 %v1430_v49, %v10554_v45  ;;  %v1432_v53 = vpop.f32.mrb[33].mxu1  ;;  %2536 = vmatprep.subr.bf16.mxu0 %v8833_v54  ;;  %2762 = vmatprep.subr.bf16.mxu1 %v8836_v39  ;;  %v8857_v54 = vld [vmem:[#allocation10 + $0x44] ss:$8 sps:$4 sm:$0xff]   ;;  %v8855_v49 = vld [vmem:[#allocation10 + $0x40] ss:$8 sps:$4 sm:$0xff]  }
 0x2b7   : > { %v1433_v0 = vadd.f32 %v1432_v53, %v10558_v41  ;;  %v1434_v1 = vpop.f32.mrb[34].mxu1  ;;  %2497 = vmatprep.mubr.bf16.mxu0 %v1602_v48  ;;  %2723 = vmatprep.mubr.bf16.mxu1 %v1602_v48 }
 0x2b8   : > { %v1435_v56 = vadd.f32 %v1434_v1, %v10554_v45  ;;  %v1436_v2 = vpop.f32.mrb[35].mxu1  ;;  %2498 = vmatmul.mubr.bf16.gmra.mrb[28].mxu0 %v1601_v60  ;;  %2724 = vmatmul.mubr.bf16.gmra.mrb[92].mxu1 %v1601_v60  ;;  %v1511_v6 = vmax.f32 %v1431_v52, 0.0  ;;  %v8860_v52 = vld [vmem:[#allocation10 + $0x54] ss:$8 sps:$4 sm:$0xff]  }
 0x2b9   : > { %v1437_v3 = vadd.f32 %v1436_v2, %v10558_v41  ;;  %2537 = vmatpush1.bf16.msra.mxu0 %v8831_v50  ;;  %2763 = vmatpush1.bf16.msra.mxu1 %v8834_v51  ;;  %v1512_v10 = vmax.f32 %v1433_v0, 0.0 }
 0x2ba   : > { %v1515_v7 = vmax.f32 %v1435_v56, 0.0  ;;  %2538 = vmatprep.subr.bf16.mxu0 %v8839_v62  ;;  %2764 = vmatprep.subr.bf16.mxu1 %v8842_v63  ;;  %v8858_v56 = vld [vmem:[#allocation10 + $0x50] ss:$8 sps:$4 sm:$0xff]  }
 0x2bb   : > { %v1516_v12 = vmax.f32 %v1437_v3, 0.0 }
 0x2bc   : > { %v1575_v13 = vpack.c.bf16 %v1515_v7, %v1511_v6 }
 0x2bd   : > { %v1576_v14 = vpack.c.bf16 %v1516_v12, %v1512_v10  ;;  %v1440_v16 = vpop.f32.mrb[36].mxu1  ;;  %2539 = vmatpush1.bf16.msra.mxu0 %v8837_v4  ;;  %2765 = vmatpush1.bf16.msra.mxu1 %v8840_v5  ;;  %v8863_v4 = vld [vmem:[#allocation10 + $0x64] ss:$8 sps:$4 sm:$0xff]   ;;  %v8861_v12 = vld [vmem:[#allocation10 + $0x60] ss:$8 sps:$4 sm:$0xff]  }
 0x2be   : > { %v1441_v18 = vadd.f32 %v1440_v16, %v10554_v45  ;;  %v1442_v19 = vpop.f32.mrb[37].mxu1  ;;  %3339 = vmatprep.subr.bf16.mxu0 %v8845_v9  ;;  %v8866_v16 = vld [vmem:[#allocation10 + $0x74] ss:$8 sps:$4 sm:$0xff]  }
 0x2bf   : > { %v1443_v21 = vadd.f32 %v1442_v19, %v10558_v41  ;;  %v1444_v22 = vpop.f32.mrb[38].mxu1  ;;  %2540 = vmatprep.mubr.bf16.mxu0 %v1576_v14  ;;  %2766 = vmatprep.mubr.bf16.mxu1 %v1576_v14 }
 0x2c0   : > { %v1445_v24 = vadd.f32 %v1444_v22, %v10554_v45  ;;  %v1446_v25 = vpop.f32.mrb[39].mxu1  ;;  %2541 = vmatmul.mubr.bf16.vlgmr.msra.gmra.mrb[0].mxu0 %v1575_v13  ;;  %2767 = vmatmul.mubr.bf16.vlgmr.msra.gmra.mrb[64].mxu1 %v1575_v13  ;;  %v1519_v15 = vmax.f32 %v1441_v18, 0.0  ;;  %v8864_v22 = vld [vmem:[#allocation10 + $0x70] ss:$8 sps:$4 sm:$0xff]  }
 0x2c1   : > { %v1447_v27 = vadd.f32 %v1446_v25, %v10558_v41  ;;  %3340 = vmatpush1.bf16.msra.mxu0 %v8843_v17  ;;  %v1520_v44 = vmax.f32 %v1443_v21, 0.0 }
 0x2c2   : > { %v1523_v29 = vmax.f32 %v1445_v24, 0.0  ;;  %3341 = vmatprep.subr.bf16.mxu0 %v8848_v20 }
 0x2c3   : > { %v1524_v47 = vmax.f32 %v1447_v27, 0.0  ;;  %v8869_v27 = vld [vmem:[#allocation10 + $0x84] ss:$8 sps:$4 sm:$0xff]  }
 0x2c4   : > { %v1579_v31 = vpack.c.bf16 %v1523_v29, %v1519_v15 }
 0x2c5   : > { %v1580_v58 = vpack.c.bf16 %v1524_v47, %v1520_v44  ;;  %v1450_v32 = vpop.f32.mrb[40].mxu1  ;;  %3342 = vmatpush1.bf16.msra.mxu0 %v8846_v28  ;;  %v8867_v47 = vld [vmem:[#allocation10 + $0x80] ss:$8 sps:$4 sm:$0xff]  }
 0x2c6   : > { %v1451_v33 = vadd.f32 %v1450_v32, %v10554_v45  ;;  %v1452_v34 = vpop.f32.mrb[41].mxu1  ;;  %3343 = vmatprep.subr.bf16.mxu0 %v8851_v30  ;;  %v8872_v32 = vld [vmem:[#allocation10 + $0x94] ss:$8 sps:$4 sm:$0xff]  }
 0x2c7   : > { %v1453_v11 = vadd.f32 %v1452_v34, %v10558_v41  ;;  %v1454_v37 = vpop.f32.mrb[42].mxu1  ;;  %2550 = vmatprep.mubr.bf16.mxu0 %v1580_v58  ;;  %2776 = vmatprep.mubr.bf16.mxu1 %v1580_v58 }
 0x2c8   : > { %v1455_v38 = vadd.f32 %v1454_v37, %v10554_v45  ;;  %v1456_v23 = vpop.f32.mrb[43].mxu1  ;;  %2551 = vmatmul.mubr.bf16.gmra.mrb[4].mxu0 %v1579_v31  ;;  %2777 = vmatmul.mubr.bf16.gmra.mrb[68].mxu1 %v1579_v31  ;;  %v1527_v42 = vmax.f32 %v1451_v33, 0.0  ;;  %v8870_v37 = vld [vmem:[#allocation10 + $0x90] ss:$8 sps:$4 sm:$0xff]  }
 0x2c9   : > { %v1457_v40 = vadd.f32 %v1456_v23, %v10558_v41  ;;  %3344 = vmatpush1.bf16.msra.mxu0 %v8849_v61  ;;  %v1528_v39 = vmax.f32 %v1453_v11, 0.0 }
 0x2ca   : > { %v1531_v43 = vmax.f32 %v1455_v38, 0.0  ;;  %3345 = vmatprep.subr.bf16.mxu0 %v8854_v8 }
 0x2cb   : > { %v1532_v59 = vmax.f32 %v1457_v40, 0.0  ;;  %v8875_v40 = vld [vmem:[#allocation10 + $0xa4] ss:$8 sps:$4 sm:$0xff]  }
 0x2cc   : > { %v1583_v46 = vpack.c.bf16 %v1531_v43, %v1527_v42 }
 0x2cd   : > { %v1584_v60 = vpack.c.bf16 %v1532_v59, %v1528_v39  ;;  %v1460_v48 = vpop.f32.mrb[44].mxu1  ;;  %3346 = vmatpush1.bf16.msra.mxu0 %v8852_v26  ;;  %v8873_v59 = vld [vmem:[#allocation10 + $0xa0] ss:$8 sps:$4 sm:$0xff]  }
 0x2ce   : > { %v1461_v50 = vadd.f32 %v1460_v48, %v10554_v45  ;;  %v1462_v51 = vpop.f32.mrb[45].mxu1  ;;  %3347 = vmatprep.subr.bf16.mxu0 %v8857_v54  ;;  %v8878_v48 = vld [vmem:[#allocation10 + $0xb4] ss:$8 sps:$4 sm:$0xff]  }
 0x2cf   : > { %v1463_v53 = vadd.f32 %v1462_v51, %v10558_v41  ;;  %v1464_v62 = vpop.f32.mrb[46].mxu1  ;;  %2560 = vmatprep.mubr.bf16.mxu0 %v1584_v60  ;;  %2786 = vmatprep.mubr.bf16.mxu1 %v1584_v60 }
 0x2d0   : > { %v1465_v63 = vadd.f32 %v1464_v62, %v10554_v45  ;;  %v1466_v0 = vpop.f32.mrb[47].mxu1  ;;  %2561 = vmatmul.mubr.bf16.gmra.mrb[8].mxu0 %v1583_v46  ;;  %2787 = vmatmul.mubr.bf16.gmra.mrb[72].mxu1 %v1583_v46  ;;  %v1535_v2 = vmax.f32 %v1461_v50, 0.0  ;;  %v8876_v62 = vld [vmem:[#allocation10 + $0xb0] ss:$8 sps:$4 sm:$0xff]  }
 0x2d1   : > { %v1467_v1 = vadd.f32 %v1466_v0, %v10558_v41  ;;  %3348 = vmatpush1.bf16.msra.mxu0 %v8855_v49  ;;  %v1536_v5 = vmax.f32 %v1463_v53, 0.0 }
 0x2d2   : > { %v1539_v3 = vmax.f32 %v1465_v63, 0.0  ;;  %3349 = vmatprep.subr.bf16.mxu0 %v8860_v52 }
 0x2d3   : > { %v1540_v6 = vmax.f32 %v1467_v1, 0.0  ;;  %v8881_v1 = vld [vmem:[#allocation10 + $0xc4] ss:$8 sps:$4 sm:$0xff]  }
 0x2d4   : > { %v1587_v7 = vpack.c.bf16 %v1539_v3, %v1535_v2 }
 0x2d5   : > { %v1588_v9 = vpack.c.bf16 %v1540_v6, %v1536_v5  ;;  %v1470_v10 = vpop.f32.mrb[48].mxu1  ;;  %3350 = vmatpush1.bf16.msra.mxu0 %v8858_v56  ;;  %v8879_v6 = vld [vmem:[#allocation10 + $0xc0] ss:$8 sps:$4 sm:$0xff]  }
 0x2d6   : > { %v1471_v13 = vadd.f32 %v1470_v10, %v10554_v45  ;;  %v1472_v14 = vpop.f32.mrb[49].mxu1  ;;  %3351 = vmatprep.subr.bf16.mxu0 %v8863_v4  ;;  %v8884_v10 = vld [vmem:[#allocation10 + $0xd4] ss:$8 sps:$4 sm:$0xff]  }
 0x2d7   : > { %v1473_v17 = vadd.f32 %v1472_v14, %v10558_v41  ;;  %v1474_v18 = vpop.f32.mrb[50].mxu1  ;;  %2570 = vmatprep.mubr.bf16.mxu0 %v1588_v9  ;;  %2796 = vmatprep.mubr.bf16.mxu1 %v1588_v9 }
 0x2d8   : > { %v1475_v19 = vadd.f32 %v1474_v18, %v10554_v45  ;;  %v1476_v20 = vpop.f32.mrb[51].mxu1  ;;  %2571 = vmatmul.mubr.bf16.gmra.mrb[12].mxu0 %v1587_v7  ;;  %2797 = vmatmul.mubr.bf16.gmra.mrb[76].mxu1 %v1587_v7  ;;  %v1543_v24 = vmax.f32 %v1471_v13, 0.0  ;;  %v8882_v18 = vld [vmem:[#allocation10 + $0xd0] ss:$8 sps:$4 sm:$0xff]  }
 0x2d9   : > { %v1477_v21 = vadd.f32 %v1476_v20, %v10558_v41  ;;  %3352 = vmatpush1.bf16.msra.mxu0 %v8861_v12  ;;  %v1544_v28 = vmax.f32 %v1473_v17, 0.0 }
 0x2da   : > { %v1547_v25 = vmax.f32 %v1475_v19, 0.0  ;;  %3353 = vmatprep.subr.bf16.mxu0 %v8866_v16 }
 0x2db   : > { %v1548_v15 = vmax.f32 %v1477_v21, 0.0 }
 0x2dc   : > { %v1591_v29 = vpack.c.bf16 %v1547_v25, %v1543_v24 }
 0x2dd   : > { %v1592_v30 = vpack.c.bf16 %v1548_v15, %v1544_v28  ;;  %v1480_v44 = vpop.f32.mrb[52].mxu1  ;;  %3354 = vmatpush1.bf16.msra.mxu0 %v8864_v22  ;;  %v8890_v28 = vld [vmem:[#allocation10 + $0xf4] ss:$8 sps:$4 sm:$0xff]   ;;  %v8893_v15 = vld [vmem:[#allocation10 + $0x104] ss:$8 sps:$4 sm:$0xff]  }
 0x2de   : > { %v1481_v31 = vadd.f32 %v1480_v44, %v10554_v45  ;;  %v1482_v58 = vpop.f32.mrb[53].mxu1  ;;  %3355 = vmatprep.subr.bf16.mxu0 %v8869_v27  ;;  %v8885_v27 = vld [vmem:[#allocation10 + $0xe0] ss:$8 sps:$4 sm:$0xff]  }
 0x2df   : > { %v1483_v61 = vadd.f32 %v1482_v58, %v10558_v41  ;;  %v1484_v33 = vpop.f32.mrb[54].mxu1  ;;  %2580 = vmatprep.mubr.bf16.mxu0 %v1592_v30  ;;  %2806 = vmatprep.mubr.bf16.mxu1 %v1592_v30 }
 0x2e0   : > { %v1485_v34 = vadd.f32 %v1484_v33, %v10554_v45  ;;  %v1486_v8 = vpop.f32.mrb[55].mxu1  ;;  %2581 = vmatmul.mubr.bf16.gmra.mrb[16].mxu0 %v1591_v29  ;;  %2807 = vmatmul.mubr.bf16.gmra.mrb[80].mxu1 %v1591_v29  ;;  %v1551_v38 = vmax.f32 %v1481_v31, 0.0  ;;  %v1733_v29 = vld [vmem:[%s11474_s5] sm:$0xf] }
 0x2e1   : > { %v1487_v11 = vadd.f32 %v1486_v8, %v10558_v41  ;;  %3356 = vmatpush1.bf16.msra.mxu0 %v8867_v47  ;;  %v1552_v26 = vmax.f32 %v1483_v61, 0.0  ;;  %v10596_v30 = vrot.slane %v1733_v29, %v10496_v55  ;;  %v10599_v44 = vrot.slane %v1733_v29, %v10544_v35 }
 0x2e2   : > { %v1555_v23 = vmax.f32 %v1485_v34, 0.0  ;;  %3357 = vmatprep.subr.bf16.mxu0 %v8872_v32  ;;  %v10602_v47 = vrot.slane %v1733_v29, %v10504_v57  ;;  %v10605_v31 = vrot.slane %v1733_v29, %v10548_v36 }
 0x2e3   : > { %v1556_v42 = vmax.f32 %v1487_v11, 0.0 }
 0x2e4   : > { %v1595_v43 = vpack.c.bf16 %v1555_v23, %v1551_v38 }
 0x2e5   : > { %v1596_v54 = vpack.c.bf16 %v1556_v42, %v1552_v26  ;;  %v1490_v39 = vpop.f32.mrb[56].mxu1  ;;  %3358 = vmatpush1.bf16.msra.mxu0 %v8870_v37 }
 0x2e6   : > { %v1491_v46 = vadd.f32 %v1490_v39, %v10554_v45  ;;  %v1492_v60 = vpop.f32.mrb[57].mxu1  ;;  %3359 = vmatprep.subr.bf16.mxu0 %v8875_v40 }
 0x2e7   : > { %v1493_v49 = vadd.f32 %v1492_v60, %v10558_v41  ;;  %v1494_v50 = vpop.f32.mrb[58].mxu1  ;;  %2590 = vmatprep.mubr.bf16.mxu0 %v1596_v54  ;;  %2816 = vmatprep.mubr.bf16.mxu1 %v1596_v54  ;;  %v8939_v54 = vld [vmem:[#allocation11] ss:$8 sps:$4 sm:$0xff]  }
 0x2e8   : > { %v1495_v51 = vadd.f32 %v1494_v50, %v10554_v45  ;;  %v1496_v52 = vpop.f32.mrb[59].mxu1  ;;  %2591 = vmatmul.mubr.bf16.gmra.mrb[20].mxu0 %v1595_v43  ;;  %2817 = vmatmul.mubr.bf16.gmra.mrb[84].mxu1 %v1595_v43  ;;  %v1559_v63 = vmax.f32 %v1491_v46, 0.0  ;;  %v8941_v46 = vld [vmem:[#allocation11 + $0x4] ss:$8 sps:$4 sm:$0xff]  }
 0x2e9   : > { %v1497_v53 = vadd.f32 %v1496_v52, %v10558_v41  ;;  %3360 = vmatpush1.bf16.msra.mxu0 %v8873_v59  ;;  %v1560_v56 = vmax.f32 %v1493_v49, 0.0  ;;  %3817 = vmatprep.subr.bf16.mxu1 %v8941_v46 }
 0x2ea   : > { %v1563_v0 = vmax.f32 %v1495_v51, 0.0  ;;  %3361 = vmatprep.subr.bf16.mxu0 %v8878_v48  ;;  %v8944_v51 = vld [vmem:[#allocation11 + $0x14] ss:$8 sps:$4 sm:$0xff]   ;;  %3818 = vmatpush1.bf16.msra.mxu1 %v8939_v54  ;;  %v8897_v54 = vld [vmem:[#allocation10 + $0x120] ss:$8 sps:$4 sm:$0xff]  }
 0x2eb   : > { %v1564_v2 = vmax.f32 %v1497_v53, 0.0  ;;  %3819 = vmatprep.subr.bf16.mxu1 %v8944_v51 }
 0x2ec   : > { %v1599_v3 = vpack.c.bf16 %v1563_v0, %v1559_v63 }
 0x2ed   : > { %v1600_v4 = vpack.c.bf16 %v1564_v2, %v1560_v56  ;;  %v1500_v5 = vpop.f32.mrb[60].mxu1  ;;  %3362 = vmatpush1.bf16.msra.mxu0 %v8876_v62  ;;  %v8942_v56 = vld [vmem:[#allocation11 + $0x10] ss:$8 sps:$4 sm:$0xff]  }
 0x2ee   : > { %v1501_v7 = vadd.f32 %v1500_v5, %v10554_v45  ;;  %v1502_v9 = vpop.f32.mrb[61].mxu1  ;;  %3363 = vmatprep.subr.bf16.mxu0 %v8881_v1  ;;  %3820 = vmatpush1.bf16.msra.mxu1 %v8942_v56 }
 0x2ef   : > { %v1503_v12 = vadd.f32 %v1502_v9, %v10558_v41  ;;  %v1504_v13 = vpop.f32.mrb[62].mxu1  ;;  %2600 = vmatprep.mubr.bf16.mxu0 %v1600_v4  ;;  %2826 = vmatprep.mubr.bf16.mxu1 %v1600_v4 }
 0x2f0   : > { %v1505_v14 = vadd.f32 %v1504_v13, %v10554_v45  ;;  %v1506_v16 = vpop.f32.mrb[63].mxu1  ;;  %2601 = vmatmul.mubr.bf16.gmra.mrb[24].mxu0 %v1599_v3  ;;  %2827 = vmatmul.mubr.bf16.gmra.mrb[88].mxu1 %v1599_v3  ;;  %v1567_v19 = vmax.f32 %v1501_v7, 0.0  ;;  %v8887_v45 = vld [vmem:[#allocation10 + $0xe4] ss:$8 sps:$4 sm:$0xff]  }
 0x2f1   : > { %v1507_v17 = vadd.f32 %v1506_v16, %v10558_v41  ;;  %3364 = vmatpush1.bf16.msra.mxu0 %v8879_v6  ;;  %v1568_v21 = vmax.f32 %v1503_v12, 0.0  ;;  %v8888_v41 = vld [vmem:[#allocation10 + $0xf0] ss:$8 sps:$4 sm:$0xff]   ;;  %v8891_v6 = vld [vmem:[#allocation10 + $0x100] ss:$8 sps:$4 sm:$0xff]  }
 0x2f2   : > { %v1571_v20 = vmax.f32 %v1505_v14, 0.0  ;;  %3365 = vmatprep.subr.bf16.mxu0 %v8884_v10  ;;  %v8947_v7 = vld [vmem:[#allocation11 + $0x24] ss:$8 sps:$4 sm:$0xff]   ;;  %v8896_v14 = vld [vmem:[#allocation10 + $0x114] ss:$8 sps:$4 sm:$0xff]  }
 0x2f3   : > { %v1572_v22 = vmax.f32 %v1507_v17, 0.0  ;;  %3821 = vmatprep.subr.bf16.mxu1 %v8947_v7  ;;  %v8956_v7 = vld [vmem:[#allocation11 + $0x54] ss:$8 sps:$4 sm:$0xff]  }
 0x2f4   : > { %v1603_v24 = vpack.c.bf16 %v1571_v20, %v1567_v19 }
 0x2f5   : > { %v1604_v25 = vpack.c.bf16 %v1572_v22, %v1568_v21  ;;  %3366 = vmatpush1.bf16.msra.mxu0 %v8882_v18 }
 0x2f6   : > { %3367 = vmatprep.subr.bf16.mxu0 %v8887_v45 }
 0x2f7   : > { %2610 = vmatprep.mubr.bf16.mxu0 %v1604_v25  ;;  %2836 = vmatprep.mubr.bf16.mxu1 %v1604_v25  ;;  %v8945_v25 = vld [vmem:[#allocation11 + $0x20] ss:$8 sps:$4 sm:$0xff]  }
 0x2f8   : > { %2611 = vmatmul.mubr.bf16.gmra.mrb[28].mxu0 %v1603_v24  ;;  %2837 = vmatmul.mubr.bf16.gmra.mrb[92].mxu1 %v1603_v24 }
 0x2f9   : > { %3368 = vmatpush1.bf16.msra.mxu0 %v8885_v27  ;;  %3822 = vmatpush1.bf16.msra.mxu1 %v8945_v25 }
 0x2fa   : > { %3369 = vmatprep.subr.bf16.mxu0 %v8890_v28  ;;  %v8894_v28 = vld [vmem:[#allocation10 + $0x110] ss:$8 sps:$4 sm:$0xff]  }
 0x2fd   : > { %3370 = vmatpush1.bf16.msra.mxu0 %v8888_v41  ;;  %v8950_v41 = vld [vmem:[#allocation11 + $0x34] ss:$8 sps:$4 sm:$0xff]  }
 0x2fe   : > { %3452 = vmatprep.subr.bf16.mxu0 %v8893_v15  ;;  %3823 = vmatprep.subr.bf16.mxu1 %v8950_v41  ;;  %v8959_v41 = vld [vmem:[#allocation11 + $0x64] ss:$8 sps:$4 sm:$0xff]  }
 0x393   : > { %v2542_v58 = vpop.f32.mrb[0].mxu0  ;;  %v2768_v32 = vpop.f32.mrb[64].mxu1 }
 0x394   : > { %v8020_v61 = vadd.f32 %v2542_v58, %v10596_v30  ;;  %v8052_v33 = vadd.f32 %v2768_v32, %v10599_v44  ;;  %v2544_v34 = vpop.f32.mrb[1].mxu0  ;;  %v2770_v8 = vpop.f32.mrb[65].mxu1 }
 0x395   : > { %v8021_v11 = vadd.f32 %v2544_v34, %v10602_v47  ;;  %v8053_v37 = vadd.f32 %v2770_v8, %v10605_v31  ;;  %v2546_v38 = vpop.f32.mrb[2].mxu0  ;;  %v2772_v23 = vpop.f32.mrb[66].mxu1 }
 0x396   : > { %v8022_v40 = vadd.f32 %v2546_v38, %v10596_v30  ;;  %v8054_v26 = vadd.f32 %v2772_v23, %v10599_v44  ;;  %v2548_v42 = vpop.f32.mrb[3].mxu0  ;;  %v2774_v43 = vpop.f32.mrb[67].mxu1  ;;  %v2847_v60 = vmax.f32 %v8020_v61, 0.0  ;;  %v2849_v48 = vmax.f32 %v8052_v33, 0.0  ;;  %v8899_v61 = vld [vmem:[#allocation10 + $0x124] ss:$8 sps:$4 sm:$0xff]  }
 0x397   : > { %v8023_v39 = vadd.f32 %v2548_v42, %v10602_v47  ;;  %v8055_v59 = vadd.f32 %v2774_v43, %v10605_v31  ;;  %v2848_v52 = vmax.f32 %v8021_v11, 0.0  ;;  %v2850_v53 = vmax.f32 %v8053_v37, 0.0  ;;  %v8948_v23 = vld [vmem:[#allocation11 + $0x30] ss:$8 sps:$4 sm:$0xff]  }
 0x398   : > { %v2851_v49 = vmax.f32 %v8022_v40, 0.0  ;;  %v2853_v50 = vmax.f32 %v8054_v26, 0.0  ;;  %3824 = vmatpush1.bf16.msra.mxu1 %v8948_v23 }
 0x399   : > { %v2852_v62 = vmax.f32 %v8023_v39, 0.0  ;;  %v2854_v63 = vmax.f32 %v8055_v59, 0.0  ;;  %v8953_v39 = vld [vmem:[#allocation11 + $0x44] ss:$8 sps:$4 sm:$0xff]  }
 0x39a   : > { %v2911_v0 = vpack.c.bf16 %v2851_v49, %v2847_v60  ;;  %v10615_v1 = vpack.c.bf16 %v2853_v50, %v2849_v48  ;;  %v8902_v49 = vld [vmem:[#allocation10 + $0x134] ss:$8 sps:$4 sm:$0xff]   ;;  %3825 = vmatprep.subr.bf16.mxu1 %v8953_v39 }
 0x39b   : > { %v2912_v2 = vpack.c.bf16 %v2852_v62, %v2848_v52  ;;  %v10617_v3 = vpack.c.bf16 %v2854_v63, %v2850_v53  ;;  %v2552_v4 = vpop.f32.mrb[4].mxu0  ;;  %v2778_v5 = vpop.f32.mrb[68].mxu1 }
 0x39c   : > { %v8024_v9 = vadd.f32 %v2552_v4, %v10596_v30  ;;  %v8056_v10 = vadd.f32 %v2778_v5, %v10599_v44  ;;  %v2554_v12 = vpop.f32.mrb[5].mxu0  ;;  %v2780_v13 = vpop.f32.mrb[69].mxu1 }
 0x39d   : > { %v8025_v16 = vadd.f32 %v2554_v12, %v10602_v47  ;;  %v8057_v17 = vadd.f32 %v2780_v13, %v10605_v31  ;;  %v2556_v18 = vpop.f32.mrb[6].mxu0  ;;  %v2782_v19 = vpop.f32.mrb[70].mxu1  ;;  %3371 = vmatprep.mubr.bf16.mxu0 %v2912_v2  ;;  %v8951_v2 = vld [vmem:[#allocation11 + $0x40] ss:$8 sps:$4 sm:$0xff]  }
 0x39e   : > { %v8026_v20 = vadd.f32 %v2556_v18, %v10596_v30  ;;  %v8058_v21 = vadd.f32 %v2782_v19, %v10599_v44  ;;  %v2558_v22 = vpop.f32.mrb[7].mxu0  ;;  %v2784_v24 = vpop.f32.mrb[71].mxu1  ;;  %3372 = vmatmul.mubr.bf16.vlgmr.msra.gmra.mrb[32].mxu0 %v2911_v0  ;;  %v2855_v15 = vmax.f32 %v8024_v9, 0.0  ;;  %v2857_v29 = vmax.f32 %v8056_v10, 0.0  ;;  %3826 = vmatpush1.bf16.msra.mxu1 %v8951_v2  ;;  %v8960_v2 = vld [vmem:[#allocation11 + $0x70] ss:$8 sps:$4 sm:$0xff]  }
 0x39f   : > { %v8027_v45 = vadd.f32 %v2558_v22, %v10602_v47  ;;  %v8059_v27 = vadd.f32 %v2784_v24, %v10605_v31  ;;  %3453 = vmatpush1.bf16.msra.mxu0 %v8891_v6  ;;  %v2856_v33 = vmax.f32 %v8025_v16, 0.0  ;;  %v2858_v34 = vmax.f32 %v8057_v17, 0.0  ;;  %v8900_v6 = vld [vmem:[#allocation10 + $0x130] ss:$8 sps:$4 sm:$0xff]   ;;  %3827 = vmatprep.subr.bf16.mxu1 %v8956_v7 }
 0x3a0   : > { %v2859_v58 = vmax.f32 %v8026_v20, 0.0  ;;  %v2861_v32 = vmax.f32 %v8058_v21, 0.0  ;;  %3454 = vmatprep.subr.bf16.mxu0 %v8896_v14  ;;  %v8905_v14 = vld [vmem:[#allocation10 + $0x144] ss:$8 sps:$4 sm:$0xff]   ;;  %v8954_v22 = vld [vmem:[#allocation11 + $0x50] ss:$8 sps:$4 sm:$0xff]  }
 0x3a1   : > { %v2860_v8 = vmax.f32 %v8027_v45, 0.0  ;;  %v2862_v11 = vmax.f32 %v8059_v27, 0.0 }
 0x3a2   : > { %v2915_v37 = vpack.c.bf16 %v2859_v58, %v2855_v15  ;;  %v10627_v38 = vpack.c.bf16 %v2861_v32, %v2857_v29  ;;  %3828 = vmatpush1.bf16.msra.mxu1 %v8954_v22 }
 0x3a3   : > { %v2916_v40 = vpack.c.bf16 %v2860_v8, %v2856_v33  ;;  %v10629_v26 = vpack.c.bf16 %v2862_v11, %v2858_v34  ;;  %v2562_v42 = vpop.f32.mrb[8].mxu0  ;;  %v2788_v43 = vpop.f32.mrb[72].mxu1  ;;  %3455 = vmatpush1.bf16.msra.mxu0 %v8894_v28  ;;  %v8903_v28 = vld [vmem:[#allocation10 + $0x140] ss:$8 sps:$4 sm:$0xff]   ;;  %3829 = vmatprep.subr.bf16.mxu1 %v8959_v41 }
 0x3a4   : > { %v8028_v59 = vadd.f32 %v2562_v42, %v10596_v30  ;;  %v8060_v46 = vadd.f32 %v2788_v43, %v10599_v44  ;;  %v2564_v60 = vpop.f32.mrb[9].mxu0  ;;  %v2790_v48 = vpop.f32.mrb[73].mxu1  ;;  %3456 = vmatprep.subr.bf16.mxu0 %v8899_v61  ;;  %v8908_v61 = vld [vmem:[#allocation10 + $0x154] ss:$8 sps:$4 sm:$0xff]   ;;  %v8957_v43 = vld [vmem:[#allocation11 + $0x60] ss:$8 sps:$4 sm:$0xff]  }
 0x3a5   : > { %v8029_v50 = vadd.f32 %v2564_v60, %v10602_v47  ;;  %v8061_v51 = vadd.f32 %v2790_v48, %v10605_v31  ;;  %v2566_v52 = vpop.f32.mrb[10].mxu0  ;;  %v2792_v53 = vpop.f32.mrb[74].mxu1  ;;  %3381 = vmatprep.mubr.bf16.mxu0 %v2916_v40  ;;  %v8963_v41 = vld [vmem:[#allocation11 + $0x80] ss:$8 sps:$4 sm:$0xff]  }
 0x3a6   : > { %v8030_v62 = vadd.f32 %v2566_v52, %v10596_v30  ;;  %v8062_v63 = vadd.f32 %v2792_v53, %v10599_v44  ;;  %v2568_v0 = vpop.f32.mrb[11].mxu0  ;;  %v2794_v56 = vpop.f32.mrb[75].mxu1  ;;  %3382 = vmatmul.mubr.bf16.gmra.mrb[36].mxu0 %v2915_v37  ;;  %v2863_v9 = vmax.f32 %v8028_v59, 0.0  ;;  %v2865_v10 = vmax.f32 %v8060_v46, 0.0  ;;  %v8906_v59 = vld [vmem:[#allocation10 + $0x150] ss:$8 sps:$4 sm:$0xff]   ;;  %3830 = vmatpush1.bf16.msra.mxu1 %v8957_v43 }
 0x3a7   : > { %v8031_v4 = vadd.f32 %v2568_v0, %v10602_v47  ;;  %v8063_v5 = vadd.f32 %v2794_v56, %v10605_v31  ;;  %3457 = vmatpush1.bf16.msra.mxu0 %v8897_v54  ;;  %v2864_v16 = vmax.f32 %v8029_v50, 0.0  ;;  %v2866_v17 = vmax.f32 %v8061_v51, 0.0  ;;  %v8962_v46 = vld [vmem:[#allocation11 + $0x74] ss:$8 sps:$4 sm:$0xff]   ;;  %v8911_v51 = vld [vmem:[#allocation10 + $0x164] ss:$8 sps:$4 sm:$0xff]  }
 0x3a8   : > { %v2867_v12 = vmax.f32 %v8030_v62, 0.0  ;;  %v2869_v13 = vmax.f32 %v8062_v63, 0.0  ;;  %3458 = vmatprep.subr.bf16.mxu0 %v8902_v49  ;;  %3831 = vmatprep.subr.bf16.mxu1 %v8962_v46 }
 0x3a9   : > { %v2868_v18 = vmax.f32 %v8031_v4, 0.0  ;;  %v2870_v19 = vmax.f32 %v8063_v5, 0.0 }
 0x3aa   : > { %v2919_v20 = vpack.c.bf16 %v2867_v12, %v2863_v9  ;;  %v10639_v21 = vpack.c.bf16 %v2869_v13, %v2865_v10  ;;  %v8909_v9 = vld [vmem:[#allocation10 + $0x160] ss:$8 sps:$4 sm:$0xff]   ;;  %v8965_v10 = vld [vmem:[#allocation11 + $0x84] ss:$8 sps:$4 sm:$0xff]   ;;  %3832 = vmatpush1.bf16.msra.mxu1 %v8960_v2 }
 0x3ab   : > { %v2920_v24 = vpack.c.bf16 %v2868_v18, %v2864_v16  ;;  %v10641_v25 = vpack.c.bf16 %v2870_v19, %v2866_v17  ;;  %v2572_v45 = vpop.f32.mrb[12].mxu0  ;;  %v2798_v27 = vpop.f32.mrb[76].mxu1  ;;  %3459 = vmatpush1.bf16.msra.mxu0 %v8900_v6  ;;  %v8914_v17 = vld [vmem:[#allocation10 + $0x174] ss:$8 sps:$4 sm:$0xff]   ;;  %3833 = vmatprep.subr.bf16.mxu1 %v8965_v10 }
 0x3ac   : > { %v8032_v15 = vadd.f32 %v2572_v45, %v10596_v30  ;;  %v8064_v29 = vadd.f32 %v2798_v27, %v10599_v44  ;;  %v2574_v58 = vpop.f32.mrb[13].mxu0  ;;  %v2800_v32 = vpop.f32.mrb[77].mxu1  ;;  %3460 = vmatprep.subr.bf16.mxu0 %v8905_v14 }
 0x3ad   : > { %v8033_v33 = vadd.f32 %v2574_v58, %v10602_v47  ;;  %v8065_v34 = vadd.f32 %v2800_v32, %v10605_v31  ;;  %v2576_v8 = vpop.f32.mrb[14].mxu0  ;;  %v2802_v11 = vpop.f32.mrb[78].mxu1  ;;  %3391 = vmatprep.mubr.bf16.mxu0 %v2920_v24  ;;  %v8912_v58 = vld [vmem:[#allocation10 + $0x170] ss:$8 sps:$4 sm:$0xff]   ;;  %v8968_v32 = vld [vmem:[#allocation11 + $0x94] ss:$8 sps:$4 sm:$0xff]  }
 0x3ae   : > { %v8034_v37 = vadd.f32 %v2576_v8, %v10596_v30  ;;  %v8066_v23 = vadd.f32 %v2802_v11, %v10599_v44  ;;  %v2578_v40 = vpop.f32.mrb[15].mxu0  ;;  %v2804_v42 = vpop.f32.mrb[79].mxu1  ;;  %3392 = vmatmul.mubr.bf16.gmra.mrb[40].mxu0 %v2919_v20  ;;  %v2871_v60 = vmax.f32 %v8032_v15, 0.0  ;;  %v2873_v48 = vmax.f32 %v8064_v29, 0.0  ;;  %v8917_v11 = vld [vmem:[#allocation10 + $0x184] ss:$8 sps:$4 sm:$0xff]   ;;  %3834 = vmatpush1.bf16.msra.mxu1 %v8963_v41 }
 0x3af   : > { %v8035_v54 = vadd.f32 %v2578_v40, %v10602_v47  ;;  %v8067_v39 = vadd.f32 %v2804_v42, %v10605_v31  ;;  %3461 = vmatpush1.bf16.msra.mxu0 %v8903_v28  ;;  %v2872_v52 = vmax.f32 %v8033_v33, 0.0  ;;  %v2874_v53 = vmax.f32 %v8065_v34, 0.0  ;;  %3835 = vmatprep.subr.bf16.mxu1 %v8968_v32  ;;  %v8972_v32 = vld [vmem:[#allocation11 + $0xb0] ss:$8 sps:$4 sm:$0xff]  }
 0x3b0   : > { %v2875_v49 = vmax.f32 %v8034_v37, 0.0  ;;  %v2877_v50 = vmax.f32 %v8066_v23, 0.0  ;;  %3462 = vmatprep.subr.bf16.mxu0 %v8908_v61 }
 0x3b1   : > { %v2876_v62 = vmax.f32 %v8035_v54, 0.0  ;;  %v2878_v63 = vmax.f32 %v8067_v39, 0.0  ;;  %v8966_v39 = vld [vmem:[#allocation11 + $0x90] ss:$8 sps:$4 sm:$0xff]  }
 0x3b2   : > { %v2923_v0 = vpack.c.bf16 %v2875_v49, %v2871_v60  ;;  %v10651_v56 = vpack.c.bf16 %v2877_v50, %v2873_v48  ;;  %v8915_v49 = vld [vmem:[#allocation10 + $0x180] ss:$8 sps:$4 sm:$0xff]   ;;  %v8971_v50 = vld [vmem:[#allocation11 + $0xa4] ss:$8 sps:$4 sm:$0xff]   ;;  %3836 = vmatpush1.bf16.msra.mxu1 %v8966_v39  ;;  %v8926_v39 = vld [vmem:[#allocation10 + $0x1b4] ss:$8 sps:$4 sm:$0xff]  }
 0x3b3   : > { %v2924_v4 = vpack.c.bf16 %v2876_v62, %v2872_v52  ;;  %v10653_v5 = vpack.c.bf16 %v2878_v63, %v2874_v53  ;;  %v2582_v6 = vpop.f32.mrb[16].mxu0  ;;  %v2808_v7 = vpop.f32.mrb[80].mxu1  ;;  %3463 = vmatpush1.bf16.msra.mxu0 %v8906_v59  ;;  %v8920_v63 = vld [vmem:[#allocation10 + $0x194] ss:$8 sps:$4 sm:$0xff]   ;;  %3837 = vmatprep.subr.bf16.mxu1 %v8971_v50 }
 0x3b4   : > { %v8036_v12 = vadd.f32 %v2582_v6, %v10596_v30  ;;  %v8068_v13 = vadd.f32 %v2808_v7, %v10599_v44  ;;  %v2584_v14 = vpop.f32.mrb[17].mxu0  ;;  %v2810_v16 = vpop.f32.mrb[81].mxu1  ;;  %3464 = vmatprep.subr.bf16.mxu0 %v8911_v51 }
 0x3b5   : > { %v8037_v18 = vadd.f32 %v2584_v14, %v10602_v47  ;;  %v8069_v19 = vadd.f32 %v2810_v16, %v10605_v31  ;;  %v2586_v20 = vpop.f32.mrb[18].mxu0  ;;  %v2812_v22 = vpop.f32.mrb[82].mxu1  ;;  %3401 = vmatprep.mubr.bf16.mxu0 %v2924_v4 }
 0x3b6   : > { %v8038_v24 = vadd.f32 %v2586_v20, %v10596_v30  ;;  %v8070_v45 = vadd.f32 %v2812_v22, %v10599_v44  ;;  %v2588_v27 = vpop.f32.mrb[19].mxu0  ;;  %v2814_v28 = vpop.f32.mrb[83].mxu1  ;;  %3402 = vmatmul.mubr.bf16.gmra.mrb[44].mxu0 %v2923_v0  ;;  %v2879_v61 = vmax.f32 %v8036_v12, 0.0  ;;  %v2881_v33 = vmax.f32 %v8068_v13, 0.0  ;;  %v8969_v13 = vld [vmem:[#allocation11 + $0xa0] ss:$8 sps:$4 sm:$0xff]  }
 0x3b7   : > { %v8039_v15 = vadd.f32 %v2588_v27, %v10602_v47  ;;  %v8071_v29 = vadd.f32 %v2814_v28, %v10605_v31  ;;  %3465 = vmatpush1.bf16.msra.mxu0 %v8909_v9  ;;  %v2880_v37 = vmax.f32 %v8037_v18, 0.0  ;;  %v2882_v23 = vmax.f32 %v8069_v19, 0.0  ;;  %v8974_v18 = vld [vmem:[#allocation11 + $0xb4] ss:$8 sps:$4 sm:$0xff]   ;;  %3838 = vmatpush1.bf16.msra.mxu1 %v8969_v13 }
 0x3b8   : > { %v2883_v34 = vmax.f32 %v8038_v24, 0.0  ;;  %v2885_v8 = vmax.f32 %v8070_v45, 0.0  ;;  %3466 = vmatprep.subr.bf16.mxu0 %v8914_v17  ;;  %v8918_v17 = vld [vmem:[#allocation10 + $0x190] ss:$8 sps:$4 sm:$0xff]   ;;  %v8923_v45 = vld [vmem:[#allocation10 + $0x1a4] ss:$8 sps:$4 sm:$0xff]   ;;  %3839 = vmatprep.subr.bf16.mxu1 %v8974_v18 }
 0x3b9   : > { %v2884_v40 = vmax.f32 %v8039_v15, 0.0  ;;  %v2886_v42 = vmax.f32 %v8071_v29, 0.0 }
 0x3ba   : > { %v2927_v43 = vpack.c.bf16 %v2883_v34, %v2879_v61  ;;  %v10663_v54 = vpack.c.bf16 %v2885_v8, %v2881_v33 }
 0x3bb   : > { %v2928_v59 = vpack.c.bf16 %v2884_v40, %v2880_v37  ;;  %v10665_v46 = vpack.c.bf16 %v2886_v42, %v2882_v23  ;;  %v2592_v60 = vpop.f32.mrb[20].mxu0  ;;  %v2818_v48 = vpop.f32.mrb[84].mxu1  ;;  %3467 = vmatpush1.bf16.msra.mxu0 %v8912_v58  ;;  %v8977_v37 = vld [vmem:[#allocation11 + $0xc4] ss:$8 sps:$4 sm:$0xff]   ;;  %3840 = vmatpush1.bf16.msra.mxu1 %v8972_v32 }
 0x3bc   : > { %v8040_v51 = vadd.f32 %v2592_v60, %v10596_v30  ;;  %v8072_v52 = vadd.f32 %v2818_v48, %v10599_v44  ;;  %v2594_v53 = vpop.f32.mrb[21].mxu0  ;;  %v2820_v62 = vpop.f32.mrb[85].mxu1  ;;  %3468 = vmatprep.subr.bf16.mxu0 %v8917_v11  ;;  %v8921_v11 = vld [vmem:[#allocation10 + $0x1a0] ss:$8 sps:$4 sm:$0xff]   ;;  %3841 = vmatprep.subr.bf16.mxu1 %v8977_v37 }
 0x3bd   : > { %v8041_v0 = vadd.f32 %v2594_v53, %v10602_v47  ;;  %v8073_v2 = vadd.f32 %v2820_v62, %v10605_v31  ;;  %v2596_v4 = vpop.f32.mrb[22].mxu0  ;;  %v2822_v6 = vpop.f32.mrb[86].mxu1  ;;  %3411 = vmatprep.mubr.bf16.mxu0 %v2928_v59  ;;  %v8975_v62 = vld [vmem:[#allocation11 + $0xc0] ss:$8 sps:$4 sm:$0xff]  }
 0x3be   : > { %v8042_v7 = vadd.f32 %v2596_v4, %v10596_v30  ;;  %v8074_v9 = vadd.f32 %v2822_v6, %v10599_v44  ;;  %v2598_v10 = vpop.f32.mrb[23].mxu0  ;;  %v2824_v12 = vpop.f32.mrb[87].mxu1  ;;  %3412 = vmatmul.mubr.bf16.gmra.mrb[48].mxu0 %v2927_v43  ;;  %v2887_v19 = vmax.f32 %v8040_v51, 0.0  ;;  %v2889_v20 = vmax.f32 %v8072_v52, 0.0  ;;  %v8980_v4 = vld [vmem:[#allocation11 + $0xd4] ss:$8 sps:$4 sm:$0xff]  }
 0x3bf   : > { %v8043_v14 = vadd.f32 %v2598_v10, %v10602_v47  ;;  %v8075_v16 = vadd.f32 %v2824_v12, %v10605_v31  ;;  %3469 = vmatpush1.bf16.msra.mxu0 %v8915_v49  ;;  %v2888_v27 = vmax.f32 %v8041_v0, 0.0  ;;  %v2890_v28 = vmax.f32 %v8073_v2, 0.0  ;;  %v8924_v2 = vld [vmem:[#allocation10 + $0x1b0] ss:$8 sps:$4 sm:$0xff]   ;;  %v8929_v12 = vld [vmem:[#allocation10 + $0x1c4] ss:$8 sps:$4 sm:$0xff]   ;;  %3842 = vmatpush1.bf16.msra.mxu1 %v8975_v62 }
 0x3c0   : > { %v2891_v22 = vmax.f32 %v8042_v7, 0.0  ;;  %v2893_v24 = vmax.f32 %v8074_v9, 0.0  ;;  %3470 = vmatprep.subr.bf16.mxu0 %v8920_v63  ;;  %3843 = vmatprep.subr.bf16.mxu1 %v8980_v4 }
 0x3c1   : > { %v2892_v41 = vmax.f32 %v8043_v14, 0.0  ;;  %v2894_v15 = vmax.f32 %v8075_v16, 0.0 }
 0x3c2   : > { %v2931_v29 = vpack.c.bf16 %v2891_v22, %v2887_v19  ;;  %v10675_v58 = vpack.c.bf16 %v2893_v24, %v2889_v20  ;;  %v8978_v20 = vld [vmem:[#allocation11 + $0xd0] ss:$8 sps:$4 sm:$0xff]  }
 0x3c3   : > { %v2932_v61 = vpack.c.bf16 %v2892_v41, %v2888_v27  ;;  %v10677_v33 = vpack.c.bf16 %v2894_v15, %v2890_v28  ;;  %v2602_v34 = vpop.f32.mrb[24].mxu0  ;;  %v2828_v8 = vpop.f32.mrb[88].mxu1  ;;  %3471 = vmatpush1.bf16.msra.mxu0 %v8918_v17  ;;  %v8927_v28 = vld [vmem:[#allocation10 + $0x1c0] ss:$8 sps:$4 sm:$0xff]   ;;  %3844 = vmatpush1.bf16.msra.mxu1 %v8978_v20 }
 0x3c4   : > { %v8044_v23 = vadd.f32 %v2602_v34, %v10596_v30  ;;  %v8076_v40 = vadd.f32 %v2828_v8, %v10599_v44  ;;  %v2604_v42 = vpop.f32.mrb[25].mxu0  ;;  %v2830_v43 = vpop.f32.mrb[89].mxu1  ;;  %3472 = vmatprep.subr.bf16.mxu0 %v8923_v45 }
 0x3c5   : > { %v8045_v59 = vadd.f32 %v2604_v42, %v10602_v47  ;;  %v8077_v60 = vadd.f32 %v2830_v43, %v10605_v31  ;;  %v2606_v48 = vpop.f32.mrb[26].mxu0  ;;  %v2832_v49 = vpop.f32.mrb[90].mxu1  ;;  %3421 = vmatprep.mubr.bf16.mxu0 %v2932_v61  ;;  %v8932_v61 = vld [vmem:[#allocation10 + $0x1d4] ss:$8 sps:$4 sm:$0xff]  }
 0x3c6   : > { %v8046_v50 = vadd.f32 %v2606_v48, %v10596_v30  ;;  %v8078_v51 = vadd.f32 %v2832_v49, %v10599_v44  ;;  %v2608_v52 = vpop.f32.mrb[27].mxu0  ;;  %v2834_v53 = vpop.f32.mrb[91].mxu1  ;;  %3422 = vmatmul.mubr.bf16.gmra.mrb[52].mxu0 %v2931_v29  ;;  %v2895_v6 = vmax.f32 %v8044_v23, 0.0  ;;  %v2897_v7 = vmax.f32 %v8076_v40, 0.0 }
 0x3c7   : > { %v8047_v63 = vadd.f32 %v2608_v52, %v10602_v47  ;;  %v8079_v0 = vadd.f32 %v2834_v53, %v10605_v31  ;;  %3473 = vmatpush1.bf16.msra.mxu0 %v8921_v11  ;;  %v2896_v13 = vmax.f32 %v8045_v59, 0.0  ;;  %v2898_v14 = vmax.f32 %v8077_v60, 0.0  ;;  %v8930_v60 = vld [vmem:[#allocation10 + $0x1d0] ss:$8 sps:$4 sm:$0xff]   ;;  %v8935_v52 = vld [vmem:[#allocation10 + $0x1e4] ss:$8 sps:$4 sm:$0xff]  }
 0x3c8   : > { %v2899_v9 = vmax.f32 %v8046_v50, 0.0  ;;  %v2901_v10 = vmax.f32 %v8078_v51, 0.0  ;;  %3474 = vmatprep.subr.bf16.mxu0 %v8926_v39 }
 0x3c9   : > { %v2900_v16 = vmax.f32 %v8047_v63, 0.0  ;;  %v2902_v17 = vmax.f32 %v8079_v0, 0.0 }
 0x3ca   : > { %v2935_v18 = vpack.c.bf16 %v2899_v9, %v2895_v6  ;;  %v10687_v19 = vpack.c.bf16 %v2901_v10, %v2897_v7  ;;  %v8936_v6 = vld [vmem:[#allocation10 + $0x1f0] ss:$8 sps:$4 sm:$0xff]  }
 0x3cb   : > { %v2936_v22 = vpack.c.bf16 %v2900_v16, %v2896_v13  ;;  %v2938_v24 = vpack.c.bf16 %v2902_v17, %v2898_v14  ;;  %v2612_v45 = vpop.f32.mrb[28].mxu0  ;;  %v2838_v27 = vpop.f32.mrb[92].mxu1  ;;  %3475 = vmatpush1.bf16.msra.mxu0 %v8924_v2 }
 0x3cc   : > { %v8048_v41 = vadd.f32 %v2612_v45, %v10596_v30  ;;  %v8080_v15 = vadd.f32 %v2838_v27, %v10599_v44  ;;  %v2614_v29 = vpop.f32.mrb[29].mxu0  ;;  %v2840_v32 = vpop.f32.mrb[93].mxu1  ;;  %3476 = vmatprep.subr.bf16.mxu0 %v8929_v12  ;;  %v8992_v27 = vld [vmem:[#allocation13 + $0x14] ss:$8 sps:$4 sm:$0xff]  }
 0x3cd   : > { %v8049_v34 = vadd.f32 %v2614_v29, %v10602_v47  ;;  %v8081_v8 = vadd.f32 %v2840_v32, %v10605_v31  ;;  %v2616_v11 = vpop.f32.mrb[30].mxu0  ;;  %v2842_v37 = vpop.f32.mrb[94].mxu1  ;;  %3431 = vmatprep.mubr.bf16.mxu0 %v2936_v22  ;;  %v8987_v22 = vld [vmem:[#allocation13] ss:$8 sps:$4 sm:$0xff]  }
 0x3ce   : > { %v8050_v23 = vadd.f32 %v2616_v11, %v10596_v30  ;;  %v8082_v40 = vadd.f32 %v2842_v37, %v10599_v44  ;;  %v2618_v42 = vpop.f32.mrb[31].mxu0  ;;  %v2844_v43 = vpop.f32.mrb[95].mxu1  ;;  %3432 = vmatmul.mubr.bf16.gmra.mrb[56].mxu0 %v2935_v18  ;;  %v2903_v48 = vmax.f32 %v8048_v41, 0.0  ;;  %v2905_v49 = vmax.f32 %v8080_v15, 0.0  ;;  %v8995_v11 = vld [vmem:[#allocation13 + $0x24] ss:$8 sps:$4 sm:$0xff]  }
 0x3cf   : > { %v8051_v39 = vadd.f32 %v2618_v42, %v10602_v47  ;;  %v8083_v59 = vadd.f32 %v2844_v43, %v10605_v31  ;;  %3477 = vmatpush1.bf16.msra.mxu0 %v8927_v28  ;;  %v2904_v53 = vmax.f32 %v8049_v34, 0.0  ;;  %v2906_v30 = vmax.f32 %v8081_v8, 0.0  ;;  %v8933_v47 = vld [vmem:[#allocation10 + $0x1e0] ss:$8 sps:$4 sm:$0xff]   ;;  %v8938_v31 = vld [vmem:[#allocation10 + $0x1f4] ss:$8 sps:$4 sm:$0xff]  }
 0x3d0   : > { %v2907_v50 = vmax.f32 %v8050_v23, 0.0  ;;  %v2909_v51 = vmax.f32 %v8082_v40, 0.0  ;;  %3478 = vmatprep.subr.bf16.mxu0 %v8932_v61  ;;  %v8990_v61 = vld [vmem:[#allocation13 + $0x10] ss:$8 sps:$4 sm:$0xff]  }
 0x3d1   : > { %v2908_v62 = vmax.f32 %v8051_v39, 0.0  ;;  %v2910_v44 = vmax.f32 %v8083_v59, 0.0  ;;  %v8993_v39 = vld [vmem:[#allocation13 + $0x20] ss:$8 sps:$4 sm:$0xff]  }
 0x3d2   : > { %v2939_v63 = vpack.c.bf16 %v2907_v50, %v2903_v48  ;;  %v2941_v0 = vpack.c.bf16 %v2909_v51, %v2905_v49  ;;  %v8998_v48 = vld [vmem:[#allocation13 + $0x34] ss:$8 sps:$4 sm:$0xff]  }
 0x3d3   : > { %v2940_v2 = vpack.c.bf16 %v2908_v62, %v2904_v53  ;;  %v2942_v4 = vpack.c.bf16 %v2910_v44, %v2906_v30  ;;  %3479 = vmatpush1.bf16.msra.mxu0 %v8930_v60  ;;  %v8996_v30 = vld [vmem:[#allocation13 + $0x30] ss:$8 sps:$4 sm:$0xff]  }
 0x3d4   : > { %3480 = vmatprep.subr.bf16.mxu0 %v8935_v52 }
 0x3d5   : > { %3441 = vmatprep.mubr.bf16.mxu0 %v2940_v2 }
 0x3d6   : > { %3442 = vmatmul.mubr.bf16.gmra.mrb[60].mxu0 %v2939_v63  ;;  %v9001_v63 = vld [vmem:[#allocation13 + $0x44] ss:$8 sps:$4 sm:$0xff]  }
 0x3d7   : > { %3481 = vmatpush1.bf16.msra.mxu0 %v8933_v47  ;;  %3484 = vmatprep.mubr.bf16.mxu0 %v10617_v3  ;;  %v8981_v3 = vld [vmem:[#allocation11 + $0xe0] ss:$8 sps:$4 sm:$0xff]  }
 0x3d8   : > { %3482 = vmatprep.subr.bf16.mxu0 %v8938_v31 }
 0x3db   : > { %3483 = vmatpush1.bf16.msra.mxu0 %v8936_v6  ;;  %v8999_v6 = vld [vmem:[#allocation13 + $0x40] ss:$8 sps:$4 sm:$0xff]  }
 0x3de   : > { %3485 = vmatmul.mubr.bf16.vlgmr.msra.gmra.mrb[32].mxu0 %v10615_v1  ;;  %v8983_v1 = vld [vmem:[#allocation11 + $0xe4] ss:$8 sps:$4 sm:$0xff]  }
 0x3df   : > { %3494 = vmatprep.mubr.bf16.mxu0 %v10629_v26  ;;  %3845 = vmatprep.subr.bf16.mxu1 %v8983_v1  ;;  %v8984_v26 = vld [vmem:[#allocation11 + $0xf0] ss:$8 sps:$4 sm:$0xff]  }
 0x3e0   : > { %3846 = vmatpush1.bf16.msra.mxu1 %v8981_v3 }
 0x3e6   : > { %3495 = vmatmul.mubr.bf16.gmra.mrb[36].mxu0 %v10627_v38  ;;  %v8986_v38 = vld [vmem:[#allocation11 + $0xf4] ss:$8 sps:$4 sm:$0xff]  }
 0x3e7   : > { %3504 = vmatprep.mubr.bf16.mxu0 %v10641_v25  ;;  %3847 = vmatprep.subr.bf16.mxu1 %v8986_v38  ;;  %v3007_v25 = vld [vmem:[%s11564_s13] sm:$0x3]  ;;  %s7160_s13 = sshll.u32 %s10771_s20, 4  ;;  %s11273_s13 = int_to_ptr.vmem [resolvable:$true] %s7160_s13 }
 0x3e8   : > { %3848 = vmatpush1.bf16.msra.mxu1 %v8984_v26 }
 0x3ee   : > { %3505 = vmatmul.mubr.bf16.gmra.mrb[40].mxu0 %v10639_v21  ;;  %v8989_v21 = vld [vmem:[#allocation13 + $0x4] ss:$8 sps:$4 sm:$0xff]  }
 0x3ef   : > { %3514 = vmatprep.mubr.bf16.mxu0 %v10653_v5  ;;  %4206 = vmatprep.subr.bf16.mxu1 %v8989_v21  ;;  %v10717_v5 = vrot.slane %v3007_v25, %v10504_v57 }
 0x3f6   : > { %3515 = vmatmul.mubr.bf16.gmra.mrb[44].mxu0 %v10651_v56  ;;  %v10714_v56 = vrot.slane %v3007_v25, %v10496_v55 }
 0x3f7   : > { %3524 = vmatprep.mubr.bf16.mxu0 %v10665_v46 }
 0x3fe   : > { %3525 = vmatmul.mubr.bf16.gmra.mrb[48].mxu0 %v10663_v54 }
 0x3ff   : > { %3534 = vmatprep.mubr.bf16.mxu0 %v10677_v33 }
 0x406   : > { %3535 = vmatmul.mubr.bf16.gmra.mrb[52].mxu0 %v10675_v58 }
 0x407   : > { %3544 = vmatprep.mubr.bf16.mxu0 %v2938_v24 }
 0x40e   : > { %3545 = vmatmul.mubr.bf16.gmra.mrb[56].mxu0 %v10687_v19 }
 0x40f   : > { %3554 = vmatprep.mubr.bf16.mxu0 %v2942_v4 }
 0x416   : > { %3555 = vmatmul.mubr.bf16.gmra.mrb[60].mxu0 %v2941_v0 }
 0x4b1   : > { %v3486_v54 = vpop.f32.mrb[32].mxu0 }
 0x4b2   : > { %v8084_v46 = vadd.f32 %v3486_v54, %v10714_v56  ;;  %v3488_v58 = vpop.f32.mrb[33].mxu0 }
 0x4b3   : > { %v8085_v33 = vadd.f32 %v3488_v58, %v10717_v5  ;;  %v3490_v7 = vpop.f32.mrb[34].mxu0 }
 0x4b4   : > { %v8086_v9 = vadd.f32 %v3490_v7, %v10714_v56  ;;  %v3492_v10 = vpop.f32.mrb[35].mxu0  ;;  %v3565_v13 = vmax.f32 %v8084_v46, 0.0 }
 0x4b5   : > { %v8087_v12 = vadd.f32 %v3492_v10, %v10717_v5  ;;  %v3566_v16 = vmax.f32 %v8085_v33, 0.0 }
 0x4b6   : > { %v3567_v14 = vmax.f32 %v8086_v9, 0.0 }
 0x4b7   : > { %v3568_v17 = vmax.f32 %v8087_v12, 0.0 }
 0x4b8   : > { %v3597_v18 = vpack.c.bf16 %v3567_v14, %v3565_v13 }
 0x4b9   : > { %v3598_v19 = vpack.c.bf16 %v3568_v17, %v3566_v16  ;;  %v3496_v20 = vpop.f32.mrb[36].mxu0 }
 0x4ba   : > { %v8088_v24 = vadd.f32 %v3496_v20, %v10714_v56  ;;  %v3498_v45 = vpop.f32.mrb[37].mxu0 }
 0x4bb   : > { %v8089_v28 = vadd.f32 %v3498_v45, %v10717_v5  ;;  %v3500_v41 = vpop.f32.mrb[38].mxu0  ;;  %3849 = vmatprep.mubr.bf16.mxu1 %v3598_v19 }
 0x4bc   : > { %v8090_v15 = vadd.f32 %v3500_v41, %v10714_v56  ;;  %v3502_v29 = vpop.f32.mrb[39].mxu0  ;;  %3850 = vmatmul.mubr.bf16.vlgmr.msra.gmra.mrb[96].mxu1 %v3597_v18  ;;  %v3569_v34 = vmax.f32 %v8088_v24, 0.0 }
 0x4bd   : > { %v8091_v32 = vadd.f32 %v3502_v29, %v10717_v5  ;;  %4207 = vmatpush1.bf16.msra.mxu1 %v8987_v22  ;;  %v3570_v37 = vmax.f32 %v8089_v28, 0.0 }
 0x4be   : > { %v3571_v8 = vmax.f32 %v8090_v15, 0.0  ;;  %4208 = vmatprep.subr.bf16.mxu1 %v8992_v27 }
 0x4bf   : > { %v3572_v23 = vmax.f32 %v8091_v32, 0.0 }
 0x4c0   : > { %v3599_v40 = vpack.c.bf16 %v3571_v8, %v3569_v34 }
 0x4c1   : > { %v3600_v42 = vpack.c.bf16 %v3572_v23, %v3570_v37  ;;  %v3506_v43 = vpop.f32.mrb[40].mxu0  ;;  %4209 = vmatpush1.bf16.msra.mxu1 %v8990_v61 }
 0x4c2   : > { %v8092_v59 = vadd.f32 %v3506_v43, %v10714_v56  ;;  %v3508_v60 = vpop.f32.mrb[41].mxu0  ;;  %4210 = vmatprep.subr.bf16.mxu1 %v8995_v11 }
 0x4c3   : > { %v8093_v49 = vadd.f32 %v3508_v60, %v10717_v5  ;;  %v3510_v50 = vpop.f32.mrb[42].mxu0  ;;  %3859 = vmatprep.mubr.bf16.mxu1 %v3600_v42 }
 0x4c4   : > { %v8094_v51 = vadd.f32 %v3510_v50, %v10714_v56  ;;  %v3512_v52 = vpop.f32.mrb[43].mxu0  ;;  %3860 = vmatmul.mubr.bf16.gmra.mrb[100].mxu1 %v3599_v40  ;;  %v3573_v62 = vmax.f32 %v8092_v59, 0.0 }
 0x4c5   : > { %v8095_v53 = vadd.f32 %v3512_v52, %v10717_v5  ;;  %4211 = vmatpush1.bf16.msra.mxu1 %v8993_v39  ;;  %v3574_v0 = vmax.f32 %v8093_v49, 0.0 }
 0x4c6   : > { %v3575_v44 = vmax.f32 %v8094_v51, 0.0  ;;  %4212 = vmatprep.subr.bf16.mxu1 %v8998_v48 }
 0x4c7   : > { %v3576_v2 = vmax.f32 %v8095_v53, 0.0 }
 0x4c8   : > { %v3601_v4 = vpack.c.bf16 %v3575_v44, %v3573_v62 }
 0x4c9   : > { %v3602_v47 = vpack.c.bf16 %v3576_v2, %v3574_v0  ;;  %v3516_v31 = vpop.f32.mrb[44].mxu0  ;;  %4213 = vmatpush1.bf16.msra.mxu1 %v8996_v30 }
 0x4ca   : > { %v8096_v1 = vadd.f32 %v3516_v31, %v10714_v56  ;;  %v3518_v3 = vpop.f32.mrb[45].mxu0  ;;  %4214 = vmatprep.subr.bf16.mxu1 %v9001_v63 }
 0x4cb   : > { %v8097_v38 = vadd.f32 %v3518_v3, %v10717_v5  ;;  %v3520_v26 = vpop.f32.mrb[46].mxu0  ;;  %3869 = vmatprep.mubr.bf16.mxu1 %v3602_v47 }
 0x4cc   : > { %v8098_v21 = vadd.f32 %v3520_v26, %v10714_v56  ;;  %v3522_v25 = vpop.f32.mrb[47].mxu0  ;;  %3870 = vmatmul.mubr.bf16.gmra.mrb[104].mxu1 %v3601_v4  ;;  %v3577_v46 = vmax.f32 %v8096_v1, 0.0 }
 0x4cd   : > { %v8099_v54 = vadd.f32 %v3522_v25, %v10717_v5  ;;  %4215 = vmatpush1.bf16.msra.mxu1 %v8999_v6  ;;  %v3578_v33 = vmax.f32 %v8097_v38, 0.0 }
 0x4ce   : > { %v3579_v58 = vmax.f32 %v8098_v21, 0.0 }
 0x4cf   : > { %v3580_v7 = vmax.f32 %v8099_v54, 0.0 }
 0x4d0   : > { %v3603_v9 = vpack.c.bf16 %v3579_v58, %v3577_v46 }
 0x4d1   : > { %v3604_v10 = vpack.c.bf16 %v3580_v7, %v3578_v33  ;;  %v3526_v12 = vpop.f32.mrb[48].mxu0 }
 0x4d2   : > { %v8100_v13 = vadd.f32 %v3526_v12, %v10714_v56  ;;  %v3528_v14 = vpop.f32.mrb[49].mxu0  ;;  %v9007_v12 = vld [vmem:[#allocation13 + $0x64] ss:$8 sps:$4 sm:$0xff]  }
 0x4d3   : > { %v8101_v16 = vadd.f32 %v3528_v14, %v10717_v5  ;;  %v3530_v17 = vpop.f32.mrb[50].mxu0  ;;  %3879 = vmatprep.mubr.bf16.mxu1 %v3604_v10  ;;  %v9002_v10 = vld [vmem:[#allocation13 + $0x50] ss:$8 sps:$4 sm:$0xff]  }
 0x4d4   : > { %v8102_v18 = vadd.f32 %v3530_v17, %v10714_v56  ;;  %v3532_v19 = vpop.f32.mrb[51].mxu0  ;;  %3880 = vmatmul.mubr.bf16.gmra.mrb[108].mxu1 %v3603_v9  ;;  %v3581_v22 = vmax.f32 %v8100_v13, 0.0  ;;  %v9004_v9 = vld [vmem:[#allocation13 + $0x54] ss:$8 sps:$4 sm:$0xff]   ;;  %v9005_v13 = vld [vmem:[#allocation13 + $0x60] ss:$8 sps:$4 sm:$0xff]  }
 0x4d5   : > { %v8103_v20 = vadd.f32 %v3532_v19, %v10717_v5  ;;  %v3582_v45 = vmax.f32 %v8101_v16, 0.0  ;;  %4216 = vmatprep.subr.bf16.mxu1 %v9004_v9  ;;  %v9008_v14 = vld [vmem:[#allocation13 + $0x70] ss:$8 sps:$4 sm:$0xff]   ;;  %v9013_v17 = vld [vmem:[#allocation14 + $0x4] ss:$16 sps:$4 sm:$0xff]  }
 0x4d6   : > { %v3583_v24 = vmax.f32 %v8102_v18, 0.0  ;;  %4217 = vmatpush1.bf16.msra.mxu1 %v9002_v10  ;;  %v9011_v16 = vld [vmem:[#allocation14] ss:$16 sps:$4 sm:$0xff]   ;;  %v9016_v18 = vld [vmem:[#allocation14 + $0xc] ss:$16 sps:$4 sm:$0xff]   ;;  %4773 = vmatprep.subr.bf16.mxu0 %v9013_v17 }
 0x4d7   : > { %v3584_v27 = vmax.f32 %v8103_v20, 0.0  ;;  %4218 = vmatprep.subr.bf16.mxu1 %v9007_v12  ;;  %v9019_v19 = vld [vmem:[#allocation14 + $0x24] ss:$16 sps:$4 sm:$0xff]   ;;  %4774 = vmatpush1.bf16.msra.mxu0 %v9011_v16  ;;  %v9017_v20 = vld [vmem:[#allocation14 + $0x20] ss:$16 sps:$4 sm:$0xff]  }
 0x4d8   : > { %v3605_v28 = vpack.c.bf16 %v3583_v24, %v3581_v22  ;;  %4775 = vmatprep.subr.bf16.mxu0 %v9019_v19  ;;  %v9025_v22 = vld [vmem:[#allocation14 + $0x44] ss:$16 sps:$4 sm:$0xff]   ;;  %v9023_v24 = vld [vmem:[#allocation14 + $0x40] ss:$16 sps:$4 sm:$0xff]  }
 0x4d9   : > { %v3606_v41 = vpack.c.bf16 %v3584_v27, %v3582_v45  ;;  %v3536_v15 = vpop.f32.mrb[52].mxu0  ;;  %v9031_v45 = vld [vmem:[#allocation14 + $0x64] ss:$16 sps:$4 sm:$0xff]   ;;  %v9029_v27 = vld [vmem:[#allocation14 + $0x60] ss:$16 sps:$4 sm:$0xff]  }
 0x4da   : > { %v8104_v29 = vadd.f32 %v3536_v15, %v10714_v56  ;;  %v3538_v32 = vpop.f32.mrb[53].mxu0  ;;  %4219 = vmatpush1.bf16.msra.mxu1 %v9005_v13  ;;  %v9043_v15 = vld [vmem:[#allocation14 + $0xa4] ss:$16 sps:$4 sm:$0xff]  }
 0x4db   : > { %v8105_v61 = vadd.f32 %v3538_v32, %v10717_v5  ;;  %v3540_v34 = vpop.f32.mrb[54].mxu0  ;;  %3889 = vmatprep.mubr.bf16.mxu1 %v3606_v41  ;;  %4776 = vmatpush1.bf16.msra.mxu0 %v9017_v20  ;;  %v9035_v41 = vld [vmem:[#allocation14 + $0x80] ss:$16 sps:$4 sm:$0xff]   ;;  %v9049_v32 = vld [vmem:[#allocation14 + $0xc4] ss:$16 sps:$4 sm:$0xff]  }
 0x4dc   : > { %v8106_v8 = vadd.f32 %v3540_v34, %v10714_v56  ;;  %v3542_v11 = vpop.f32.mrb[55].mxu0  ;;  %3890 = vmatmul.mubr.bf16.gmra.mrb[112].mxu1 %v3605_v28  ;;  %v3585_v23 = vmax.f32 %v8104_v29, 0.0  ;;  %4777 = vmatprep.subr.bf16.mxu0 %v9025_v22  ;;  %v9037_v28 = vld [vmem:[#allocation14 + $0x84] ss:$16 sps:$4 sm:$0xff]   ;;  %v9041_v29 = vld [vmem:[#allocation14 + $0xa0] ss:$16 sps:$4 sm:$0xff]  }
 0x4dd   : > { %v8107_v37 = vadd.f32 %v3542_v11, %v10717_v5  ;;  %v3586_v42 = vmax.f32 %v8105_v61, 0.0  ;;  %v9047_v61 = vld [vmem:[#allocation14 + $0xc0] ss:$16 sps:$4 sm:$0xff]   ;;  %v9055_v34 = vld [vmem:[#allocation14 + $0xe4] ss:$16 sps:$4 sm:$0xff]  }
 0x4de   : > { %v3587_v40 = vmax.f32 %v8106_v8, 0.0  ;;  %v9053_v8 = vld [vmem:[#allocation14 + $0xe0] ss:$16 sps:$4 sm:$0xff]   ;;  %v9061_v11 = vld [vmem:[#allocation14 + $0x104] ss:$16 sps:$4 sm:$0xff]  }
 0x4df   : > { %v3588_v43 = vmax.f32 %v8107_v37, 0.0  ;;  %4778 = vmatpush1.bf16.msra.mxu0 %v9023_v24  ;;  %v9059_v37 = vld [vmem:[#allocation14 + $0x100] ss:$16 sps:$4 sm:$0xff]  }
 0x4e0   : > { %v3607_v39 = vpack.c.bf16 %v3587_v40, %v3585_v23  ;;  %4779 = vmatprep.subr.bf16.mxu0 %v9031_v45  ;;  %v9067_v23 = vld [vmem:[#allocation14 + $0x124] ss:$16 sps:$4 sm:$0xff]   ;;  %v9065_v40 = vld [vmem:[#allocation14 + $0x120] ss:$16 sps:$4 sm:$0xff]  }
 0x4e1   : > { %v3608_v59 = vpack.c.bf16 %v3588_v43, %v3586_v42  ;;  %v3546_v60 = vpop.f32.mrb[56].mxu0  ;;  %v9073_v42 = vld [vmem:[#allocation14 + $0x144] ss:$16 sps:$4 sm:$0xff]   ;;  %v3645_v43 = vld [vmem:[%s11565_s11] sm:$0x3]  ;;  %s11569_s11 = sld [smem:[#allocation49_spill]] }
 0x4e2   : > { %v8108_v48 = vadd.f32 %v3546_v60, %v10714_v56  ;;  %v3548_v49 = vpop.f32.mrb[57].mxu0  ;;  %v9079_v60 = vld [vmem:[#allocation14 + $0x164] ss:$16 sps:$4 sm:$0xff]  }
 0x4e3   : > { %v8109_v50 = vadd.f32 %v3548_v49, %v10717_v5  ;;  %v3550_v51 = vpop.f32.mrb[58].mxu0  ;;  %3899 = vmatprep.mubr.bf16.mxu1 %v3608_v59  ;;  %4780 = vmatpush1.bf16.msra.mxu0 %v9029_v27  ;;  %v10756_v59 = vrot.slane %v3645_v43, %v10496_v55  ;;  %v3994_v45 = vld [vmem:[%s10371_s10] sm:$0xff] }
 0x4e4   : > { %v8110_v52 = vadd.f32 %v3550_v51, %v10714_v56  ;;  %v3552_v53 = vpop.f32.mrb[59].mxu0  ;;  %3900 = vmatmul.mubr.bf16.gmra.mrb[116].mxu1 %v3607_v39  ;;  %v3589_v62 = vmax.f32 %v8108_v48, 0.0  ;;  %4781 = vmatprep.subr.bf16.mxu0 %v9037_v28  ;;  %v9071_v39 = vld [vmem:[#allocation14 + $0x140] ss:$16 sps:$4 sm:$0xff]   ;;  %v10759_v48 = vrot.slane %v3645_v43, %v10504_v57 }
 0x4e5   : > { %v8111_v30 = vadd.f32 %v3552_v53, %v10717_v5  ;;  %v3590_v63 = vmax.f32 %v8109_v50, 0.0  ;;  %v9077_v50 = vld [vmem:[#allocation14 + $0x160] ss:$16 sps:$4 sm:$0xff]   ;;  %v9085_v53 = vld [vmem:[#allocation14 + $0x184] ss:$16 sps:$4 sm:$0xff]  }
 0x4e6   : > { %v3591_v44 = vmax.f32 %v8110_v52, 0.0 }
 0x4e7   : > { %v3592_v0 = vmax.f32 %v8111_v30, 0.0  ;;  %4782 = vmatpush1.bf16.msra.mxu0 %v9035_v41  ;;  %s11271_s26 = scalar_lea.hbm %s11569_s11, %s8018_s9 }
 0x4e8   : > { %v3609_v2 = vpack.c.bf16 %v3591_v44, %v3589_v62  ;;  %4783 = vmatprep.subr.bf16.mxu0 %v9043_v15 }
 0x4e9   : > { %v3610_v4 = vpack.c.bf16 %v3592_v0, %v3590_v63  ;;  %v3556_v47 = vpop.f32.mrb[60].mxu0 }
 0x4ea   : > { %v8112_v31 = vadd.f32 %v3556_v47, %v10714_v56  ;;  %v3558_v6 = vpop.f32.mrb[61].mxu0  ;;  %v9083_v47 = vld [vmem:[#allocation14 + $0x180] ss:$16 sps:$4 sm:$0xff]  }
 0x4eb   : > { %v8113_v1 = vadd.f32 %v3558_v6, %v10717_v5  ;;  %v3560_v3 = vpop.f32.mrb[62].mxu0  ;;  %3909 = vmatprep.mubr.bf16.mxu1 %v3610_v4  ;;  %4784 = vmatpush1.bf16.msra.mxu0 %v9041_v29  ;;  %v9091_v6 = vld [vmem:[#allocation14 + $0x1a4] ss:$16 sps:$4 sm:$0xff]  }
 0x4ec   : > { %v8114_v38 = vadd.f32 %v3560_v3, %v10714_v56  ;;  %v3562_v26 = vpop.f32.mrb[63].mxu0  ;;  %3910 = vmatmul.mubr.bf16.gmra.mrb[120].mxu1 %v3609_v2  ;;  %v3593_v25 = vmax.f32 %v8112_v31, 0.0  ;;  %v9010_v56 = vld [vmem:[#allocation13 + $0x74] ss:$8 sps:$4 sm:$0xff]   ;;  %4785 = vmatprep.subr.bf16.mxu0 %v9049_v32 }
 0x4ed   : > { %v8115_v21 = vadd.f32 %v3562_v26, %v10717_v5  ;;  %v3594_v46 = vmax.f32 %v8113_v1, 0.0  ;;  %4220 = vmatprep.subr.bf16.mxu1 %v9010_v56  ;;  %v9877_v5 = vmov 0  }
 0x4ee   : > { %v3595_v54 = vmax.f32 %v8114_v38, 0.0  ;;  %4221 = vmatpush1.bf16.msra.mxu1 %v9008_v14 }
 0x4ef   : > { %v3596_v58 = vmax.f32 %v8115_v21, 0.0  ;;  %4886 = vmatprep.subr.bf16.mxu1 %v9016_v18  ;;  %4786 = vmatpush1.bf16.msra.mxu0 %v9047_v61 }
 0x4f0   : > { %v3611_v33 = vpack.c.bf16 %v3595_v54, %v3593_v25  ;;  %4787 = vmatprep.subr.bf16.mxu0 %v9055_v34  ;;  %v9089_v25 = vld [vmem:[#allocation14 + $0x1a0] ss:$16 sps:$4 sm:$0xff]   ;;  %v3995_v34 = vld [vmem:[%s10371_s10 + $0x8] sm:$0xff] }
 0x4f1   : > { %v3612_v7 = vpack.c.bf16 %v3596_v58, %v3594_v46 }
 0x4f3   : > { %3919 = vmatprep.mubr.bf16.mxu1 %v3612_v7  ;;  %4788 = vmatpush1.bf16.msra.mxu0 %v9053_v8 }
 0x4f4   : > { %3920 = vmatmul.mubr.bf16.gmra.mrb[124].mxu1 %v3611_v33  ;;  %4789 = vmatprep.subr.bf16.mxu0 %v9061_v11 }
 0x4f5   : > { %4238 = vmatprep.mubr.bf16.mxu1 %v9877_v5 }
 0x4f7   : > { %4790 = vmatpush1.bf16.msra.mxu0 %v9059_v37 }
 0x4f8   : > { %4791 = vmatprep.subr.bf16.mxu0 %v9067_v23 }
 0x4fb   : > { %4792 = vmatpush1.bf16.msra.mxu0 %v9065_v40 }
 0x4fc   : > { %4793 = vmatprep.subr.bf16.mxu0 %v9073_v42 }
 0x4ff   : > { %4794 = vmatpush1.bf16.msra.mxu0 %v9071_v39 }
 0x500   : > { %4795 = vmatprep.subr.bf16.mxu0 %v9079_v60 }
 0x503   : > { %4796 = vmatpush1.bf16.msra.mxu0 %v9077_v50 }
 0x504   : > { %4797 = vmatprep.subr.bf16.mxu0 %v9085_v53 }
 0x507   : > { %4798 = vmatpush1.bf16.msra.mxu0 %v9083_v47 }
 0x508   : > { %4799 = vmatprep.subr.bf16.mxu0 %v9091_v6 }
 0x50b   : > { %4800 = vmatpush1.bf16.msra.mxu0 %v9089_v25 }
 0x58f   : > { %v3851_v49 = vpop.f32.mrb[96].mxu1 }
 0x590   : > { %v10762_v51 = vadd.f32 %v3851_v49, %v10756_v59  ;;  %v3853_v52 = vpop.f32.mrb[97].mxu1 }
 0x591   : > { %v3854_v30 = vadd.f32 %v3853_v52, %v10759_v48  ;;  %v3855_v62 = vpop.f32.mrb[98].mxu1 }
 0x592   : > { %v3930_v44 = vmax.f32 %v10762_v51, 0.0  ;;  %v10767_v63 = vadd.f32 %v3855_v62, %v10756_v59  ;;  %v3857_v0 = vpop.f32.mrb[99].mxu1  ;;  %v3996_v51 = vld [vmem:[%s10371_s10 + $0x10] sm:$0xff] }
 0x593   : > { %v3931_v2 = vmax.f32 %v3854_v30, 0.0  ;;  %v3858_v4 = vadd.f32 %v3857_v0, %v10759_v48 }
 0x594   : > { %3962 = vst [vmem:[%s10771_s20] sm:$0xff] %v3930_v44  ;;  %v3932_v31 = vmax.f32 %v10767_v63, 0.0 }
 0x595   : > { %3978 = vst [vmem:[%s10778_s28] sm:$0xff] %v3931_v2  ;;  %v4010_v1 = vmul.f32 0.5, %v3931_v2  ;;  %v3933_v3 = vmax.f32 %v3858_v4, 0.0 }
 0x596   : > { %3963 = vst [vmem:[%s10771_s20 + $0x8] sm:$0xff] %v3932_v31 }
 0x597   : > { %v4026_v38 = vmul.f32 1.442695, %v4010_v1  ;;  %3979 = vst [vmem:[%s10778_s28 + $0x8] sm:$0xff] %v3933_v3  ;;  %v4011_v26 = vmul.f32 0.5, %v3933_v3  ;;  %v3861_v21 = vpop.f32.mrb[100].mxu1 }
 0x598   : > { %v10786_v54 = vadd.f32 %v3861_v21, %v10756_v59  ;;  %v3863_v46 = vpop.f32.mrb[101].mxu1  ;;  %v3997_v21 = vld [vmem:[%s10371_s10 + $0x18] sm:$0xff] }
 0x599   : > { %9395 = vpow2.f32 %v4026_v38  ;;  %v4028_v58 = vmul.f32 1.442695, %v4011_v26  ;;  %v3864_v33 = vadd.f32 %v3863_v46, %v10759_v48  ;;  %v3865_v7 = vpop.f32.mrb[102].mxu1  ;;  %v9022_v38 = vld [vmem:[#allocation14 + $0x2c] ss:$16 sps:$4 sm:$0xff]  }
 0x59a   : > { %v3934_v9 = vmax.f32 %v10786_v54, 0.0  ;;  %v10791_v10 = vadd.f32 %v3865_v7, %v10756_v59  ;;  %v3867_v12 = vpop.f32.mrb[103].mxu1 }
 0x59b   : > { %9397 = vpow2.f32 %v4028_v58  ;;  %v3935_v13 = vmax.f32 %v3864_v33, 0.0  ;;  %v3868_v56 = vadd.f32 %v3867_v12, %v10759_v48  ;;  %v9020_v12 = vld [vmem:[#allocation14 + $0x28] ss:$16 sps:$4 sm:$0xff]  }
 0x59c   : > { %3964 = vst [vmem:[%s10771_s20 + $0x10] sm:$0xff] %v3934_v9  ;;  %v3936_v14 = vmax.f32 %v10791_v10, 0.0  ;;  %v9034_v10 = vld [vmem:[#allocation14 + $0x6c] ss:$16 sps:$4 sm:$0xff]  }
 0x59d   : > { %3980 = vst [vmem:[%s10778_s28 + $0x10] sm:$0xff] %v3935_v13  ;;  %v4012_v16 = vmul.f32 0.5, %v3935_v13  ;;  %v3937_v17 = vmax.f32 %v3868_v56, 0.0 }
 0x59e   : > { %3965 = vst [vmem:[%s10771_s20 + $0x18] sm:$0xff] %v3936_v14 }
 0x59f   : > { %v4030_v18 = vmul.f32 1.442695, %v4012_v16  ;;  %3981 = vst [vmem:[%s10778_s28 + $0x18] sm:$0xff] %v3937_v17  ;;  %v4013_v19 = vmul.f32 0.5, %v3937_v17  ;;  %v3871_v20 = vpop.f32.mrb[104].mxu1 }
 0x5a0   : > { %v10804_v22 = vadd.f32 %v3871_v20, %v10756_v59  ;;  %v3873_v24 = vpop.f32.mrb[105].mxu1  ;;  %v9028_v16 = vld [vmem:[#allocation14 + $0x4c] ss:$16 sps:$4 sm:$0xff]  }
 0x5a1   : > { %9399 = vpow2.f32 %v4030_v18  ;;  %v4032_v27 = vmul.f32 1.442695, %v4013_v19  ;;  %v3874_v28 = vadd.f32 %v3873_v24, %v10759_v48  ;;  %v3875_v41 = vpop.f32.mrb[106].mxu1 }
 0x5a2   : > { %v3938_v15 = vmax.f32 %v10804_v22, 0.0  ;;  %v10810_v29 = vadd.f32 %v3875_v41, %v10756_v59  ;;  %v3877_v32 = vpop.f32.mrb[107].mxu1  ;;  %v9026_v41 = vld [vmem:[#allocation14 + $0x48] ss:$16 sps:$4 sm:$0xff]  }
 0x5a3   : > { %v9396_v61 = vpop.eup %9395  ;;  %9401 = vpow2.f32 %v4032_v27  ;;  %v3939_v8 = vmax.f32 %v3874_v28, 0.0  ;;  %v3878_v11 = vadd.f32 %v3877_v32, %v10759_v48 }
 0x5a4   : > { %v4058_v37 = vmul.f32 %v9396_v61, %v3994_v45  ;;  %3966 = vst [vmem:[%s10771_s20 + $0x20] sm:$0xff] %v3938_v15  ;;  %v3940_v23 = vmax.f32 %v10810_v29, 0.0  ;;  %v9046_v29 = vld [vmem:[#allocation14 + $0xac] ss:$16 sps:$4 sm:$0xff]  }
 0x5a5   : > { %v9398_v40 = vpop.eup %9397  ;;  %3982 = vst [vmem:[%s10778_s28 + $0x20] sm:$0xff] %v3939_v8  ;;  %v4014_v42 = vmul.f32 0.5, %v3939_v8  ;;  %v3941_v43 = vmax.f32 %v3878_v11, 0.0 }
 0x5a6   : > { %v4059_v39 = vmul.f32 %v9398_v40, %v3995_v34  ;;  %3967 = vst [vmem:[%s10771_s20 + $0x28] sm:$0xff] %v3940_v23  ;;  %v4074_v60 = vadd.f32 %v4058_v37, %v3930_v44  ;;  %v9014_v44 = vld [vmem:[#allocation14 + $0x8] ss:$16 sps:$4 sm:$0xff]  }
 0x5a7   : > { %v4034_v49 = vmul.f32 1.442695, %v4014_v42  ;;  %3983 = vst [vmem:[%s10778_s28 + $0x28] sm:$0xff] %v3941_v43  ;;  %v4015_v50 = vmul.f32 0.5, %v3941_v43  ;;  %v3881_v52 = vpop.f32.mrb[108].mxu1  ;;  %v3999_v40 = vld [vmem:[%s10371_s10 + $0x28] sm:$0xff] }
 0x5a8   : > { %v10826_v53 = vadd.f32 %v3881_v52, %v10756_v59  ;;  %v3883_v30 = vpop.f32.mrb[109].mxu1  ;;  %v4075_v62 = vadd.f32 %v4059_v39, %v3932_v31 }
 0x5a9   : > { %9403 = vpow2.f32 %v4034_v49  ;;  %v4036_v0 = vmul.f32 1.442695, %v4015_v50  ;;  %v3884_v2 = vadd.f32 %v3883_v30, %v10759_v48  ;;  %v3885_v4 = vpop.f32.mrb[110].mxu1  ;;  %v9032_v50 = vld [vmem:[#allocation14 + $0x68] ss:$16 sps:$4 sm:$0xff]  }
 0x5aa   : > { %v3942_v47 = vmax.f32 %v10826_v53, 0.0  ;;  %v10834_v6 = vadd.f32 %v3885_v4, %v10756_v59  ;;  %v3887_v1 = vpop.f32.mrb[111].mxu1  ;;  %v4090_v3 = vpack.c.bf16 %v4075_v62, %v4074_v60  ;;  %v9040_v62 = vld [vmem:[#allocation14 + $0x8c] ss:$16 sps:$4 sm:$0xff]  }
 0x5ab   : > { %v9400_v63 = vpop.eup %9399  ;;  %9405 = vpow2.f32 %v4036_v0  ;;  %v3943_v31 = vmax.f32 %v3884_v2, 0.0  ;;  %v3888_v26 = vadd.f32 %v3887_v1, %v10759_v48 }
 0x5ac   : > { %3968 = vst [vmem:[%s10771_s20 + $0x30] sm:$0xff] %v3942_v47  ;;  %v3944_v25 = vmax.f32 %v10834_v6, 0.0  ;;  %4239 = vmatmul.mubr.bf16.vlgmr.msra.gmra.mrb[128].mxu1 %v4090_v3  ;;  %v4060_v46 = vmul.f32 %v9400_v63, %v3996_v51  ;;  %v9038_v63 = vld [vmem:[#allocation14 + $0x88] ss:$16 sps:$4 sm:$0xff]   ;;  %v9058_v6 = vld [vmem:[#allocation14 + $0xec] ss:$16 sps:$4 sm:$0xff]  }
 0x5ad   : > { %v9402_v58 = vpop.eup %9401  ;;  %3984 = vst [vmem:[%s10778_s28 + $0x30] sm:$0xff] %v3943_v31  ;;  %v4016_v33 = vmul.f32 0.5, %v3943_v31  ;;  %v3945_v7 = vmax.f32 %v3888_v26, 0.0  ;;  %4248 = vmatprep.mubr.bf16.mxu1 %v9877_v5  ;;  %4887 = vmatpush1.bf16.msra.mxu1 %v9014_v44 }
 0x5ae   : > { %3969 = vst [vmem:[%s10771_s20 + $0x38] sm:$0xff] %v3944_v25  ;;  %v4061_v13 = vmul.f32 %v9402_v58, %v3997_v21  ;;  %v4076_v56 = vadd.f32 %v4060_v46, %v3934_v9  ;;  %4888 = vmatprep.subr.bf16.mxu1 %v9022_v38  ;;  %v3998_v9 = vld [vmem:[%s10371_s10 + $0x20] sm:$0xff] }
 0x5af   : > { %v4038_v17 = vmul.f32 1.442695, %v4016_v33  ;;  %3985 = vst [vmem:[%s10778_s28 + $0x38] sm:$0xff] %v3945_v7  ;;  %v4017_v18 = vmul.f32 0.5, %v3945_v7  ;;  %v3891_v19 = vpop.f32.mrb[112].mxu1  ;;  %v4001_v7 = vld [vmem:[%s10371_s10 + $0x38] sm:$0xff] }
 0x5b0   : > { %v10851_v20 = vadd.f32 %v3891_v19, %v10756_v59  ;;  %v3893_v24 = vpop.f32.mrb[113].mxu1  ;;  %v4077_v45 = vadd.f32 %v4061_v13, %v3936_v14 }
 0x5b1   : > { %9407 = vpow2.f32 %v4038_v17  ;;  %v4040_v27 = vmul.f32 1.442695, %v4017_v18  ;;  %v3894_v28 = vadd.f32 %v3893_v24, %v10759_v48  ;;  %v3895_v54 = vpop.f32.mrb[114].mxu1  ;;  %4889 = vmatpush1.bf16.msra.mxu1 %v9020_v12  ;;  %v9044_v18 = vld [vmem:[#allocation14 + $0xa8] ss:$16 sps:$4 sm:$0xff]  }
 0x5b2   : > { %v3946_v32 = vmax.f32 %v10851_v20, 0.0  ;;  %v10859_v61 = vadd.f32 %v3895_v54, %v10756_v59  ;;  %v3897_v34 = vpop.f32.mrb[115].mxu1  ;;  %v4091_v8 = vpack.c.bf16 %v4077_v45, %v4076_v56  ;;  %4890 = vmatprep.subr.bf16.mxu1 %v9028_v16  ;;  %v9052_v45 = vld [vmem:[#allocation14 + $0xcc] ss:$16 sps:$4 sm:$0xff]  }
 0x5b3   : > { %v9404_v14 = vpop.eup %9403  ;;  %9409 = vpow2.f32 %v4040_v27  ;;  %v3947_v11 = vmax.f32 %v3894_v28, 0.0  ;;  %v3898_v37 = vadd.f32 %v3897_v34, %v10759_v48 }
 0x5b4   : > { %3970 = vst [vmem:[%s10771_s20 + $0x40] sm:$0xff] %v3946_v32  ;;  %v3948_v42 = vmax.f32 %v10859_v61, 0.0  ;;  %4249 = vmatmul.mubr.bf16.gmra.mrb[132].mxu1 %v4091_v8  ;;  %v4062_v43 = vmul.f32 %v9404_v14, %v3998_v9  ;;  %v9050_v14 = vld [vmem:[#allocation14 + $0xc8] ss:$16 sps:$4 sm:$0xff]   ;;  %v9070_v61 = vld [vmem:[#allocation14 + $0x12c] ss:$16 sps:$4 sm:$0xff]  }
 0x5b5   : > { %v9406_v39 = vpop.eup %9405  ;;  %3986 = vst [vmem:[%s10778_s28 + $0x40] sm:$0xff] %v3947_v11  ;;  %v4018_v60 = vmul.f32 0.5, %v3947_v11  ;;  %v3949_v49 = vmax.f32 %v3898_v37, 0.0  ;;  %4258 = vmatprep.mubr.bf16.mxu1 %v9877_v5  ;;  %4891 = vmatpush1.bf16.msra.mxu1 %v9026_v41 }
 0x5b6   : > { %3971 = vst [vmem:[%s10771_s20 + $0x48] sm:$0xff] %v3948_v42  ;;  %v4063_v52 = vmul.f32 %v9406_v39, %v3999_v40  ;;  %v4078_v30 = vadd.f32 %v4062_v43, %v3938_v15  ;;  %4892 = vmatprep.subr.bf16.mxu1 %v9034_v10  ;;  %v4000_v15 = vld [vmem:[%s10371_s10 + $0x30] sm:$0xff] }
 0x5b7   : > { %v4042_v0 = vmul.f32 1.442695, %v4018_v60  ;;  %3987 = vst [vmem:[%s10778_s28 + $0x48] sm:$0xff] %v3949_v49  ;;  %v4019_v2 = vmul.f32 0.5, %v3949_v49  ;;  %v3901_v4 = vpop.f32.mrb[116].mxu1  ;;  %v4003_v49 = vld [vmem:[%s10371_s10 + $0x48] sm:$0xff] }
 0x5b8   : > { %v10876_v51 = vadd.f32 %v3901_v4, %v10756_v59  ;;  %v3903_v44 = vpop.f32.mrb[117].mxu1  ;;  %v4079_v1 = vadd.f32 %v4063_v52, %v3940_v23 }
 0x5b9   : > { %9411 = vpow2.f32 %v4042_v0  ;;  %v4044_v3 = vmul.f32 1.442695, %v4019_v2  ;;  %v3904_v38 = vadd.f32 %v3903_v44, %v10759_v48  ;;  %v3905_v22 = vpop.f32.mrb[118].mxu1  ;;  %4893 = vmatpush1.bf16.msra.mxu1 %v9032_v50  ;;  %v9056_v2 = vld [vmem:[#allocation14 + $0xe8] ss:$16 sps:$4 sm:$0xff]  }
 0x5ba   : > { %v3950_v31 = vmax.f32 %v10876_v51, 0.0  ;;  %v10884_v26 = vadd.f32 %v3905_v22, %v10756_v59  ;;  %v3907_v21 = vpop.f32.mrb[119].mxu1  ;;  %v4092_v46 = vpack.c.bf16 %v4079_v1, %v4078_v30  ;;  %4894 = vmatprep.subr.bf16.mxu1 %v9040_v62  ;;  %v9064_v1 = vld [vmem:[#allocation14 + $0x10c] ss:$16 sps:$4 sm:$0xff]  }
 0x5bb   : > { %v9408_v23 = vpop.eup %9407  ;;  %9413 = vpow2.f32 %v4044_v3  ;;  %v3951_v58 = vmax.f32 %v3904_v38, 0.0  ;;  %v3908_v33 = vadd.f32 %v3907_v21, %v10759_v48 }
 0x5bc   : > { %3972 = vst [vmem:[%s10771_s20 + $0x50] sm:$0xff] %v3950_v31  ;;  %v3952_v12 = vmax.f32 %v10884_v26, 0.0  ;;  %4259 = vmatmul.mubr.bf16.gmra.mrb[136].mxu1 %v4092_v46  ;;  %v4064_v13 = vmul.f32 %v9408_v23, %v4000_v15  ;;  %v9062_v23 = vld [vmem:[#allocation14 + $0x108] ss:$16 sps:$4 sm:$0xff]  }
 0x5bd   : > { %v9410_v56 = vpop.eup %9409  ;;  %3988 = vst [vmem:[%s10778_s28 + $0x50] sm:$0xff] %v3951_v58  ;;  %v4020_v16 = vmul.f32 0.5, %v3951_v58  ;;  %v3953_v17 = vmax.f32 %v3908_v33, 0.0  ;;  %4268 = vmatprep.mubr.bf16.mxu1 %v9877_v5  ;;  %4895 = vmatpush1.bf16.msra.mxu1 %v9038_v63  ;;  %v9080_v26 = vld [vmem:[#allocation14 + $0x168] ss:$16 sps:$4 sm:$0xff]  }
 0x5be   : > { %3973 = vst [vmem:[%s10771_s20 + $0x58] sm:$0xff] %v3952_v12  ;;  %v4065_v19 = vmul.f32 %v9410_v56, %v4001_v7  ;;  %v4080_v24 = vadd.f32 %v4064_v13, %v3942_v47  ;;  %4896 = vmatprep.subr.bf16.mxu1 %v9046_v29  ;;  %v4002_v47 = vld [vmem:[%s10371_s10 + $0x40] sm:$0xff] }
 0x5bf   : > { %v4046_v27 = vmul.f32 1.442695, %v4020_v16  ;;  %3989 = vst [vmem:[%s10778_s28 + $0x58] sm:$0xff] %v3953_v17  ;;  %v4021_v28 = vmul.f32 0.5, %v3953_v17  ;;  %v3911_v54 = vpop.f32.mrb[120].mxu1  ;;  %v4005_v17 = vld [vmem:[%s10371_s10 + $0x58] sm:$0xff] }
 0x5c0   : > { %v10901_v9 = vadd.f32 %v3911_v54, %v10756_v59  ;;  %v3913_v41 = vpop.f32.mrb[121].mxu1  ;;  %v4081_v34 = vadd.f32 %v4065_v19, %v3944_v25  ;;  %v9076_v54 = vld [vmem:[#allocation14 + $0x14c] ss:$16 sps:$4 sm:$0xff]  }
 0x5c1   : > { %9415 = vpow2.f32 %v4046_v27  ;;  %v4048_v8 = vmul.f32 1.442695, %v4021_v28  ;;  %v3914_v10 = vadd.f32 %v3913_v41, %v10759_v48  ;;  %v3915_v53 = vpop.f32.mrb[122].mxu1  ;;  %4897 = vmatpush1.bf16.msra.mxu1 %v9044_v18  ;;  %v9068_v27 = vld [vmem:[#allocation14 + $0x128] ss:$16 sps:$4 sm:$0xff]  }
 0x5c2   : > { %v3954_v11 = vmax.f32 %v10901_v9, 0.0  ;;  %v10909_v37 = vadd.f32 %v3915_v53, %v10756_v59  ;;  %v3917_v40 = vpop.f32.mrb[123].mxu1  ;;  %v4093_v43 = vpack.c.bf16 %v4081_v34, %v4080_v24  ;;  %4898 = vmatprep.subr.bf16.mxu1 %v9052_v45  ;;  %v4006_v53 = vld [vmem:[%s10371_s10 + $0x60] sm:$0xff]  ;;  %v9092_v9 = vld [vmem:[#allocation14 + $0x1a8] ss:$16 sps:$4 sm:$0xff]  }
 0x5c3   : > { %v9412_v25 = vpop.eup %9411  ;;  %9417 = vpow2.f32 %v4048_v8  ;;  %v3955_v39 = vmax.f32 %v3914_v10, 0.0  ;;  %v3918_v60 = vadd.f32 %v3917_v40, %v10759_v48  ;;  %v9082_v40 = vld [vmem:[#allocation14 + $0x16c] ss:$16 sps:$4 sm:$0xff]  }
 0x5c4   : > { %3974 = vst [vmem:[%s10771_s20 + $0x60] sm:$0xff] %v3954_v11  ;;  %v3956_v50 = vmax.f32 %v10909_v37, 0.0  ;;  %4269 = vmatmul.mubr.bf16.gmra.mrb[140].mxu1 %v4093_v43  ;;  %v4066_v52 = vmul.f32 %v9412_v25, %v4002_v47  ;;  %v9074_v47 = vld [vmem:[#allocation14 + $0x148] ss:$16 sps:$4 sm:$0xff]  }
 0x5c5   : > { %v9414_v30 = vpop.eup %9413  ;;  %3990 = vst [vmem:[%s10778_s28 + $0x60] sm:$0xff] %v3955_v39  ;;  %v4022_v62 = vmul.f32 0.5, %v3955_v39  ;;  %v3957_v0 = vmax.f32 %v3918_v60, 0.0  ;;  %4278 = vmatprep.mubr.bf16.mxu1 %v9877_v5  ;;  %4899 = vmatpush1.bf16.msra.mxu1 %v9050_v14  ;;  %v9088_v39 = vld [vmem:[#allocation14 + $0x18c] ss:$16 sps:$4 sm:$0xff]  }
 0x5c6   : > { %3975 = vst [vmem:[%s10771_s20 + $0x68] sm:$0xff] %v3956_v50  ;;  %v4067_v4 = vmul.f32 %v9414_v30, %v4003_v49  ;;  %v4082_v44 = vadd.f32 %v4066_v52, %v3946_v32  ;;  %4900 = vmatprep.subr.bf16.mxu1 %v9058_v6  ;;  %v4004_v32 = vld [vmem:[%s10371_s10 + $0x50] sm:$0xff]  ;;  %v9086_v52 = vld [vmem:[#allocation14 + $0x188] ss:$16 sps:$4 sm:$0xff]  }
 0x5c7   : > { %v4050_v3 = vmul.f32 1.442695, %v4022_v62  ;;  %3991 = vst [vmem:[%s10778_s28 + $0x68] sm:$0xff] %v3957_v0  ;;  %v4023_v38 = vmul.f32 0.5, %v3957_v0  ;;  %v3921_v22 = vpop.f32.mrb[124].mxu1  ;;  %v4008_v49 = vld [vmem:[%s10371_s10 + $0x70] sm:$0xff] }
 0x5c8   : > { %v10926_v15 = vadd.f32 %v3921_v22, %v10756_v59  ;;  %v3923_v63 = vpop.f32.mrb[125].mxu1  ;;  %v4083_v21 = vadd.f32 %v4067_v4, %v3948_v42  ;;  %v9094_v62 = vld [vmem:[#allocation14 + $0x1ac] ss:$16 sps:$4 sm:$0xff]   ;;  %v9095_v22 = vld [vmem:[#allocation14 + $0x1c0] ss:$16 sps:$4 sm:$0xff]  }
 0x5c9   : > { %9419 = vpow2.f32 %v4050_v3  ;;  %v4052_v46 = vmul.f32 1.442695, %v4023_v38  ;;  %v3924_v29 = vadd.f32 %v3923_v63, %v10759_v48  ;;  %v3925_v20 = vpop.f32.mrb[126].mxu1  ;;  %4901 = vmatpush1.bf16.msra.mxu1 %v9056_v2  ;;  %v4009_v2 = vld [vmem:[%s10371_s10 + $0x78] sm:$0xff]  ;;  %v9097_v3 = vld [vmem:[#allocation14 + $0x1c4] ss:$16 sps:$4 sm:$0xff]  }
 0x5ca   : > { %v3958_v58 = vmax.f32 %v10926_v15, 0.0  ;;  %v10934_v33 = vadd.f32 %v3925_v20, %v10756_v59  ;;  %v3927_v7 = vpop.f32.mrb[127].mxu1  ;;  %v4094_v13 = vpack.c.bf16 %v4083_v21, %v4082_v44  ;;  %4902 = vmatprep.subr.bf16.mxu1 %v9064_v1  ;;  %v9100_v38 = vld [vmem:[#allocation14 + $0x1cc] ss:$16 sps:$4 sm:$0xff]   ;;  %v9098_v63 = vld [vmem:[#allocation14 + $0x1c8] ss:$16 sps:$4 sm:$0xff]   ;;  %4801 = vmatprep.subr.bf16.mxu0 %v9097_v3 }
 0x5cb   : > { %v9416_v42 = vpop.eup %9415  ;;  %9421 = vpow2.f32 %v4052_v46  ;;  %v3959_v56 = vmax.f32 %v3924_v29, 0.0  ;;  %v3928_v16 = vadd.f32 %v3927_v7, %v10759_v48  ;;  %4802 = vmatpush1.bf16.msra.mxu0 %v9095_v22  ;;  %v9106_v21 = vld [vmem:[#allocation14 + $0x1ec] ss:$16 sps:$4 sm:$0xff]   ;;  %v9101_v46 = vld [vmem:[#allocation14 + $0x1e0] ss:$16 sps:$4 sm:$0xff]  }
 0x5cc   : > { %3976 = vst [vmem:[%s10771_s20 + $0x70] sm:$0xff] %v3958_v58  ;;  %v3960_v18 = vmax.f32 %v10934_v33, 0.0  ;;  %4279 = vmatmul.mubr.bf16.gmra.mrb[144].mxu1 %v4094_v13  ;;  %v4068_v59 = vmul.f32 %v9416_v42, %v4004_v32  ;;  %v9104_v29 = vld [vmem:[#allocation14 + $0x1e8] ss:$16 sps:$4 sm:$0xff]   ;;  %v9109_v15 = vld [vmem:[#allocation16 + $0x4] ss:$16 sps:$4 sm:$0xff]  }
 0x5cd   : > { %v9418_v19 = vpop.eup %9417  ;;  %3992 = vst [vmem:[%s10778_s28 + $0x70] sm:$0xff] %v3959_v56  ;;  %v4024_v24 = vmul.f32 0.5, %v3959_v56  ;;  %v3961_v45 = vmax.f32 %v3928_v16, 0.0  ;;  %4288 = vmatprep.mubr.bf16.mxu1 %v9877_v5  ;;  %4903 = vmatpush1.bf16.msra.mxu1 %v9062_v23  ;;  %v9112_v20 = vld [vmem:[#allocation16 + $0xc] ss:$16 sps:$4 sm:$0xff]  }
 0x5ce   : > { %3977 = vst [vmem:[%s10771_s20 + $0x78] sm:$0xff] %v3960_v18  ;;  %v4069_v48 = vmul.f32 %v9418_v19, %v4005_v17  ;;  %v4084_v28 = vadd.f32 %v4068_v59, %v3950_v31  ;;  %4904 = vmatprep.subr.bf16.mxu1 %v9070_v61  ;;  %v4007_v31 = vld [vmem:[%s10371_s10 + $0x68] sm:$0xff]  ;;  %s11566_s10 = sld [smem:[#allocation42_spill]]  ;;  %s9878_s20 = smov [#allocation20]  }
 0x5cf   : > { %v4054_v41 = vmul.f32 1.442695, %v4024_v24  ;;  %3993 = vst [vmem:[%s10778_s28 + $0x78] sm:$0xff] %v3961_v45  ;;  %v4025_v34 = vmul.f32 0.5, %v3961_v45  ;;  %v9128_v22 = vld [vmem:[#allocation16 + $0x68] ss:$16 sps:$4 sm:$0xff]  }
 0x5d0   : > { %v4085_v8 = vadd.f32 %v4069_v48, %v3952_v12  ;;  %s9715_s15 = sshll.u32 %s9878_s20, 4  ;;  %s9716_s15 = int_to_ptr.vmem [resolvable:$false] %s9715_s15 }
 0x5d1   : > { %9423 = vpow2.f32 %v4054_v41  ;;  %v4056_v10 = vmul.f32 1.442695, %v4025_v34  ;;  %4905 = vmatpush1.bf16.msra.mxu1 %v9068_v27  ;;  %s9717_s18 = scalar_lea.vmem %s9716_s15, 4096  ;;  %p9718_p4 = scmp.lt.s32.totalorder %s11273_s13, %s9716_s15 }
 0x5d2   : > { %v4095_v14 = vpack.c.bf16 %v4085_v8, %v4084_v28  ;;  %4906 = vmatprep.subr.bf16.mxu1 %v9076_v54  ;;  %v9107_v28 = vld [vmem:[#allocation16] ss:$16 sps:$4 sm:$0xff]   ;;  %v9110_v54 = vld [vmem:[#allocation16 + $0x8] ss:$16 sps:$4 sm:$0xff]   ;;  %v9115_v8 = vld [vmem:[#allocation16 + $0x24] ss:$16 sps:$4 sm:$0xff]  }
 0x5d3   : > { %v9420_v51 = vpop.eup %9419  ;;  %9425 = vpow2.f32 %v4056_v10  ;;  %v9118_v10 = vld [vmem:[#allocation16 + $0x2c] ss:$16 sps:$4 sm:$0xff]  }
 0x5d4   : > { %4289 = vmatmul.mubr.bf16.gmra.mrb[148].mxu1 %v4095_v14  ;;  %v4070_v43 = vmul.f32 %v9420_v51, %v4006_v53  ;;  %v4114_v32 = vld [vmem:[%s11566_s10] sm:$0x3]  ;;  %s9711_s10 = scalar_lea.vmem %s11273_s13, 2048 }
 0x5d5   : > { %v9422_v6 = vpop.eup %9421  ;;  %4298 = vmatprep.mubr.bf16.mxu1 %v9877_v5  ;;  %4907 = vmatpush1.bf16.msra.mxu1 %v9074_v47  ;;  %v10966_v23 = vrot.slane %v4114_v32, %v10496_v55  ;;  %p9712_p0 = scmp.ne.s32.totalorder %s11273_s13, %s9711_s10  ;;  %p9719_p3 = scmp.lt.s32.totalorder %s9717_s18, %s9711_s10 }
 0x5d6   : > { %v4071_v12 = vmul.f32 %v9422_v6, %v4007_v31  ;;  %v4086_v25 = vadd.f32 %v4070_v43, %v3954_v11  ;;  %4908 = vmatprep.subr.bf16.mxu1 %v9082_v40  ;;  %v9113_v31 = vld [vmem:[#allocation16 + $0x20] ss:$16 sps:$4 sm:$0xff]   ;;  %v9116_v43 = vld [vmem:[#allocation16 + $0x28] ss:$16 sps:$4 sm:$0xff]  }
 0x5d7   : > { %p9713_p5 = pnand %p9712_p0, %p11570_p2  ;;  %p9720_p10 = por %p9719_p3, %p9718_p4 }
 0x5d8   : > { %v4087_v60 = vadd.f32 %v4071_v12, %v3956_v50  ;;  %v9121_v12 = vld [vmem:[#allocation16 + $0x44] ss:$16 sps:$4 sm:$0xff]  }
 0x5d9   : > { %4909 = vmatpush1.bf16.msra.mxu1 %v9080_v26  ;;  %p9714_p8 = pneg %p9713_p5 }
 0x5da   : > { %v4096_v30 = vpack.c.bf16 %v4087_v60, %v4086_v25  ;;  %4910 = vmatprep.subr.bf16.mxu1 %v9088_v39  ;;  %v9124_v25 = vld [vmem:[#allocation16 + $0x4c] ss:$16 sps:$4 sm:$0xff]  }
 0x5db   : > { %v9424_v0 = vpop.eup %9423  ;;  %p9721_p1 = pnand %p9720_p10, %p9714_p8 }
 0x5dc   : > { %4299 = vmatmul.mubr.bf16.gmra.mrb[152].mxu1 %v4096_v30  ;;  %v4072_v4 = vmul.f32 %v9424_v0, %v4008_v49  ;;  %v9122_v0 = vld [vmem:[#allocation16 + $0x48] ss:$16 sps:$4 sm:$0xff]  }
 0x5dd   : > { %v9426_v44 = vpop.eup %9425  ;;  %4308 = vmatprep.mubr.bf16.mxu1 %v9877_v5  ;;  %4911 = vmatpush1.bf16.msra.mxu1 %v9086_v52  ;;  %v9103_v5 = vld [vmem:[#allocation14 + $0x1e4] ss:$16 sps:$4 sm:$0xff]  }
 0x5de   : > { %v4073_v11 = vmul.f32 %v9426_v44, %v4009_v2  ;;  %v4088_v37 = vadd.f32 %v4072_v4, %v3958_v58  ;;  %4912 = vmatprep.subr.bf16.mxu1 %v9094_v62  ;;  %4803 = vmatprep.subr.bf16.mxu0 %v9103_v5  ;;  %v10969_v58 = vrot.slane %v4114_v32, %v10504_v57  ;;  %v9119_v62 = vld [vmem:[#allocation16 + $0x40] ss:$16 sps:$4 sm:$0xff]   ;;  %v9127_v44 = vld [vmem:[#allocation16 + $0x64] ss:$16 sps:$4 sm:$0xff]  }
 0x5df   : > { %4804 = vmatpush1.bf16.msra.mxu0 %v9101_v46  ;;  %v9136_v46 = vld [vmem:[#allocation16 + $0x8c] ss:$16 sps:$4 sm:$0xff]  }
 0x5e0   : > { %v4089_v50 = vadd.f32 %v4073_v11, %v3960_v18  ;;  %5885 = vmatprep.subr.bf16.mxu0 %v9109_v15 }
 0x5e1   : > { %4913 = vmatpush1.bf16.msra.mxu1 %v9092_v9  ;;  %v9130_v9 = vld [vmem:[#allocation16 + $0x6c] ss:$16 sps:$4 sm:$0xff]  }
 0x5e2   : > { %v4097_v1 = vpack.c.bf16 %v4089_v50, %v4088_v37  ;;  %4914 = vmatprep.subr.bf16.mxu1 %v9100_v38  ;;  %v9125_v38 = vld [vmem:[#allocation16 + $0x60] ss:$16 sps:$4 sm:$0xff]  }
 0x5e4   : > { %4309 = vmatmul.mubr.bf16.gmra.mrb[156].mxu1 %v4097_v1 }
 0x5e5   : > { %4915 = vmatpush1.bf16.msra.mxu1 %v9098_v63 }
 0x5e6   : > { %4916 = vmatprep.subr.bf16.mxu1 %v9106_v21  ;;  %v9133_v21 = vld [vmem:[#allocation16 + $0x84] ss:$16 sps:$4 sm:$0xff]  }
 0x5e9   : > { %4917 = vmatpush1.bf16.msra.mxu1 %v9104_v29 }
 0x5ea   : > { %6111 = vmatprep.subr.bf16.mxu1 %v9112_v20 }
 0x67f   : > { %v4240_v33 = vpop.f32.mrb[128].mxu1 }
 0x680   : > { %v4241_v7 = vadd.f32 %v4240_v33, %v10966_v23  ;;  %v4242_v13 = vpop.f32.mrb[129].mxu1 }
 0x681   : > { %v4243_v61 = vadd.f32 %v4242_v13, %v10969_v58  ;;  %v4244_v42 = vpop.f32.mrb[130].mxu1  ;;  %v9134_v13 = vld [vmem:[#allocation16 + $0x88] ss:$16 sps:$4 sm:$0xff]  }
 0x682   : > { %v4245_v56 = vadd.f32 %v4244_v42, %v10966_v23  ;;  %v4246_v16 = vpop.f32.mrb[131].mxu1  ;;  %v4319_v18 = vmax.f32 %v4241_v7, 0.0  ;;  %v9131_v7 = vld [vmem:[#allocation16 + $0x80] ss:$16 sps:$4 sm:$0xff]  }
 0x683   : > { %v4247_v17 = vadd.f32 %v4246_v16, %v10969_v58  ;;  %v4320_v19 = vmax.f32 %v4243_v61, 0.0  ;;  %v9142_v16 = vld [vmem:[#allocation16 + $0xac] ss:$16 sps:$4 sm:$0xff]  }
 0x684   : > { %v4321_v59 = vmax.f32 %v4245_v56, 0.0  ;;  %v9139_v56 = vld [vmem:[#allocation16 + $0xa4] ss:$16 sps:$4 sm:$0xff]  }
 0x685   : > { %v4322_v24 = vmax.f32 %v4247_v17, 0.0 }
 0x686   : > { %v4351_v45 = vpack.c.bf16 %v4321_v59, %v4319_v18 }
 0x687   : > { %v4352_v27 = vpack.c.bf16 %v4322_v24, %v4320_v19  ;;  %v4250_v48 = vpop.f32.mrb[132].mxu1 }
 0x688   : > { %v4251_v41 = vadd.f32 %v4250_v48, %v10966_v23  ;;  %v4252_v34 = vpop.f32.mrb[133].mxu1 }
 0x689   : > { %v4253_v53 = vadd.f32 %v4252_v34, %v10969_v58  ;;  %v4254_v47 = vpop.f32.mrb[134].mxu1  ;;  %4805 = vmatprep.mubr.bf16.mxu0 %v4352_v27  ;;  %4918 = vmatprep.mubr.bf16.mxu1 %v4352_v27  ;;  %v9140_v27 = vld [vmem:[#allocation16 + $0xa8] ss:$16 sps:$4 sm:$0xff]  }
 0x68a   : > { %v4255_v14 = vadd.f32 %v4254_v47, %v10966_v23  ;;  %v4256_v40 = vpop.f32.mrb[135].mxu1  ;;  %4806 = vmatmul.mubr.bf16.vlgmr.msra.gmra.mrb[64].mxu0 %v4351_v45  ;;  %4919 = vmatmul.mubr.bf16.vlgmr.msra.gmra.mrb[160].mxu1 %v4351_v45  ;;  %v4323_v6 = vmax.f32 %v4251_v41, 0.0  ;;  %v9137_v45 = vld [vmem:[#allocation16 + $0xa0] ss:$16 sps:$4 sm:$0xff]   ;;  %v9148_v41 = vld [vmem:[#allocation16 + $0xcc] ss:$16 sps:$4 sm:$0xff]  }
 0x68b   : > { %v4257_v51 = vadd.f32 %v4256_v40, %v10969_v58  ;;  %5886 = vmatpush1.bf16.msra.mxu0 %v9107_v28  ;;  %6112 = vmatpush1.bf16.msra.mxu1 %v9110_v54  ;;  %v4324_v39 = vmax.f32 %v4253_v53, 0.0  ;;  %v9145_v54 = vld [vmem:[#allocation16 + $0xc4] ss:$16 sps:$4 sm:$0xff]   ;;  %v9146_v40 = vld [vmem:[#allocation16 + $0xc8] ss:$16 sps:$4 sm:$0xff]  }
 0x68c   : > { %v4325_v26 = vmax.f32 %v4255_v14, 0.0  ;;  %5887 = vmatprep.subr.bf16.mxu0 %v9115_v8  ;;  %6113 = vmatprep.subr.bf16.mxu1 %v9118_v10  ;;  %v9143_v14 = vld [vmem:[#allocation16 + $0xc0] ss:$16 sps:$4 sm:$0xff]  }
 0x68d   : > { %v4326_v60 = vmax.f32 %v4257_v51, 0.0 }
 0x68e   : > { %v4353_v49 = vpack.c.bf16 %v4325_v26, %v4323_v6  ;;  %v9154_v6 = vld [vmem:[#allocation16 + $0xec] ss:$16 sps:$4 sm:$0xff]  }
 0x68f   : > { %v4354_v52 = vpack.c.bf16 %v4326_v60, %v4324_v39  ;;  %v4260_v30 = vpop.f32.mrb[136].mxu1  ;;  %5888 = vmatpush1.bf16.msra.mxu0 %v9113_v31  ;;  %6114 = vmatpush1.bf16.msra.mxu1 %v9116_v43  ;;  %v9151_v43 = vld [vmem:[#allocation16 + $0xe4] ss:$16 sps:$4 sm:$0xff]  }
 0x690   : > { %v4261_v2 = vadd.f32 %v4260_v30, %v10966_v23  ;;  %v4262_v4 = vpop.f32.mrb[137].mxu1  ;;  %5889 = vmatprep.subr.bf16.mxu0 %v9121_v12  ;;  %6115 = vmatprep.subr.bf16.mxu1 %v9124_v25 }
 0x691   : > { %v4263_v11 = vadd.f32 %v4262_v4, %v10969_v58  ;;  %v4264_v37 = vpop.f32.mrb[138].mxu1  ;;  %4815 = vmatprep.mubr.bf16.mxu0 %v4354_v52  ;;  %4928 = vmatprep.mubr.bf16.mxu1 %v4354_v52  ;;  %v9152_v52 = vld [vmem:[#allocation16 + $0xe8] ss:$16 sps:$4 sm:$0xff]  }
 0x692   : > { %v4265_v50 = vadd.f32 %v4264_v37, %v10966_v23  ;;  %v4266_v1 = vpop.f32.mrb[139].mxu1  ;;  %4816 = vmatmul.mubr.bf16.gmra.mrb[68].mxu0 %v4353_v49  ;;  %4929 = vmatmul.mubr.bf16.gmra.mrb[164].mxu1 %v4353_v49  ;;  %v4327_v63 = vmax.f32 %v4261_v2, 0.0  ;;  %v9149_v49 = vld [vmem:[#allocation16 + $0xe0] ss:$16 sps:$4 sm:$0xff]   ;;  %v9160_v2 = vld [vmem:[#allocation16 + $0x10c] ss:$16 sps:$4 sm:$0xff]  }
 0x693   : > { %v4267_v3 = vadd.f32 %v4266_v1, %v10969_v58  ;;  %5890 = vmatpush1.bf16.msra.mxu0 %v9119_v62  ;;  %6116 = vmatpush1.bf16.msra.mxu1 %v9122_v0  ;;  %v4328_v29 = vmax.f32 %v4263_v11, 0.0  ;;  %v9157_v0 = vld [vmem:[#allocation16 + $0x104] ss:$16 sps:$4 sm:$0xff]   ;;  %v9158_v1 = vld [vmem:[#allocation16 + $0x108] ss:$16 sps:$4 sm:$0xff]  }
 0x694   : > { %v4329_v5 = vmax.f32 %v4265_v50, 0.0  ;;  %5891 = vmatprep.subr.bf16.mxu0 %v9127_v44  ;;  %6117 = vmatprep.subr.bf16.mxu1 %v9130_v9  ;;  %v9155_v50 = vld [vmem:[#allocation16 + $0x100] ss:$16 sps:$4 sm:$0xff]  }
 0x695   : > { %v4330_v15 = vmax.f32 %v4267_v3, 0.0 }
 0x696   : > { %v4355_v20 = vpack.c.bf16 %v4329_v5, %v4327_v63  ;;  %v9166_v63 = vld [vmem:[#allocation16 + $0x12c] ss:$16 sps:$4 sm:$0xff]  }
 0x697   : > { %v4356_v32 = vpack.c.bf16 %v4330_v15, %v4328_v29  ;;  %v4270_v33 = vpop.f32.mrb[140].mxu1  ;;  %5892 = vmatpush1.bf16.msra.mxu0 %v9125_v38  ;;  %6118 = vmatpush1.bf16.msra.mxu1 %v9128_v22  ;;  %v9163_v22 = vld [vmem:[#allocation16 + $0x124] ss:$16 sps:$4 sm:$0xff]  }
 0x698   : > { %v4271_v61 = vadd.f32 %v4270_v33, %v10966_v23  ;;  %v4272_v42 = vpop.f32.mrb[141].mxu1  ;;  %5893 = vmatprep.subr.bf16.mxu0 %v9133_v21  ;;  %6119 = vmatprep.subr.bf16.mxu1 %v9136_v46 }
 0x699   : > { %v4273_v17 = vadd.f32 %v4272_v42, %v10969_v58  ;;  %v4274_v18 = vpop.f32.mrb[142].mxu1  ;;  %4825 = vmatprep.mubr.bf16.mxu0 %v4356_v32  ;;  %4938 = vmatprep.mubr.bf16.mxu1 %v4356_v32  ;;  %v9164_v32 = vld [vmem:[#allocation16 + $0x128] ss:$16 sps:$4 sm:$0xff]  }
 0x69a   : > { %v4275_v59 = vadd.f32 %v4274_v18, %v10966_v23  ;;  %v4276_v19 = vpop.f32.mrb[143].mxu1  ;;  %4826 = vmatmul.mubr.bf16.gmra.mrb[72].mxu0 %v4355_v20  ;;  %4939 = vmatmul.mubr.bf16.gmra.mrb[168].mxu1 %v4355_v20  ;;  %v4331_v48 = vmax.f32 %v4271_v61, 0.0  ;;  %v9161_v20 = vld [vmem:[#allocation16 + $0x120] ss:$16 sps:$4 sm:$0xff]   ;;  %v9172_v61 = vld [vmem:[#allocation16 + $0x14c] ss:$16 sps:$4 sm:$0xff]  }
 0x69b   : > { %v4277_v24 = vadd.f32 %v4276_v19, %v10969_v58  ;;  %5894 = vmatpush1.bf16.msra.mxu0 %v9131_v7  ;;  %6120 = vmatpush1.bf16.msra.mxu1 %v9134_v13  ;;  %v4332_v34 = vmax.f32 %v4273_v17, 0.0  ;;  %v9169_v13 = vld [vmem:[#allocation16 + $0x144] ss:$16 sps:$4 sm:$0xff]   ;;  %v9170_v19 = vld [vmem:[#allocation16 + $0x148] ss:$16 sps:$4 sm:$0xff]  }
 0x69c   : > { %v4333_v28 = vmax.f32 %v4275_v59, 0.0  ;;  %5895 = vmatprep.subr.bf16.mxu0 %v9139_v56  ;;  %6121 = vmatprep.subr.bf16.mxu1 %v9142_v16  ;;  %v9167_v59 = vld [vmem:[#allocation16 + $0x140] ss:$16 sps:$4 sm:$0xff]  }
 0x69d   : > { %v4334_v8 = vmax.f32 %v4277_v24, 0.0 }
 0x69e   : > { %v4357_v10 = vpack.c.bf16 %v4333_v28, %v4331_v48  ;;  %v9178_v48 = vld [vmem:[#allocation16 + $0x16c] ss:$16 sps:$4 sm:$0xff]  }
 0x69f   : > { %v4358_v53 = vpack.c.bf16 %v4334_v8, %v4332_v34  ;;  %v4280_v47 = vpop.f32.mrb[144].mxu1  ;;  %5896 = vmatpush1.bf16.msra.mxu0 %v9137_v45  ;;  %6122 = vmatpush1.bf16.msra.mxu1 %v9140_v27  ;;  %v9175_v27 = vld [vmem:[#allocation16 + $0x164] ss:$16 sps:$4 sm:$0xff]  }
 0x6a0   : > { %v4281_v51 = vadd.f32 %v4280_v47, %v10966_v23  ;;  %v4282_v31 = vpop.f32.mrb[145].mxu1  ;;  %5897 = vmatprep.subr.bf16.mxu0 %v9145_v54  ;;  %6123 = vmatprep.subr.bf16.mxu1 %v9148_v41 }
 0x6a1   : > { %v4283_v26 = vadd.f32 %v4282_v31, %v10969_v58  ;;  %v4284_v12 = vpop.f32.mrb[146].mxu1  ;;  %4835 = vmatprep.mubr.bf16.mxu0 %v4358_v53  ;;  %4948 = vmatprep.mubr.bf16.mxu1 %v4358_v53  ;;  %v9176_v53 = vld [vmem:[#allocation16 + $0x168] ss:$16 sps:$4 sm:$0xff]  }
 0x6a2   : > { %v4285_v25 = vadd.f32 %v4284_v12, %v10966_v23  ;;  %v4286_v39 = vpop.f32.mrb[147].mxu1  ;;  %4836 = vmatmul.mubr.bf16.gmra.mrb[76].mxu0 %v4357_v10  ;;  %4949 = vmatmul.mubr.bf16.gmra.mrb[172].mxu1 %v4357_v10  ;;  %v4335_v30 = vmax.f32 %v4281_v51, 0.0  ;;  %v9173_v10 = vld [vmem:[#allocation16 + $0x160] ss:$16 sps:$4 sm:$0xff]   ;;  %v9184_v51 = vld [vmem:[#allocation16 + $0x18c] ss:$16 sps:$4 sm:$0xff]  }
 0x6a3   : > { %v4287_v60 = vadd.f32 %v4286_v39, %v10969_v58  ;;  %5898 = vmatpush1.bf16.msra.mxu0 %v9143_v14  ;;  %6124 = vmatpush1.bf16.msra.mxu1 %v9146_v40  ;;  %v4336_v4 = vmax.f32 %v4283_v26, 0.0  ;;  %v9181_v40 = vld [vmem:[#allocation16 + $0x184] ss:$16 sps:$4 sm:$0xff]   ;;  %v9182_v39 = vld [vmem:[#allocation16 + $0x188] ss:$16 sps:$4 sm:$0xff]  }
 0x6a4   : > { %v4337_v62 = vmax.f32 %v4285_v25, 0.0  ;;  %5899 = vmatprep.subr.bf16.mxu0 %v9151_v43  ;;  %6125 = vmatprep.subr.bf16.mxu1 %v9154_v6  ;;  %v9179_v25 = vld [vmem:[#allocation16 + $0x180] ss:$16 sps:$4 sm:$0xff]  }
 0x6a5   : > { %v4338_v44 = vmax.f32 %v4287_v60, 0.0 }
 0x6a6   : > { %v4359_v9 = vpack.c.bf16 %v4337_v62, %v4335_v30  ;;  %v9190_v30 = vld [vmem:[#allocation16 + $0x1ac] ss:$16 sps:$4 sm:$0xff]  }
 0x6a7   : > { %v4360_v11 = vpack.c.bf16 %v4338_v44, %v4336_v4  ;;  %v4290_v37 = vpop.f32.mrb[148].mxu1  ;;  %5900 = vmatpush1.bf16.msra.mxu0 %v9149_v49  ;;  %6126 = vmatpush1.bf16.msra.mxu1 %v9152_v52  ;;  %v9187_v52 = vld [vmem:[#allocation16 + $0x1a4] ss:$16 sps:$4 sm:$0xff]  }
 0x6a8   : > { %v4291_v3 = vadd.f32 %v4290_v37, %v10966_v23  ;;  %v4292_v38 = vpop.f32.mrb[149].mxu1  ;;  %5901 = vmatprep.subr.bf16.mxu0 %v9157_v0  ;;  %6127 = vmatprep.subr.bf16.mxu1 %v9160_v2 }
 0x6a9   : > { %v4293_v5 = vadd.f32 %v4292_v38, %v10969_v58  ;;  %v4294_v21 = vpop.f32.mrb[150].mxu1  ;;  %4845 = vmatprep.mubr.bf16.mxu0 %v4360_v11  ;;  %4958 = vmatprep.mubr.bf16.mxu1 %v4360_v11  ;;  %v9188_v11 = vld [vmem:[#allocation16 + $0x1a8] ss:$16 sps:$4 sm:$0xff]  }
 0x6aa   : > { %v4295_v46 = vadd.f32 %v4294_v21, %v10966_v23  ;;  %v4296_v29 = vpop.f32.mrb[151].mxu1  ;;  %4846 = vmatmul.mubr.bf16.gmra.mrb[80].mxu0 %v4359_v9  ;;  %4959 = vmatmul.mubr.bf16.gmra.mrb[176].mxu1 %v4359_v9  ;;  %v4339_v33 = vmax.f32 %v4291_v3, 0.0  ;;  %v9185_v9 = vld [vmem:[#allocation16 + $0x1a0] ss:$16 sps:$4 sm:$0xff]   ;;  %v9199_v21 = vld [vmem:[#allocation16 + $0x1e4] ss:$16 sps:$4 sm:$0xff]  }
 0x6ab   : > { %v4297_v15 = vadd.f32 %v4296_v29, %v10969_v58  ;;  %5902 = vmatpush1.bf16.msra.mxu0 %v9155_v50  ;;  %6128 = vmatpush1.bf16.msra.mxu1 %v9158_v1  ;;  %v4340_v42 = vmax.f32 %v4293_v5, 0.0  ;;  %v9194_v5 = vld [vmem:[#allocation16 + $0x1c8] ss:$16 sps:$4 sm:$0xff]   ;;  %v9197_v29 = vld [vmem:[#allocation16 + $0x1e0] ss:$16 sps:$4 sm:$0xff]  }
 0x6ac   : > { %v4341_v7 = vmax.f32 %v4295_v46, 0.0  ;;  %5903 = vmatprep.subr.bf16.mxu0 %v9163_v22  ;;  %6129 = vmatprep.subr.bf16.mxu1 %v9166_v63  ;;  %v9191_v63 = vld [vmem:[#allocation16 + $0x1c0] ss:$16 sps:$4 sm:$0xff]   ;;  %v9202_v46 = vld [vmem:[#allocation16 + $0x1ec] ss:$16 sps:$4 sm:$0xff]  }
 0x6ad   : > { %v4342_v56 = vmax.f32 %v4297_v15, 0.0  ;;  %v9200_v15 = vld [vmem:[#allocation16 + $0x1e8] ss:$16 sps:$4 sm:$0xff]  }
 0x6ae   : > { %v4361_v16 = vpack.c.bf16 %v4341_v7, %v4339_v33  ;;  %v4431_v33 = vld [vmem:[%s11567_s4] sm:$0xf] }
 0x6af   : > { %v4362_v17 = vpack.c.bf16 %v4342_v56, %v4340_v42  ;;  %v4300_v18 = vpop.f32.mrb[152].mxu1  ;;  %5904 = vmatpush1.bf16.msra.mxu0 %v9161_v20  ;;  %6130 = vmatpush1.bf16.msra.mxu1 %v9164_v32  ;;  %v9205_v20 = vld [vmem:[#allocation16 + $0x204] ss:$16 sps:$4 sm:$0xff]   ;;  %v9208_v32 = vld [vmem:[#allocation16 + $0x20c] ss:$16 sps:$4 sm:$0xff]   ;;  %v11007_v7 = vrot.slane %v4431_v33, %v10496_v55  ;;  %v11016_v42 = vrot.slane %v4431_v33, %v10548_v36 }
 0x6b0   : > { %v4301_v24 = vadd.f32 %v4300_v18, %v10966_v23  ;;  %v4302_v45 = vpop.f32.mrb[153].mxu1  ;;  %5905 = vmatprep.subr.bf16.mxu0 %v9169_v13  ;;  %6131 = vmatprep.subr.bf16.mxu1 %v9172_v61  ;;  %v11010_v13 = vrot.slane %v4431_v33, %v10544_v35  ;;  %v11013_v61 = vrot.slane %v4431_v33, %v10504_v57  ;;  %v9220_v33 = vld [vmem:[#allocation16 + $0x24c] ss:$16 sps:$4 sm:$0xff]  }
 0x6b1   : > { %v4303_v28 = vadd.f32 %v4302_v45, %v10969_v58  ;;  %v4304_v54 = vpop.f32.mrb[154].mxu1  ;;  %4855 = vmatprep.mubr.bf16.mxu0 %v4362_v17  ;;  %4968 = vmatprep.mubr.bf16.mxu1 %v4362_v17 }
 0x6b2   : > { %v4305_v41 = vadd.f32 %v4304_v54, %v10966_v23  ;;  %v4306_v34 = vpop.f32.mrb[155].mxu1  ;;  %4856 = vmatmul.mubr.bf16.gmra.mrb[84].mxu0 %v4361_v16  ;;  %4969 = vmatmul.mubr.bf16.gmra.mrb[180].mxu1 %v4361_v16  ;;  %v4343_v47 = vmax.f32 %v4301_v24, 0.0 }
 0x6b3   : > { %v4307_v8 = vadd.f32 %v4306_v34, %v10969_v58  ;;  %5906 = vmatpush1.bf16.msra.mxu0 %v9167_v59  ;;  %6132 = vmatpush1.bf16.msra.mxu1 %v9170_v19  ;;  %v4344_v31 = vmax.f32 %v4303_v28, 0.0 }
 0x6b4   : > { %v4345_v14 = vmax.f32 %v4305_v41, 0.0  ;;  %5907 = vmatprep.subr.bf16.mxu0 %v9175_v27  ;;  %6133 = vmatprep.subr.bf16.mxu1 %v9178_v48 }
 0x6b5   : > { %v4346_v43 = vmax.f32 %v4307_v8, 0.0 }
 0x6b6   : > { %v4363_v6 = vpack.c.bf16 %v4345_v14, %v4343_v47 }
 0x6b7   : > { %v4364_v26 = vpack.c.bf16 %v4346_v43, %v4344_v31  ;;  %v4310_v12 = vpop.f32.mrb[156].mxu1  ;;  %5908 = vmatpush1.bf16.msra.mxu0 %v9173_v10  ;;  %6134 = vmatpush1.bf16.msra.mxu1 %v9176_v53 }
 0x6b8   : > { %v4311_v60 = vadd.f32 %v4310_v12, %v10966_v23  ;;  %v4312_v49 = vpop.f32.mrb[157].mxu1  ;;  %5909 = vmatprep.subr.bf16.mxu0 %v9181_v40  ;;  %6135 = vmatprep.subr.bf16.mxu1 %v9184_v51 }
 0x6b9   : > { %v4313_v62 = vadd.f32 %v4312_v49, %v10969_v58  ;;  %v4314_v0 = vpop.f32.mrb[158].mxu1  ;;  %4865 = vmatprep.mubr.bf16.mxu0 %v4364_v26  ;;  %4978 = vmatprep.mubr.bf16.mxu1 %v4364_v26 }
 0x6ba   : > { %v4315_v2 = vadd.f32 %v4314_v0, %v10966_v23  ;;  %v4316_v4 = vpop.f32.mrb[159].mxu1  ;;  %4866 = vmatmul.mubr.bf16.gmra.mrb[88].mxu0 %v4363_v6  ;;  %4979 = vmatmul.mubr.bf16.gmra.mrb[184].mxu1 %v4363_v6  ;;  %v4347_v37 = vmax.f32 %v4311_v60, 0.0  ;;  %v9193_v23 = vld [vmem:[#allocation16 + $0x1c4] ss:$16 sps:$4 sm:$0xff]  }
 0x6bb   : > { %v4317_v44 = vadd.f32 %v4316_v4, %v10969_v58  ;;  %5910 = vmatpush1.bf16.msra.mxu0 %v9179_v25  ;;  %6136 = vmatpush1.bf16.msra.mxu1 %v9182_v39  ;;  %v4348_v1 = vmax.f32 %v4313_v62, 0.0  ;;  %v9196_v58 = vld [vmem:[#allocation16 + $0x1cc] ss:$16 sps:$4 sm:$0xff]  }
 0x6bc   : > { %v4349_v50 = vmax.f32 %v4315_v2, 0.0  ;;  %5911 = vmatprep.subr.bf16.mxu0 %v9187_v52  ;;  %6137 = vmatprep.subr.bf16.mxu1 %v9190_v30  ;;  %v9203_v52 = vld [vmem:[#allocation16 + $0x200] ss:$16 sps:$4 sm:$0xff]   ;;  %v9206_v30 = vld [vmem:[#allocation16 + $0x208] ss:$16 sps:$4 sm:$0xff]  }
 0x6bd   : > { %v4350_v3 = vmax.f32 %v4317_v44, 0.0  ;;  %v9211_v44 = vld [vmem:[#allocation16 + $0x224] ss:$16 sps:$4 sm:$0xff]  }
 0x6be   : > { %v4365_v38 = vpack.c.bf16 %v4349_v50, %v4347_v37 }
 0x6bf   : > { %v4366_v22 = vpack.c.bf16 %v4350_v3, %v4348_v1  ;;  %5912 = vmatpush1.bf16.msra.mxu0 %v9185_v9  ;;  %6138 = vmatpush1.bf16.msra.mxu1 %v9188_v11  ;;  %v9214_v9 = vld [vmem:[#allocation16 + $0x22c] ss:$16 sps:$4 sm:$0xff]  }
 0x6c0   : > { %5913 = vmatprep.subr.bf16.mxu0 %v9193_v23  ;;  %6139 = vmatprep.subr.bf16.mxu1 %v9196_v58 }
 0x6c1   : > { %4875 = vmatprep.mubr.bf16.mxu0 %v4366_v22  ;;  %4988 = vmatprep.mubr.bf16.mxu1 %v4366_v22 }
 0x6c2   : > { %4876 = vmatmul.mubr.bf16.gmra.mrb[92].mxu0 %v4365_v38  ;;  %4989 = vmatmul.mubr.bf16.gmra.mrb[188].mxu1 %v4365_v38 }
 0x6c3   : > { %5914 = vmatpush1.bf16.msra.mxu0 %v9191_v63  ;;  %6140 = vmatpush1.bf16.msra.mxu1 %v9194_v5  ;;  %v9209_v5 = vld [vmem:[#allocation16 + $0x220] ss:$16 sps:$4 sm:$0xff]  }
 0x6c4   : > { %5915 = vmatprep.subr.bf16.mxu0 %v9199_v21  ;;  %6141 = vmatprep.subr.bf16.mxu1 %v9202_v46  ;;  %v9212_v21 = vld [vmem:[#allocation16 + $0x228] ss:$16 sps:$4 sm:$0xff]   ;;  %v9217_v46 = vld [vmem:[#allocation16 + $0x244] ss:$16 sps:$4 sm:$0xff]  }
 0x6c7   : > { %5916 = vmatpush1.bf16.msra.mxu0 %v9197_v29  ;;  %6142 = vmatpush1.bf16.msra.mxu1 %v9200_v15 }
 0x6c8   : > { %5998 = vmatprep.subr.bf16.mxu0 %v9205_v20  ;;  %6224 = vmatprep.subr.bf16.mxu1 %v9208_v32 }
 0x75d   : > { %v4807_v56 = vpop.f32.mrb[64].mxu0  ;;  %v4920_v16 = vpop.f32.mrb[160].mxu1 }
 0x75e   : > { %v4808_v17 = vadd.f32 %v4807_v56, %v11007_v7  ;;  %v4921_v18 = vadd.f32 %v4920_v16, %v11010_v13  ;;  %v4809_v59 = vpop.f32.mrb[65].mxu0  ;;  %v4922_v19 = vpop.f32.mrb[161].mxu1 }
 0x75f   : > { %v4810_v24 = vadd.f32 %v4809_v59, %v11013_v61  ;;  %v4923_v45 = vadd.f32 %v4922_v19, %v11016_v42  ;;  %v4811_v27 = vpop.f32.mrb[66].mxu0  ;;  %v4924_v48 = vpop.f32.mrb[162].mxu1 }
 0x760   : > { %v4812_v28 = vadd.f32 %v4811_v27, %v11007_v7  ;;  %v4925_v54 = vadd.f32 %v4924_v48, %v11010_v13  ;;  %v4813_v41 = vpop.f32.mrb[67].mxu0  ;;  %v4926_v34 = vpop.f32.mrb[163].mxu1  ;;  %v4999_v53 = vmax.f32 %v4808_v17, 0.0  ;;  %v5001_v47 = vmax.f32 %v4921_v18, 0.0 }
 0x761   : > { %v4814_v8 = vadd.f32 %v4813_v41, %v11013_v61  ;;  %v4927_v10 = vadd.f32 %v4926_v34, %v11016_v42  ;;  %v5000_v51 = vmax.f32 %v4810_v24, 0.0  ;;  %v5002_v31 = vmax.f32 %v4923_v45, 0.0 }
 0x762   : > { %v5003_v14 = vmax.f32 %v4812_v28, 0.0  ;;  %v5005_v40 = vmax.f32 %v4925_v54, 0.0  ;;  %v9215_v28 = vld [vmem:[#allocation16 + $0x240] ss:$16 sps:$4 sm:$0xff]   ;;  %v9218_v54 = vld [vmem:[#allocation16 + $0x248] ss:$16 sps:$4 sm:$0xff]  }
 0x763   : > { %v5004_v43 = vmax.f32 %v4814_v8, 0.0  ;;  %v5006_v6 = vmax.f32 %v4927_v10, 0.0 }
 0x764   : > { %v5063_v26 = vpack.c.bf16 %v5003_v14, %v4999_v53  ;;  %v11026_v12 = vpack.c.bf16 %v5005_v40, %v5001_v47  ;;  %v9223_v53 = vld [vmem:[#allocation16 + $0x264] ss:$16 sps:$4 sm:$0xff]   ;;  %v9226_v47 = vld [vmem:[#allocation16 + $0x26c] ss:$16 sps:$4 sm:$0xff]  }
 0x765   : > { %v5064_v25 = vpack.c.bf16 %v5004_v43, %v5000_v51  ;;  %v11028_v39 = vpack.c.bf16 %v5006_v6, %v5002_v31  ;;  %v4817_v60 = vpop.f32.mrb[68].mxu0  ;;  %v4930_v49 = vpop.f32.mrb[164].mxu1 }
 0x766   : > { %v4818_v62 = vadd.f32 %v4817_v60, %v11007_v7  ;;  %v4931_v0 = vadd.f32 %v4930_v49, %v11010_v13  ;;  %v4819_v2 = vpop.f32.mrb[69].mxu0  ;;  %v4932_v4 = vpop.f32.mrb[165].mxu1 }
 0x767   : > { %v4820_v11 = vadd.f32 %v4819_v2, %v11013_v61  ;;  %v4933_v37 = vadd.f32 %v4932_v4, %v11016_v42  ;;  %v4821_v50 = vpop.f32.mrb[70].mxu0  ;;  %v4934_v1 = vpop.f32.mrb[166].mxu1  ;;  %5917 = vmatprep.mubr.bf16.mxu0 %v5064_v25  ;;  %6143 = vmatprep.mubr.bf16.mxu1 %v5064_v25 }
 0x768   : > { %v4822_v3 = vadd.f32 %v4821_v50, %v11007_v7  ;;  %v4935_v38 = vadd.f32 %v4934_v1, %v11010_v13  ;;  %v4823_v22 = vpop.f32.mrb[71].mxu0  ;;  %v4936_v23 = vpop.f32.mrb[167].mxu1  ;;  %5918 = vmatmul.mubr.bf16.vlgmr.msra.gmra.mrb[96].mxu0 %v5063_v26  ;;  %6144 = vmatmul.mubr.bf16.vlgmr.msra.gmra.mrb[192].mxu1 %v5063_v26  ;;  %v5007_v29 = vmax.f32 %v4818_v62, 0.0  ;;  %v5009_v15 = vmax.f32 %v4931_v0, 0.0  ;;  %v9229_v62 = vld [vmem:[#allocation16 + $0x284] ss:$16 sps:$4 sm:$0xff]  }
 0x769   : > { %v4824_v58 = vadd.f32 %v4823_v22, %v11013_v61  ;;  %v4937_v63 = vadd.f32 %v4936_v23, %v11016_v42  ;;  %5999 = vmatpush1.bf16.msra.mxu0 %v9203_v52  ;;  %6225 = vmatpush1.bf16.msra.mxu1 %v9206_v30  ;;  %v5008_v56 = vmax.f32 %v4820_v11, 0.0  ;;  %v5010_v16 = vmax.f32 %v4933_v37, 0.0  ;;  %v9221_v52 = vld [vmem:[#allocation16 + $0x260] ss:$16 sps:$4 sm:$0xff]   ;;  %v9224_v30 = vld [vmem:[#allocation16 + $0x268] ss:$16 sps:$4 sm:$0xff]  }
 0x76a   : > { %v5011_v20 = vmax.f32 %v4822_v3, 0.0  ;;  %v5013_v32 = vmax.f32 %v4935_v38, 0.0  ;;  %6000 = vmatprep.subr.bf16.mxu0 %v9211_v44  ;;  %6226 = vmatprep.subr.bf16.mxu1 %v9214_v9  ;;  %v9232_v9 = vld [vmem:[#allocation16 + $0x28c] ss:$16 sps:$4 sm:$0xff]  }
 0x76b   : > { %v5012_v17 = vmax.f32 %v4824_v58, 0.0  ;;  %v5014_v18 = vmax.f32 %v4937_v63, 0.0 }
 0x76c   : > { %v5067_v59 = vpack.c.bf16 %v5011_v20, %v5007_v29  ;;  %v11038_v19 = vpack.c.bf16 %v5013_v32, %v5009_v15  ;;  %v9235_v32 = vld [vmem:[#allocation16 + $0x2a4] ss:$16 sps:$4 sm:$0xff]  }
 0x76d   : > { %v5068_v24 = vpack.c.bf16 %v5012_v17, %v5008_v56  ;;  %v11040_v45 = vpack.c.bf16 %v5014_v18, %v5010_v16  ;;  %v4827_v27 = vpop.f32.mrb[72].mxu0  ;;  %v4940_v48 = vpop.f32.mrb[168].mxu1  ;;  %6001 = vmatpush1.bf16.msra.mxu0 %v9209_v5  ;;  %6227 = vmatpush1.bf16.msra.mxu1 %v9212_v21  ;;  %v9227_v5 = vld [vmem:[#allocation16 + $0x280] ss:$16 sps:$4 sm:$0xff]   ;;  %v9230_v21 = vld [vmem:[#allocation16 + $0x288] ss:$16 sps:$4 sm:$0xff]  }
 0x76e   : > { %v4828_v41 = vadd.f32 %v4827_v27, %v11007_v7  ;;  %v4941_v34 = vadd.f32 %v4940_v48, %v11010_v13  ;;  %v4829_v8 = vpop.f32.mrb[73].mxu0  ;;  %v4942_v10 = vpop.f32.mrb[169].mxu1  ;;  %6002 = vmatprep.subr.bf16.mxu0 %v9217_v46  ;;  %6228 = vmatprep.subr.bf16.mxu1 %v9220_v33  ;;  %v9238_v33 = vld [vmem:[#allocation16 + $0x2ac] ss:$16 sps:$4 sm:$0xff]  }
 0x76f   : > { %v4830_v14 = vadd.f32 %v4829_v8, %v11013_v61  ;;  %v4943_v40 = vadd.f32 %v4942_v10, %v11016_v42  ;;  %v4831_v51 = vpop.f32.mrb[74].mxu0  ;;  %v4944_v31 = vpop.f32.mrb[170].mxu1  ;;  %5927 = vmatprep.mubr.bf16.mxu0 %v5068_v24  ;;  %6153 = vmatprep.mubr.bf16.mxu1 %v5068_v24  ;;  %v9241_v8 = vld [vmem:[#allocation16 + $0x2c4] ss:$16 sps:$4 sm:$0xff]  }
 0x770   : > { %v4832_v43 = vadd.f32 %v4831_v51, %v11007_v7  ;;  %v4945_v6 = vadd.f32 %v4944_v31, %v11010_v13  ;;  %v4833_v26 = vpop.f32.mrb[75].mxu0  ;;  %v4946_v25 = vpop.f32.mrb[171].mxu1  ;;  %5928 = vmatmul.mubr.bf16.gmra.mrb[100].mxu0 %v5067_v59  ;;  %6154 = vmatmul.mubr.bf16.gmra.mrb[196].mxu1 %v5067_v59  ;;  %v5015_v0 = vmax.f32 %v4828_v41, 0.0  ;;  %v5017_v2 = vmax.f32 %v4941_v34, 0.0  ;;  %v9233_v41 = vld [vmem:[#allocation16 + $0x2a0] ss:$16 sps:$4 sm:$0xff]  }
 0x771   : > { %v4834_v60 = vadd.f32 %v4833_v26, %v11013_v61  ;;  %v4947_v49 = vadd.f32 %v4946_v25, %v11016_v42  ;;  %6003 = vmatpush1.bf16.msra.mxu0 %v9215_v28  ;;  %6229 = vmatpush1.bf16.msra.mxu1 %v9218_v54  ;;  %v5016_v11 = vmax.f32 %v4830_v14, 0.0  ;;  %v5018_v37 = vmax.f32 %v4943_v40, 0.0  ;;  %v9236_v34 = vld [vmem:[#allocation16 + $0x2a8] ss:$16 sps:$4 sm:$0xff]   ;;  %v9244_v40 = vld [vmem:[#allocation16 + $0x2cc] ss:$16 sps:$4 sm:$0xff]  }
 0x772   : > { %v5019_v4 = vmax.f32 %v4832_v43, 0.0  ;;  %v5021_v44 = vmax.f32 %v4945_v6, 0.0  ;;  %6004 = vmatprep.subr.bf16.mxu0 %v9223_v53  ;;  %6230 = vmatprep.subr.bf16.mxu1 %v9226_v47 }
 0x773   : > { %v5020_v50 = vmax.f32 %v4834_v60, 0.0  ;;  %v5022_v1 = vmax.f32 %v4947_v49, 0.0 }
 0x774   : > { %v5071_v3 = vpack.c.bf16 %v5019_v4, %v5015_v0  ;;  %v11050_v38 = vpack.c.bf16 %v5021_v44, %v5017_v2  ;;  %v9242_v0 = vld [vmem:[#allocation16 + $0x2c8] ss:$16 sps:$4 sm:$0xff]  }
 0x775   : > { %v5072_v22 = vpack.c.bf16 %v5020_v50, %v5016_v11  ;;  %v11052_v23 = vpack.c.bf16 %v5022_v1, %v5018_v37  ;;  %v4837_v58 = vpop.f32.mrb[76].mxu0  ;;  %v4950_v63 = vpop.f32.mrb[172].mxu1  ;;  %6005 = vmatpush1.bf16.msra.mxu0 %v9221_v52  ;;  %6231 = vmatpush1.bf16.msra.mxu1 %v9224_v30  ;;  %v9247_v11 = vld [vmem:[#allocation16 + $0x2e4] ss:$16 sps:$4 sm:$0xff]   ;;  %v9250_v37 = vld [vmem:[#allocation16 + $0x2ec] ss:$16 sps:$4 sm:$0xff]  }
 0x776   : > { %v4838_v46 = vadd.f32 %v4837_v58, %v11007_v7  ;;  %v4951_v29 = vadd.f32 %v4950_v63, %v11010_v13  ;;  %v4839_v15 = vpop.f32.mrb[77].mxu0  ;;  %v4952_v20 = vpop.f32.mrb[173].mxu1  ;;  %6006 = vmatprep.subr.bf16.mxu0 %v9229_v62  ;;  %6232 = vmatprep.subr.bf16.mxu1 %v9232_v9  ;;  %v9239_v62 = vld [vmem:[#allocation16 + $0x2c0] ss:$16 sps:$4 sm:$0xff]  }
 0x777   : > { %v4840_v56 = vadd.f32 %v4839_v15, %v11013_v61  ;;  %v4953_v16 = vadd.f32 %v4952_v20, %v11016_v42  ;;  %v4841_v17 = vpop.f32.mrb[78].mxu0  ;;  %v4954_v18 = vpop.f32.mrb[174].mxu1  ;;  %5937 = vmatprep.mubr.bf16.mxu0 %v5072_v22  ;;  %6163 = vmatprep.mubr.bf16.mxu1 %v5072_v22  ;;  %v9245_v15 = vld [vmem:[#allocation16 + $0x2e0] ss:$16 sps:$4 sm:$0xff]   ;;  %v9248_v20 = vld [vmem:[#allocation16 + $0x2e8] ss:$16 sps:$4 sm:$0xff]  }
 0x778   : > { %v4842_v59 = vadd.f32 %v4841_v17, %v11007_v7  ;;  %v4955_v24 = vadd.f32 %v4954_v18, %v11010_v13  ;;  %v4843_v27 = vpop.f32.mrb[79].mxu0  ;;  %v4956_v48 = vpop.f32.mrb[175].mxu1  ;;  %5938 = vmatmul.mubr.bf16.gmra.mrb[104].mxu0 %v5071_v3  ;;  %6164 = vmatmul.mubr.bf16.gmra.mrb[200].mxu1 %v5071_v3  ;;  %v5023_v10 = vmax.f32 %v4838_v46, 0.0  ;;  %v5025_v53 = vmax.f32 %v4951_v29, 0.0  ;;  %v9256_v18 = vld [vmem:[#allocation16 + $0x30c] ss:$16 sps:$4 sm:$0xff]  }
 0x779   : > { %v4844_v28 = vadd.f32 %v4843_v27, %v11013_v61  ;;  %v4957_v54 = vadd.f32 %v4956_v48, %v11016_v42  ;;  %6007 = vmatpush1.bf16.msra.mxu0 %v9227_v5  ;;  %6233 = vmatpush1.bf16.msra.mxu1 %v9230_v21  ;;  %v5024_v51 = vmax.f32 %v4840_v56, 0.0  ;;  %v5026_v31 = vmax.f32 %v4953_v16, 0.0 }
 0x77a   : > { %v5027_v47 = vmax.f32 %v4842_v59, 0.0  ;;  %v5029_v14 = vmax.f32 %v4955_v24, 0.0  ;;  %6008 = vmatprep.subr.bf16.mxu0 %v9235_v32  ;;  %6234 = vmatprep.subr.bf16.mxu1 %v9238_v33  ;;  %v9253_v32 = vld [vmem:[#allocation16 + $0x304] ss:$16 sps:$4 sm:$0xff]  }
 0x77b   : > { %v5028_v43 = vmax.f32 %v4844_v28, 0.0  ;;  %v5030_v6 = vmax.f32 %v4957_v54, 0.0 }
 0x77c   : > { %v5075_v26 = vpack.c.bf16 %v5027_v47, %v5023_v10  ;;  %v11062_v25 = vpack.c.bf16 %v5029_v14, %v5025_v53  ;;  %v9251_v53 = vld [vmem:[#allocation16 + $0x300] ss:$16 sps:$4 sm:$0xff]   ;;  %v9254_v47 = vld [vmem:[#allocation16 + $0x308] ss:$16 sps:$4 sm:$0xff]  }
 0x77d   : > { %v5076_v60 = vpack.c.bf16 %v5028_v43, %v5024_v51  ;;  %v11064_v49 = vpack.c.bf16 %v5030_v6, %v5026_v31  ;;  %v4847_v52 = vpop.f32.mrb[80].mxu0  ;;  %v4960_v30 = vpop.f32.mrb[176].mxu1  ;;  %6009 = vmatpush1.bf16.msra.mxu0 %v9233_v41  ;;  %6235 = vmatpush1.bf16.msra.mxu1 %v9236_v34  ;;  %v9259_v43 = vld [vmem:[#allocation16 + $0x324] ss:$16 sps:$4 sm:$0xff]   ;;  %v9262_v6 = vld [vmem:[#allocation16 + $0x32c] ss:$16 sps:$4 sm:$0xff]  }
 0x77e   : > { %v4848_v2 = vadd.f32 %v4847_v52, %v11007_v7  ;;  %v4961_v4 = vadd.f32 %v4960_v30, %v11010_v13  ;;  %v4849_v44 = vpop.f32.mrb[81].mxu0  ;;  %v4962_v9 = vpop.f32.mrb[177].mxu1  ;;  %6010 = vmatprep.subr.bf16.mxu0 %v9241_v8  ;;  %6236 = vmatprep.subr.bf16.mxu1 %v9244_v40 }
 0x77f   : > { %v4850_v50 = vadd.f32 %v4849_v44, %v11013_v61  ;;  %v4963_v1 = vadd.f32 %v4962_v9, %v11016_v42  ;;  %v4851_v3 = vpop.f32.mrb[82].mxu0  ;;  %v4964_v22 = vpop.f32.mrb[178].mxu1  ;;  %5947 = vmatprep.mubr.bf16.mxu0 %v5076_v60  ;;  %6173 = vmatprep.mubr.bf16.mxu1 %v5076_v60 }
 0x780   : > { %v4852_v58 = vadd.f32 %v4851_v3, %v11007_v7  ;;  %v4965_v63 = vadd.f32 %v4964_v22, %v11010_v13  ;;  %v4853_v5 = vpop.f32.mrb[83].mxu0  ;;  %v4966_v21 = vpop.f32.mrb[179].mxu1  ;;  %5948 = vmatmul.mubr.bf16.gmra.mrb[108].mxu0 %v5075_v26  ;;  %6174 = vmatmul.mubr.bf16.gmra.mrb[204].mxu1 %v5075_v26  ;;  %v5031_v33 = vmax.f32 %v4848_v2, 0.0  ;;  %v5033_v56 = vmax.f32 %v4961_v4, 0.0 }
 0x781   : > { %v4854_v46 = vadd.f32 %v4853_v5, %v11013_v61  ;;  %v4967_v29 = vadd.f32 %v4966_v21, %v11016_v42  ;;  %6011 = vmatpush1.bf16.msra.mxu0 %v9239_v62  ;;  %6237 = vmatpush1.bf16.msra.mxu1 %v9242_v0  ;;  %v5032_v59 = vmax.f32 %v4850_v50, 0.0  ;;  %v5034_v24 = vmax.f32 %v4963_v1, 0.0  ;;  %v9265_v50 = vld [vmem:[#allocation16 + $0x344] ss:$16 sps:$4 sm:$0xff]  }
 0x782   : > { %v5035_v16 = vmax.f32 %v4852_v58, 0.0  ;;  %v5037_v17 = vmax.f32 %v4965_v63, 0.0  ;;  %6012 = vmatprep.subr.bf16.mxu0 %v9247_v11  ;;  %6238 = vmatprep.subr.bf16.mxu1 %v9250_v37  ;;  %v9257_v11 = vld [vmem:[#allocation16 + $0x320] ss:$16 sps:$4 sm:$0xff]   ;;  %v9260_v37 = vld [vmem:[#allocation16 + $0x328] ss:$16 sps:$4 sm:$0xff]  }
 0x783   : > { %v5036_v27 = vmax.f32 %v4854_v46, 0.0  ;;  %v5038_v48 = vmax.f32 %v4967_v29, 0.0  ;;  %v9268_v63 = vld [vmem:[#allocation16 + $0x34c] ss:$16 sps:$4 sm:$0xff]  }
 0x784   : > { %v5079_v28 = vpack.c.bf16 %v5035_v16, %v5031_v33  ;;  %v11074_v54 = vpack.c.bf16 %v5037_v17, %v5033_v56  ;;  %v9263_v17 = vld [vmem:[#allocation16 + $0x340] ss:$16 sps:$4 sm:$0xff]  }
 0x785   : > { %v5080_v41 = vpack.c.bf16 %v5036_v27, %v5032_v59  ;;  %v11076_v34 = vpack.c.bf16 %v5038_v48, %v5034_v24  ;;  %v4857_v8 = vpop.f32.mrb[84].mxu0  ;;  %v4970_v10 = vpop.f32.mrb[180].mxu1  ;;  %6013 = vmatpush1.bf16.msra.mxu0 %v9245_v15  ;;  %6239 = vmatpush1.bf16.msra.mxu1 %v9248_v20 }
 0x786   : > { %v4858_v14 = vadd.f32 %v4857_v8, %v11007_v7  ;;  %v4971_v40 = vadd.f32 %v4970_v10, %v11010_v13  ;;  %v4859_v51 = vpop.f32.mrb[85].mxu0  ;;  %v4972_v31 = vpop.f32.mrb[181].mxu1  ;;  %6014 = vmatprep.subr.bf16.mxu0 %v9253_v32  ;;  %6240 = vmatprep.subr.bf16.mxu1 %v9256_v18  ;;  %v9266_v18 = vld [vmem:[#allocation16 + $0x348] ss:$16 sps:$4 sm:$0xff]  }
 0x787   : > { %v4860_v26 = vadd.f32 %v4859_v51, %v11013_v61  ;;  %v4973_v60 = vadd.f32 %v4972_v31, %v11016_v42  ;;  %v4861_v52 = vpop.f32.mrb[86].mxu0  ;;  %v4974_v30 = vpop.f32.mrb[182].mxu1  ;;  %5957 = vmatprep.mubr.bf16.mxu0 %v5080_v41  ;;  %6183 = vmatprep.mubr.bf16.mxu1 %v5080_v41  ;;  %v9274_v41 = vld [vmem:[#allocation16 + $0x36c] ss:$16 sps:$4 sm:$0xff]  }
 0x788   : > { %v4862_v62 = vadd.f32 %v4861_v52, %v11007_v7  ;;  %v4975_v0 = vadd.f32 %v4974_v30, %v11010_v13  ;;  %v4863_v2 = vpop.f32.mrb[87].mxu0  ;;  %v4976_v4 = vpop.f32.mrb[183].mxu1  ;;  %5958 = vmatmul.mubr.bf16.gmra.mrb[112].mxu0 %v5079_v28  ;;  %6184 = vmatmul.mubr.bf16.gmra.mrb[208].mxu1 %v5079_v28  ;;  %v5039_v1 = vmax.f32 %v4858_v14, 0.0  ;;  %v5041_v3 = vmax.f32 %v4971_v40, 0.0  ;;  %v9271_v28 = vld [vmem:[#allocation16 + $0x364] ss:$16 sps:$4 sm:$0xff]  }
 0x789   : > { %v4864_v44 = vadd.f32 %v4863_v2, %v11013_v61  ;;  %v4977_v9 = vadd.f32 %v4976_v4, %v11016_v42  ;;  %6015 = vmatpush1.bf16.msra.mxu0 %v9251_v53  ;;  %6241 = vmatpush1.bf16.msra.mxu1 %v9254_v47  ;;  %v5040_v5 = vmax.f32 %v4860_v26, 0.0  ;;  %v5042_v21 = vmax.f32 %v4973_v60, 0.0  ;;  %v9269_v26 = vld [vmem:[#allocation16 + $0x360] ss:$16 sps:$4 sm:$0xff]   ;;  %v9272_v60 = vld [vmem:[#allocation16 + $0x368] ss:$16 sps:$4 sm:$0xff]  }
 0x78a   : > { %v5043_v22 = vmax.f32 %v4862_v62, 0.0  ;;  %v5045_v58 = vmax.f32 %v4975_v0, 0.0  ;;  %6016 = vmatprep.subr.bf16.mxu0 %v9259_v43  ;;  %6242 = vmatprep.subr.bf16.mxu1 %v9262_v6  ;;  %v9277_v52 = vld [vmem:[#allocation16 + $0x384] ss:$16 sps:$4 sm:$0xff]   ;;  %v9280_v4 = vld [vmem:[#allocation16 + $0x38c] ss:$16 sps:$4 sm:$0xff]  }
 0x78b   : > { %v5044_v46 = vmax.f32 %v4864_v44, 0.0  ;;  %v5046_v29 = vmax.f32 %v4977_v9, 0.0 }
 0x78c   : > { %v5083_v15 = vpack.c.bf16 %v5043_v22, %v5039_v1  ;;  %v11086_v20 = vpack.c.bf16 %v5045_v58, %v5041_v3 }
 0x78d   : > { %v5084_v32 = vpack.c.bf16 %v5044_v46, %v5040_v5  ;;  %v11088_v33 = vpack.c.bf16 %v5046_v29, %v5042_v21  ;;  %v4867_v56 = vpop.f32.mrb[88].mxu0  ;;  %v4980_v16 = vpop.f32.mrb[184].mxu1  ;;  %6017 = vmatpush1.bf16.msra.mxu0 %v9257_v11  ;;  %6243 = vmatpush1.bf16.msra.mxu1 %v9260_v37  ;;  %v9275_v5 = vld [vmem:[#allocation16 + $0x380] ss:$16 sps:$4 sm:$0xff]   ;;  %v9278_v21 = vld [vmem:[#allocation16 + $0x388] ss:$16 sps:$4 sm:$0xff]  }
 0x78e   : > { %v4868_v59 = vadd.f32 %v4867_v56, %v11007_v7  ;;  %v4981_v24 = vadd.f32 %v4980_v16, %v11010_v13  ;;  %v4869_v27 = vpop.f32.mrb[89].mxu0  ;;  %v4982_v48 = vpop.f32.mrb[185].mxu1  ;;  %6018 = vmatprep.subr.bf16.mxu0 %v9265_v50  ;;  %6244 = vmatprep.subr.bf16.mxu1 %v9268_v63  ;;  %v9283_v56 = vld [vmem:[#allocation16 + $0x3a4] ss:$16 sps:$4 sm:$0xff]   ;;  %v9286_v16 = vld [vmem:[#allocation16 + $0x3ac] ss:$16 sps:$4 sm:$0xff]  }
 0x78f   : > { %v4870_v8 = vadd.f32 %v4869_v27, %v11013_v61  ;;  %v4983_v10 = vadd.f32 %v4982_v48, %v11016_v42  ;;  %v4871_v53 = vpop.f32.mrb[90].mxu0  ;;  %v4984_v47 = vpop.f32.mrb[186].mxu1  ;;  %5967 = vmatprep.mubr.bf16.mxu0 %v5084_v32  ;;  %6193 = vmatprep.mubr.bf16.mxu1 %v5084_v32 }
 0x790   : > { %v4872_v14 = vadd.f32 %v4871_v53, %v11007_v7  ;;  %v4985_v40 = vadd.f32 %v4984_v47, %v11010_v13  ;;  %v4873_v51 = vpop.f32.mrb[91].mxu0  ;;  %v4986_v31 = vpop.f32.mrb[187].mxu1  ;;  %5968 = vmatmul.mubr.bf16.gmra.mrb[116].mxu0 %v5083_v15  ;;  %6194 = vmatmul.mubr.bf16.gmra.mrb[212].mxu1 %v5083_v15  ;;  %v5047_v30 = vmax.f32 %v4868_v59, 0.0  ;;  %v5049_v62 = vmax.f32 %v4981_v24, 0.0  ;;  %v9281_v53 = vld [vmem:[#allocation16 + $0x3a0] ss:$16 sps:$4 sm:$0xff]  }
 0x791   : > { %v4874_v43 = vadd.f32 %v4873_v51, %v11013_v61  ;;  %v4987_v6 = vadd.f32 %v4986_v31, %v11016_v42  ;;  %6019 = vmatpush1.bf16.msra.mxu0 %v9263_v17  ;;  %6245 = vmatpush1.bf16.msra.mxu1 %v9266_v18  ;;  %v5048_v44 = vmax.f32 %v4870_v8, 0.0  ;;  %v5050_v9 = vmax.f32 %v4983_v10, 0.0  ;;  %v9284_v47 = vld [vmem:[#allocation16 + $0x3a8] ss:$16 sps:$4 sm:$0xff]  }
 0x792   : > { %v5051_v0 = vmax.f32 %v4872_v14, 0.0  ;;  %v5053_v2 = vmax.f32 %v4985_v40, 0.0  ;;  %6020 = vmatprep.subr.bf16.mxu0 %v9271_v28  ;;  %6246 = vmatprep.subr.bf16.mxu1 %v9274_v41  ;;  %v9289_v14 = vld [vmem:[#allocation16 + $0x3c4] ss:$16 sps:$4 sm:$0xff]  }
 0x793   : > { %v5052_v11 = vmax.f32 %v4874_v43, 0.0  ;;  %v5054_v37 = vmax.f32 %v4987_v6, 0.0 }
 0x794   : > { %v5087_v50 = vpack.c.bf16 %v5051_v0, %v5047_v30  ;;  %v11098_v1 = vpack.c.bf16 %v5053_v2, %v5049_v62  ;;  %v9287_v62 = vld [vmem:[#allocation16 + $0x3c0] ss:$16 sps:$4 sm:$0xff]   ;;  %v9290_v0 = vld [vmem:[#allocation16 + $0x3c8] ss:$16 sps:$4 sm:$0xff]   ;;  %v9295_v2 = vld [vmem:[#allocation16 + $0x3e4] ss:$16 sps:$4 sm:$0xff]  }
 0x795   : > { %v5088_v3 = vpack.c.bf16 %v5052_v11, %v5048_v44  ;;  %v11100_v22 = vpack.c.bf16 %v5054_v37, %v5050_v9  ;;  %v4877_v58 = vpop.f32.mrb[92].mxu0  ;;  %v4990_v63 = vpop.f32.mrb[188].mxu1  ;;  %6021 = vmatpush1.bf16.msra.mxu0 %v9269_v26  ;;  %6247 = vmatpush1.bf16.msra.mxu1 %v9272_v60  ;;  %v9293_v44 = vld [vmem:[#allocation16 + $0x3e0] ss:$16 sps:$4 sm:$0xff]   ;;  %v9296_v9 = vld [vmem:[#allocation16 + $0x3e8] ss:$16 sps:$4 sm:$0xff]  }
 0x796   : > { %v4878_v46 = vadd.f32 %v4877_v58, %v11007_v7  ;;  %v4991_v29 = vadd.f32 %v4990_v63, %v11010_v13  ;;  %v4879_v15 = vpop.f32.mrb[93].mxu0  ;;  %v4992_v32 = vpop.f32.mrb[189].mxu1  ;;  %6022 = vmatprep.subr.bf16.mxu0 %v9277_v52  ;;  %6248 = vmatprep.subr.bf16.mxu1 %v9280_v4  ;;  %v9298_v4 = vld [vmem:[#allocation16 + $0x3ec] ss:$16 sps:$4 sm:$0xff]   ;;  %v9299_v37 = vld [vmem:[#allocation17] ss:$8 sps:$4 sm:$0xff]  }
 0x797   : > { %v4880_v17 = vadd.f32 %v4879_v15, %v11013_v61  ;;  %v4993_v18 = vadd.f32 %v4992_v32, %v11016_v42  ;;  %v4881_v59 = vpop.f32.mrb[94].mxu0  ;;  %v4994_v24 = vpop.f32.mrb[190].mxu1  ;;  %5977 = vmatprep.mubr.bf16.mxu0 %v5088_v3  ;;  %6203 = vmatprep.mubr.bf16.mxu1 %v5088_v3  ;;  %v9301_v11 = vld [vmem:[#allocation17 + $0x4] ss:$8 sps:$4 sm:$0xff]   ;;  %v9302_v3 = vld [vmem:[#allocation17 + $0x10] ss:$8 sps:$4 sm:$0xff]  }
 0x798   : > { %v4882_v27 = vadd.f32 %v4881_v59, %v11007_v7  ;;  %v4995_v48 = vadd.f32 %v4994_v24, %v11010_v13  ;;  %v4883_v28 = vpop.f32.mrb[95].mxu0  ;;  %v4996_v41 = vpop.f32.mrb[191].mxu1  ;;  %5978 = vmatmul.mubr.bf16.gmra.mrb[120].mxu0 %v5087_v50  ;;  %6204 = vmatmul.mubr.bf16.gmra.mrb[216].mxu1 %v5087_v50  ;;  %v5055_v40 = vmax.f32 %v4878_v46, 0.0  ;;  %v5057_v51 = vmax.f32 %v4991_v29, 0.0  ;;  %v9292_v7 = vld [vmem:[#allocation16 + $0x3cc] ss:$16 sps:$4 sm:$0xff]  }
 0x799   : > { %v4884_v8 = vadd.f32 %v4883_v28, %v11013_v61  ;;  %v4997_v10 = vadd.f32 %v4996_v41, %v11016_v42  ;;  %6023 = vmatpush1.bf16.msra.mxu0 %v9275_v5  ;;  %6249 = vmatpush1.bf16.msra.mxu1 %v9278_v21  ;;  %v5056_v13 = vmax.f32 %v4880_v17, 0.0  ;;  %v5058_v6 = vmax.f32 %v4993_v18, 0.0  ;;  %v9304_v50 = vld [vmem:[#allocation17 + $0x14] ss:$8 sps:$4 sm:$0xff]   ;;  %v9305_v58 = vld [vmem:[#allocation17 + $0x20] ss:$8 sps:$4 sm:$0xff]  }
 0x79a   : > { %v5059_v31 = vmax.f32 %v4882_v27, 0.0  ;;  %v5061_v43 = vmax.f32 %v4995_v48, 0.0  ;;  %6024 = vmatprep.subr.bf16.mxu0 %v9283_v56  ;;  %6250 = vmatprep.subr.bf16.mxu1 %v9286_v16  ;;  %v9310_v63 = vld [vmem:[#allocation17 + $0x34] ss:$8 sps:$4 sm:$0xff]   ;;  %v9311_v5 = vld [vmem:[#allocation17 + $0x40] ss:$8 sps:$4 sm:$0xff]  }
 0x79b   : > { %v5060_v26 = vmax.f32 %v4884_v8, 0.0  ;;  %v5062_v60 = vmax.f32 %v4997_v10, 0.0  ;;  %v9316_v21 = vld [vmem:[#allocation17 + $0x54] ss:$8 sps:$4 sm:$0xff]   ;;  %v9317_v46 = vld [vmem:[#allocation17 + $0x60] ss:$8 sps:$4 sm:$0xff]  }
 0x79c   : > { %v5091_v52 = vpack.c.bf16 %v5059_v31, %v5055_v40  ;;  %v11110_v61 = vpack.c.bf16 %v5061_v43, %v5057_v51  ;;  %v9322_v29 = vld [vmem:[#allocation17 + $0x74] ss:$8 sps:$4 sm:$0xff]   ;;  %v9323_v15 = vld [vmem:[#allocation17 + $0x80] ss:$8 sps:$4 sm:$0xff]   ;;  %v9344_v27 = vld [vmem:[#allocation17 + $0xf0] ss:$8 sps:$4 sm:$0xff]  }
 0x79d   : > { %v5092_v42 = vpack.c.bf16 %v5060_v26, %v5056_v13  ;;  %v11112_v30 = vpack.c.bf16 %v5062_v60, %v5058_v6  ;;  %6025 = vmatpush1.bf16.msra.mxu0 %v9281_v53  ;;  %6251 = vmatpush1.bf16.msra.mxu1 %v9284_v47  ;;  %v9328_v32 = vld [vmem:[#allocation17 + $0x94] ss:$8 sps:$4 sm:$0xff]   ;;  %v9329_v56 = vld [vmem:[#allocation17 + $0xa0] ss:$8 sps:$4 sm:$0xff]  }
 0x79e   : > { %6026 = vmatprep.subr.bf16.mxu0 %v9289_v14  ;;  %6252 = vmatprep.subr.bf16.mxu1 %v9292_v7  ;;  %v9334_v16 = vld [vmem:[#allocation17 + $0xb4] ss:$8 sps:$4 sm:$0xff]   ;;  %v9335_v17 = vld [vmem:[#allocation17 + $0xc0] ss:$8 sps:$4 sm:$0xff]  }
 0x79f   : > { %5987 = vmatprep.mubr.bf16.mxu0 %v5092_v42  ;;  %6213 = vmatprep.mubr.bf16.mxu1 %v5092_v42  ;;  %v9340_v18 = vld [vmem:[#allocation17 + $0xd4] ss:$8 sps:$4 sm:$0xff]   ;;  %v9341_v59 = vld [vmem:[#allocation17 + $0xe0] ss:$8 sps:$4 sm:$0xff]  }
 0x7a0   : > { %5988 = vmatmul.mubr.bf16.gmra.mrb[124].mxu0 %v5091_v52  ;;  %6214 = vmatmul.mubr.bf16.gmra.mrb[220].mxu1 %v5091_v52  ;;  %v9346_v24 = vld [vmem:[#allocation17 + $0xf4] ss:$8 sps:$4 sm:$0xff]   ;;  %v5223_v48 = vld [vmem:[%s11568_s6] sm:$0xf] }
 0x7a1   : > { %6027 = vmatpush1.bf16.msra.mxu0 %v9287_v62  ;;  %6030 = vmatprep.mubr.bf16.mxu0 %v11028_v39  ;;  %v11150_v28 = vrot.slane %v5223_v48, %v10496_v55  ;;  %v11153_v41 = vrot.slane %v5223_v48, %v10544_v35  ;;  %v11156_v8 = vrot.slane %v5223_v48, %v10504_v57 }
 0x7a2   : > { %6253 = vmatpush1.bf16.msra.mxu1 %v9290_v0  ;;  %6256 = vmatprep.mubr.bf16.mxu1 %v11028_v39  ;;  %v9307_v39 = vld [vmem:[#allocation17 + $0x24] ss:$8 sps:$4 sm:$0xff]   ;;  %v11159_v10 = vrot.slane %v5223_v48, %v10548_v36 }
 0x7a3   : > { %6028 = vmatprep.subr.bf16.mxu0 %v9295_v2  ;;  %6254 = vmatprep.subr.bf16.mxu1 %v9298_v4 }
 0x7a5   : > { %6029 = vmatpush1.bf16.msra.mxu0 %v9293_v44 }
 0x7a6   : > { %6255 = vmatpush1.bf16.msra.mxu1 %v9296_v9  ;;  %6829 = vmatprep.subr.bf16.mxu0 %v9301_v11 }
 0x7a8   : > { %6031 = vmatmul.mubr.bf16.vlgmr.msra.gmra.mrb[96].mxu0 %v11026_v12 }
 0x7a9   : > { %6257 = vmatmul.mubr.bf16.vlgmr.msra.gmra.mrb[192].mxu1 %v11026_v12  ;;  %6040 = vmatprep.mubr.bf16.mxu0 %v11040_v45  ;;  %v9308_v12 = vld [vmem:[#allocation17 + $0x30] ss:$8 sps:$4 sm:$0xff]  }
 0x7aa   : > { %6266 = vmatprep.mubr.bf16.mxu1 %v11040_v45  ;;  %6830 = vmatpush1.bf16.msra.mxu0 %v9299_v37  ;;  %v9313_v45 = vld [vmem:[#allocation17 + $0x44] ss:$8 sps:$4 sm:$0xff]  }
 0x7ab   : > { %6831 = vmatprep.subr.bf16.mxu0 %v9304_v50 }
 0x7ae   : > { %6832 = vmatpush1.bf16.msra.mxu0 %v9302_v3 }
 0x7af   : > { %6833 = vmatprep.subr.bf16.mxu0 %v9307_v39  ;;  %v9347_v39 = vld [vmem:[#allocation17 + $0x100] ss:$8 sps:$4 sm:$0xff]  }
 0x7b0   : > { %6041 = vmatmul.mubr.bf16.gmra.mrb[100].mxu0 %v11038_v19 }
 0x7b1   : > { %6267 = vmatmul.mubr.bf16.gmra.mrb[196].mxu1 %v11038_v19  ;;  %6050 = vmatprep.mubr.bf16.mxu0 %v11052_v23  ;;  %v9314_v19 = vld [vmem:[#allocation17 + $0x50] ss:$8 sps:$4 sm:$0xff]  }
 0x7b2   : > { %6276 = vmatprep.mubr.bf16.mxu1 %v11052_v23  ;;  %6834 = vmatpush1.bf16.msra.mxu0 %v9305_v58  ;;  %v9319_v23 = vld [vmem:[#allocation17 + $0x64] ss:$8 sps:$4 sm:$0xff]  }
 0x7b3   : > { %6835 = vmatprep.subr.bf16.mxu0 %v9310_v63 }
 0x7b6   : > { %6836 = vmatpush1.bf16.msra.mxu0 %v9308_v12 }
 0x7b7   : > { %6837 = vmatprep.subr.bf16.mxu0 %v9313_v45 }
 0x7b8   : > { %6051 = vmatmul.mubr.bf16.gmra.mrb[104].mxu0 %v11050_v38 }
 0x7b9   : > { %6277 = vmatmul.mubr.bf16.gmra.mrb[200].mxu1 %v11050_v38  ;;  %6060 = vmatprep.mubr.bf16.mxu0 %v11064_v49  ;;  %v9320_v38 = vld [vmem:[#allocation17 + $0x70] ss:$8 sps:$4 sm:$0xff]  }
 0x7ba   : > { %6286 = vmatprep.mubr.bf16.mxu1 %v11064_v49  ;;  %6838 = vmatpush1.bf16.msra.mxu0 %v9311_v5  ;;  %v9325_v49 = vld [vmem:[#allocation17 + $0x84] ss:$8 sps:$4 sm:$0xff]   ;;  %v9352_v5 = vld [vmem:[#allocation17 + $0x114] ss:$8 sps:$4 sm:$0xff]  }
 0x7bb   : > { %6839 = vmatprep.subr.bf16.mxu0 %v9316_v21 }
 0x7be   : > { %6840 = vmatpush1.bf16.msra.mxu0 %v9314_v19 }
 0x7bf   : > { %6841 = vmatprep.subr.bf16.mxu0 %v9319_v23 }
 0x7c0   : > { %6061 = vmatmul.mubr.bf16.gmra.mrb[108].mxu0 %v11062_v25 }
 0x7c1   : > { %6287 = vmatmul.mubr.bf16.gmra.mrb[204].mxu1 %v11062_v25  ;;  %6070 = vmatprep.mubr.bf16.mxu0 %v11076_v34  ;;  %v9326_v25 = vld [vmem:[#allocation17 + $0x90] ss:$8 sps:$4 sm:$0xff]  }
 0x7c2   : > { %6296 = vmatprep.mubr.bf16.mxu1 %v11076_v34  ;;  %6842 = vmatpush1.bf16.msra.mxu0 %v9317_v46  ;;  %v9331_v34 = vld [vmem:[#allocation17 + $0xa4] ss:$8 sps:$4 sm:$0xff]  }
 0x7c3   : > { %6843 = vmatprep.subr.bf16.mxu0 %v9322_v29 }
 0x7c6   : > { %6844 = vmatpush1.bf16.msra.mxu0 %v9320_v38 }
 0x7c7   : > { %6845 = vmatprep.subr.bf16.mxu0 %v9325_v49 }
 0x7c8   : > { %6071 = vmatmul.mubr.bf16.gmra.mrb[112].mxu0 %v11074_v54 }
 0x7c9   : > { %6297 = vmatmul.mubr.bf16.gmra.mrb[208].mxu1 %v11074_v54  ;;  %6080 = vmatprep.mubr.bf16.mxu0 %v11088_v33  ;;  %v9332_v54 = vld [vmem:[#allocation17 + $0xb0] ss:$8 sps:$4 sm:$0xff]  }
 0x7ca   : > { %6306 = vmatprep.mubr.bf16.mxu1 %v11088_v33  ;;  %6846 = vmatpush1.bf16.msra.mxu0 %v9323_v15  ;;  %v9337_v33 = vld [vmem:[#allocation17 + $0xc4] ss:$8 sps:$4 sm:$0xff]  }
 0x7cb   : > { %6847 = vmatprep.subr.bf16.mxu0 %v9328_v32 }
 0x7ce   : > { %6848 = vmatpush1.bf16.msra.mxu0 %v9326_v25 }
 0x7cf   : > { %6849 = vmatprep.subr.bf16.mxu0 %v9331_v34 }
 0x7d0   : > { %6081 = vmatmul.mubr.bf16.gmra.mrb[116].mxu0 %v11086_v20 }
 0x7d1   : > { %6307 = vmatmul.mubr.bf16.gmra.mrb[212].mxu1 %v11086_v20  ;;  %6090 = vmatprep.mubr.bf16.mxu0 %v11100_v22  ;;  %v9338_v20 = vld [vmem:[#allocation17 + $0xd0] ss:$8 sps:$4 sm:$0xff]  }
 0x7d2   : > { %6316 = vmatprep.mubr.bf16.mxu1 %v11100_v22  ;;  %6850 = vmatpush1.bf16.msra.mxu0 %v9329_v56  ;;  %v9343_v22 = vld [vmem:[#allocation17 + $0xe4] ss:$8 sps:$4 sm:$0xff]   ;;  %v9350_v56 = vld [vmem:[#allocation17 + $0x110] ss:$8 sps:$4 sm:$0xff]  }
 0x7d3   : > { %6851 = vmatprep.subr.bf16.mxu0 %v9334_v16 }
 0x7d6   : > { %6852 = vmatpush1.bf16.msra.mxu0 %v9332_v54 }
 0x7d7   : > { %6853 = vmatprep.subr.bf16.mxu0 %v9337_v33 }
 0x7d8   : > { %6091 = vmatmul.mubr.bf16.gmra.mrb[120].mxu0 %v11098_v1 }
 0x7d9   : > { %6317 = vmatmul.mubr.bf16.gmra.mrb[216].mxu1 %v11098_v1  ;;  %6100 = vmatprep.mubr.bf16.mxu0 %v11112_v30  ;;  %v9349_v1 = vld [vmem:[#allocation17 + $0x104] ss:$8 sps:$4 sm:$0xff]  }
 0x7da   : > { %6326 = vmatprep.mubr.bf16.mxu1 %v11112_v30  ;;  %6854 = vmatpush1.bf16.msra.mxu0 %v9335_v17  ;;  %v9355_v17 = vld [vmem:[#allocation17 + $0x124] ss:$8 sps:$4 sm:$0xff]  }
 0x7db   : > { %6855 = vmatprep.subr.bf16.mxu0 %v9340_v18 }
 0x7de   : > { %6856 = vmatpush1.bf16.msra.mxu0 %v9338_v20 }
 0x7df   : > { %6857 = vmatprep.subr.bf16.mxu0 %v9343_v22 }
 0x7e0   : > { %6101 = vmatmul.mubr.bf16.gmra.mrb[124].mxu0 %v11110_v61 }
 0x7e1   : > { %6327 = vmatmul.mubr.bf16.gmra.mrb[220].mxu1 %v11110_v61 }
 0x7e2   : > { %6858 = vmatpush1.bf16.msra.mxu0 %v9341_v59 }
 0x7e3   : > { %6859 = vmatprep.subr.bf16.mxu0 %v9346_v24 }
 0x7e6   : > { %6860 = vmatpush1.bf16.msra.mxu0 %v9344_v27 }
 0x7e7   : > { %6942 = vmatprep.subr.bf16.mxu0 %v9349_v1 }
 0x87b   : > { %v6032_v53 = vpop.f32.mrb[96].mxu0 }
 0x87c   : > { %v8116_v47 = vadd.f32 %v6032_v53, %v11150_v28  ;;  %v6258_v14 = vpop.f32.mrb[192].mxu1  ;;  %v6034_v40 = vpop.f32.mrb[97].mxu0 }
 0x87d   : > { %v8148_v51 = vadd.f32 %v6258_v14, %v11153_v41  ;;  %v8117_v31 = vadd.f32 %v6034_v40, %v11156_v8  ;;  %v6260_v43 = vpop.f32.mrb[193].mxu1  ;;  %v6036_v7 = vpop.f32.mrb[98].mxu0  ;;  %v9353_v14 = vld [vmem:[#allocation17 + $0x120] ss:$8 sps:$4 sm:$0xff]  }
 0x87e   : > { %v8149_v35 = vadd.f32 %v6260_v43, %v11159_v10  ;;  %v8118_v13 = vadd.f32 %v6036_v7, %v11150_v28  ;;  %v6262_v6 = vpop.f32.mrb[194].mxu1  ;;  %v6038_v26 = vpop.f32.mrb[99].mxu0  ;;  %v6337_v61 = vmax.f32 %v8116_v47, 0.0  ;;  %v9358_v7 = vld [vmem:[#allocation17 + $0x134] ss:$8 sps:$4 sm:$0xff]  }
 0x87f   : > { %v8150_v36 = vadd.f32 %v6262_v6, %v11153_v41  ;;  %v8119_v60 = vadd.f32 %v6038_v26, %v11156_v8  ;;  %v6264_v52 = vpop.f32.mrb[195].mxu1  ;;  %v6339_v62 = vmax.f32 %v8148_v51, 0.0  ;;  %v6338_v0 = vmax.f32 %v8117_v31, 0.0 }
 0x880   : > { %v6341_v42 = vmax.f32 %v8118_v13, 0.0  ;;  %v8151_v30 = vadd.f32 %v6264_v52, %v11159_v10  ;;  %v6340_v44 = vmax.f32 %v8149_v35, 0.0 }
 0x881   : > { %v6343_v2 = vmax.f32 %v8150_v36, 0.0  ;;  %v6342_v4 = vmax.f32 %v8119_v60, 0.0 }
 0x882   : > { %v6401_v9 = vpack.c.bf16 %v6341_v42, %v6337_v61  ;;  %v6344_v11 = vmax.f32 %v8151_v30, 0.0 }
 0x883   : > { %v11169_v37 = vpack.c.bf16 %v6343_v2, %v6339_v62  ;;  %v6402_v50 = vpack.c.bf16 %v6342_v4, %v6338_v0  ;;  %v6042_v3 = vpop.f32.mrb[100].mxu0  ;;  %v9356_v0 = vld [vmem:[#allocation17 + $0x130] ss:$8 sps:$4 sm:$0xff]  }
 0x884   : > { %v11171_v58 = vpack.c.bf16 %v6344_v11, %v6340_v44  ;;  %v8120_v63 = vadd.f32 %v6042_v3, %v11150_v28  ;;  %v6268_v12 = vpop.f32.mrb[196].mxu1  ;;  %v6044_v45 = vpop.f32.mrb[101].mxu0 }
 0x885   : > { %v8152_v21 = vadd.f32 %v6268_v12, %v11153_v41  ;;  %v8121_v19 = vadd.f32 %v6044_v45, %v11156_v8  ;;  %v6270_v23 = vpop.f32.mrb[197].mxu1  ;;  %v6046_v46 = vpop.f32.mrb[102].mxu0  ;;  %6861 = vmatprep.mubr.bf16.mxu0 %v6402_v50 }
 0x886   : > { %v8153_v29 = vadd.f32 %v6270_v23, %v11159_v10  ;;  %v8122_v38 = vadd.f32 %v6046_v46, %v11150_v28  ;;  %v6272_v49 = vpop.f32.mrb[198].mxu1  ;;  %v6048_v15 = vpop.f32.mrb[103].mxu0  ;;  %6862 = vmatmul.mubr.bf16.vlgmr.msra.gmra.mrb[128].mxu0 %v6401_v9  ;;  %v6345_v16 = vmax.f32 %v8120_v63, 0.0  ;;  %v9361_v9 = vld [vmem:[#allocation17 + $0x144] ss:$8 sps:$4 sm:$0xff]  }
 0x887   : > { %v8154_v32 = vadd.f32 %v6272_v49, %v11153_v41  ;;  %v8123_v25 = vadd.f32 %v6048_v15, %v11156_v8  ;;  %v6274_v34 = vpop.f32.mrb[199].mxu1  ;;  %6943 = vmatpush1.bf16.msra.mxu0 %v9347_v39  ;;  %v6347_v18 = vmax.f32 %v8152_v21, 0.0  ;;  %v6346_v20 = vmax.f32 %v8121_v19, 0.0  ;;  %v9359_v23 = vld [vmem:[#allocation17 + $0x140] ss:$8 sps:$4 sm:$0xff]  }
 0x888   : > { %v6349_v54 = vmax.f32 %v8122_v38, 0.0  ;;  %v8155_v33 = vadd.f32 %v6274_v34, %v11159_v10  ;;  %6944 = vmatprep.subr.bf16.mxu0 %v9352_v5  ;;  %v6348_v24 = vmax.f32 %v8153_v29, 0.0  ;;  %v9364_v15 = vld [vmem:[#allocation17 + $0x154] ss:$8 sps:$4 sm:$0xff]  }
 0x889   : > { %v6351_v22 = vmax.f32 %v8154_v32, 0.0  ;;  %v6350_v59 = vmax.f32 %v8123_v25, 0.0 }
 0x88a   : > { %v6405_v27 = vpack.c.bf16 %v6349_v54, %v6345_v16  ;;  %v6352_v1 = vmax.f32 %v8155_v33, 0.0 }
 0x88b   : > { %v11181_v48 = vpack.c.bf16 %v6351_v22, %v6347_v18  ;;  %v6406_v53 = vpack.c.bf16 %v6350_v59, %v6346_v20  ;;  %v6052_v47 = vpop.f32.mrb[104].mxu0  ;;  %6945 = vmatpush1.bf16.msra.mxu0 %v9350_v56  ;;  %v9362_v59 = vld [vmem:[#allocation17 + $0x150] ss:$8 sps:$4 sm:$0xff]  }
 0x88c   : > { %v11183_v40 = vpack.c.bf16 %v6352_v1, %v6348_v24  ;;  %v8124_v51 = vadd.f32 %v6052_v47, %v11150_v28  ;;  %v6278_v31 = vpop.f32.mrb[200].mxu1  ;;  %v6054_v43 = vpop.f32.mrb[105].mxu0  ;;  %6946 = vmatprep.subr.bf16.mxu0 %v9355_v17 }
 0x88d   : > { %v8156_v35 = vadd.f32 %v6278_v31, %v11153_v41  ;;  %v8125_v13 = vadd.f32 %v6054_v43, %v11156_v8  ;;  %v6280_v6 = vpop.f32.mrb[201].mxu1  ;;  %v6056_v26 = vpop.f32.mrb[106].mxu0  ;;  %6871 = vmatprep.mubr.bf16.mxu0 %v6406_v53  ;;  %v9367_v53 = vld [vmem:[#allocation17 + $0x164] ss:$8 sps:$4 sm:$0xff]  }
 0x88e   : > { %v8157_v36 = vadd.f32 %v6280_v6, %v11159_v10  ;;  %v8126_v60 = vadd.f32 %v6056_v26, %v11150_v28  ;;  %v6282_v52 = vpop.f32.mrb[202].mxu1  ;;  %v6058_v61 = vpop.f32.mrb[107].mxu0  ;;  %6872 = vmatmul.mubr.bf16.gmra.mrb[132].mxu0 %v6405_v27  ;;  %v6353_v2 = vmax.f32 %v8124_v51, 0.0 }
 0x88f   : > { %v8158_v42 = vadd.f32 %v6282_v52, %v11153_v41  ;;  %v8127_v30 = vadd.f32 %v6058_v61, %v11156_v8  ;;  %v6284_v62 = vpop.f32.mrb[203].mxu1  ;;  %6947 = vmatpush1.bf16.msra.mxu0 %v9353_v14  ;;  %v6355_v11 = vmax.f32 %v8156_v35, 0.0  ;;  %v6354_v50 = vmax.f32 %v8125_v13, 0.0 }
 0x890   : > { %v6357_v4 = vmax.f32 %v8126_v60, 0.0  ;;  %v8159_v44 = vadd.f32 %v6284_v62, %v11159_v10  ;;  %6948 = vmatprep.subr.bf16.mxu0 %v9358_v7  ;;  %v6356_v63 = vmax.f32 %v8157_v36, 0.0  ;;  %v9365_v36 = vld [vmem:[#allocation17 + $0x160] ss:$8 sps:$4 sm:$0xff]  }
 0x891   : > { %v6359_v3 = vmax.f32 %v8158_v42, 0.0  ;;  %v6358_v39 = vmax.f32 %v8127_v30, 0.0  ;;  %v9370_v30 = vld [vmem:[#allocation17 + $0x174] ss:$8 sps:$4 sm:$0xff]  }
 0x892   : > { %v6409_v12 = vpack.c.bf16 %v6357_v4, %v6353_v2  ;;  %v6360_v45 = vmax.f32 %v8159_v44, 0.0 }
 0x893   : > { %v11193_v5 = vpack.c.bf16 %v6359_v3, %v6355_v11  ;;  %v6410_v21 = vpack.c.bf16 %v6358_v39, %v6354_v50  ;;  %v6062_v19 = vpop.f32.mrb[108].mxu0  ;;  %6949 = vmatpush1.bf16.msra.mxu0 %v9356_v0 }
 0x894   : > { %v11195_v46 = vpack.c.bf16 %v6360_v45, %v6356_v63  ;;  %v8128_v29 = vadd.f32 %v6062_v19, %v11150_v28  ;;  %v6288_v38 = vpop.f32.mrb[204].mxu1  ;;  %v6064_v49 = vpop.f32.mrb[109].mxu0  ;;  %6950 = vmatprep.subr.bf16.mxu0 %v9361_v9 }
 0x895   : > { %v8160_v32 = vadd.f32 %v6288_v38, %v11153_v41  ;;  %v8129_v25 = vadd.f32 %v6064_v49, %v11156_v8  ;;  %v6290_v34 = vpop.f32.mrb[205].mxu1  ;;  %v6066_v56 = vpop.f32.mrb[110].mxu0  ;;  %6881 = vmatprep.mubr.bf16.mxu0 %v6410_v21 }
 0x896   : > { %v8161_v16 = vadd.f32 %v6290_v34, %v11159_v10  ;;  %v8130_v54 = vadd.f32 %v6066_v56, %v11150_v28  ;;  %v6292_v33 = vpop.f32.mrb[206].mxu1  ;;  %v6068_v17 = vpop.f32.mrb[111].mxu0  ;;  %6882 = vmatmul.mubr.bf16.gmra.mrb[136].mxu0 %v6409_v12  ;;  %v6361_v24 = vmax.f32 %v8128_v29, 0.0  ;;  %v9368_v12 = vld [vmem:[#allocation17 + $0x170] ss:$8 sps:$4 sm:$0xff]  }
 0x897   : > { %v8162_v18 = vadd.f32 %v6292_v33, %v11153_v41  ;;  %v8131_v20 = vadd.f32 %v6068_v17, %v11156_v8  ;;  %v6294_v22 = vpop.f32.mrb[207].mxu1  ;;  %6951 = vmatpush1.bf16.msra.mxu0 %v9359_v23  ;;  %v6363_v47 = vmax.f32 %v8160_v32, 0.0  ;;  %v6362_v14 = vmax.f32 %v8129_v25, 0.0  ;;  %v9373_v23 = vld [vmem:[#allocation17 + $0x184] ss:$8 sps:$4 sm:$0xff]  }
 0x898   : > { %v6365_v27 = vmax.f32 %v8130_v54, 0.0  ;;  %v8163_v1 = vadd.f32 %v6294_v22, %v11159_v10  ;;  %6952 = vmatprep.subr.bf16.mxu0 %v9364_v15  ;;  %v6364_v43 = vmax.f32 %v8161_v16, 0.0  ;;  %v9371_v33 = vld [vmem:[#allocation17 + $0x180] ss:$8 sps:$4 sm:$0xff]  }
 0x899   : > { %v6367_v51 = vmax.f32 %v8162_v18, 0.0  ;;  %v6366_v31 = vmax.f32 %v8131_v20, 0.0 }
 0x89a   : > { %v6413_v7 = vpack.c.bf16 %v6365_v27, %v6361_v24  ;;  %v6368_v35 = vmax.f32 %v8163_v1, 0.0 }
 0x89b   : > { %v11205_v13 = vpack.c.bf16 %v6367_v51, %v6363_v47  ;;  %v6414_v6 = vpack.c.bf16 %v6366_v31, %v6362_v14  ;;  %v6072_v26 = vpop.f32.mrb[112].mxu0  ;;  %6953 = vmatpush1.bf16.msra.mxu0 %v9362_v59  ;;  %v9376_v59 = vld [vmem:[#allocation17 + $0x194] ss:$8 sps:$4 sm:$0xff]  }
 0x89c   : > { %v11207_v60 = vpack.c.bf16 %v6368_v35, %v6364_v43  ;;  %v8132_v52 = vadd.f32 %v6072_v26, %v11150_v28  ;;  %v6298_v61 = vpop.f32.mrb[208].mxu1  ;;  %v6074_v42 = vpop.f32.mrb[113].mxu0  ;;  %6954 = vmatprep.subr.bf16.mxu0 %v9367_v53 }
 0x89d   : > { %v8164_v62 = vadd.f32 %v6298_v61, %v11153_v41  ;;  %v8133_v0 = vadd.f32 %v6074_v42, %v11156_v8  ;;  %v6300_v2 = vpop.f32.mrb[209].mxu1  ;;  %v6076_v4 = vpop.f32.mrb[114].mxu0  ;;  %6891 = vmatprep.mubr.bf16.mxu0 %v6414_v6  ;;  %v9374_v6 = vld [vmem:[#allocation17 + $0x190] ss:$8 sps:$4 sm:$0xff]   ;;  %v9379_v61 = vld [vmem:[#allocation17 + $0x1a4] ss:$8 sps:$4 sm:$0xff]  }
 0x89e   : > { %v8165_v44 = vadd.f32 %v6300_v2, %v11159_v10  ;;  %v8134_v9 = vadd.f32 %v6076_v4, %v11150_v28  ;;  %v6302_v11 = vpop.f32.mrb[210].mxu1  ;;  %v6078_v50 = vpop.f32.mrb[115].mxu0  ;;  %6892 = vmatmul.mubr.bf16.gmra.mrb[140].mxu0 %v6413_v7  ;;  %v6369_v45 = vmax.f32 %v8132_v52, 0.0 }
 0x89f   : > { %v8166_v3 = vadd.f32 %v6302_v11, %v11153_v41  ;;  %v8135_v39 = vadd.f32 %v6078_v50, %v11156_v8  ;;  %v6304_v63 = vpop.f32.mrb[211].mxu1  ;;  %6955 = vmatpush1.bf16.msra.mxu0 %v9365_v36  ;;  %v6371_v29 = vmax.f32 %v8164_v62, 0.0  ;;  %v6370_v38 = vmax.f32 %v8133_v0, 0.0 }
 0x8a0   : > { %v6373_v21 = vmax.f32 %v8134_v9, 0.0  ;;  %v8167_v19 = vadd.f32 %v6304_v63, %v11159_v10  ;;  %6956 = vmatprep.subr.bf16.mxu0 %v9370_v30  ;;  %v6372_v32 = vmax.f32 %v8165_v44, 0.0 }
 0x8a1   : > { %v6375_v49 = vmax.f32 %v8166_v3, 0.0  ;;  %v6374_v15 = vmax.f32 %v8135_v39, 0.0  ;;  %v9377_v3 = vld [vmem:[#allocation17 + $0x1a0] ss:$8 sps:$4 sm:$0xff]  }
 0x8a2   : > { %v6417_v25 = vpack.c.bf16 %v6373_v21, %v6369_v45  ;;  %v6376_v34 = vmax.f32 %v8167_v19, 0.0  ;;  %v9382_v21 = vld [vmem:[#allocation17 + $0x1b4] ss:$8 sps:$4 sm:$0xff]  }
 0x8a3   : > { %v11217_v56 = vpack.c.bf16 %v6375_v49, %v6371_v29  ;;  %v6418_v16 = vpack.c.bf16 %v6374_v15, %v6370_v38  ;;  %v6082_v54 = vpop.f32.mrb[116].mxu0  ;;  %6957 = vmatpush1.bf16.msra.mxu0 %v9368_v12 }
 0x8a4   : > { %v11219_v17 = vpack.c.bf16 %v6376_v34, %v6372_v32  ;;  %v8136_v18 = vadd.f32 %v6082_v54, %v11150_v28  ;;  %v6308_v20 = vpop.f32.mrb[212].mxu1  ;;  %v6084_v22 = vpop.f32.mrb[117].mxu0  ;;  %6958 = vmatprep.subr.bf16.mxu0 %v9373_v23 }
 0x8a5   : > { %v8168_v24 = vadd.f32 %v6308_v20, %v11153_v41  ;;  %v8137_v27 = vadd.f32 %v6084_v22, %v11156_v8  ;;  %v6310_v1 = vpop.f32.mrb[213].mxu1  ;;  %v6086_v53 = vpop.f32.mrb[118].mxu0  ;;  %6901 = vmatprep.mubr.bf16.mxu0 %v6418_v16 }
 0x8a6   : > { %v8169_v47 = vadd.f32 %v6310_v1, %v11159_v10  ;;  %v8138_v14 = vadd.f32 %v6086_v53, %v11150_v28  ;;  %v6312_v51 = vpop.f32.mrb[214].mxu1  ;;  %v6088_v31 = vpop.f32.mrb[119].mxu0  ;;  %6902 = vmatmul.mubr.bf16.gmra.mrb[144].mxu0 %v6417_v25  ;;  %v6377_v26 = vmax.f32 %v8136_v18, 0.0 }
 0x8a7   : > { %v8170_v43 = vadd.f32 %v6312_v51, %v11153_v41  ;;  %v8139_v7 = vadd.f32 %v6088_v31, %v11156_v8  ;;  %v6314_v35 = vpop.f32.mrb[215].mxu1  ;;  %6959 = vmatpush1.bf16.msra.mxu0 %v9371_v33  ;;  %v6379_v42 = vmax.f32 %v8168_v24, 0.0  ;;  %v6378_v30 = vmax.f32 %v8137_v27, 0.0  ;;  %v9380_v33 = vld [vmem:[#allocation17 + $0x1b0] ss:$8 sps:$4 sm:$0xff]  }
 0x8a8   : > { %v6381_v36 = vmax.f32 %v8138_v14, 0.0  ;;  %v8171_v52 = vadd.f32 %v6314_v35, %v11159_v10  ;;  %6960 = vmatprep.subr.bf16.mxu0 %v9376_v59  ;;  %v6380_v2 = vmax.f32 %v8169_v47, 0.0  ;;  %v9385_v59 = vld [vmem:[#allocation17 + $0x1c4] ss:$8 sps:$4 sm:$0xff]   ;;  %v9383_v35 = vld [vmem:[#allocation17 + $0x1c0] ss:$8 sps:$4 sm:$0xff]  }
 0x8a9   : > { %v6383_v62 = vmax.f32 %v8170_v43, 0.0  ;;  %v6382_v0 = vmax.f32 %v8139_v7, 0.0 }
 0x8aa   : > { %v6421_v4 = vpack.c.bf16 %v6381_v36, %v6377_v26  ;;  %v6384_v44 = vmax.f32 %v8171_v52, 0.0 }
 0x8ab   : > { %v11229_v9 = vpack.c.bf16 %v6383_v62, %v6379_v42  ;;  %v6422_v11 = vpack.c.bf16 %v6382_v0, %v6378_v30  ;;  %v6092_v50 = vpop.f32.mrb[120].mxu0  ;;  %6961 = vmatpush1.bf16.msra.mxu0 %v9374_v6 }
 0x8ac   : > { %v11231_v39 = vpack.c.bf16 %v6384_v44, %v6380_v2  ;;  %v8140_v63 = vadd.f32 %v6092_v50, %v11150_v28  ;;  %v6318_v12 = vpop.f32.mrb[216].mxu1  ;;  %v6094_v45 = vpop.f32.mrb[121].mxu0  ;;  %6962 = vmatprep.subr.bf16.mxu0 %v9379_v61  ;;  %v9388_v61 = vld [vmem:[#allocation17 + $0x1d4] ss:$8 sps:$4 sm:$0xff]  }
 0x8ad   : > { %v8172_v19 = vadd.f32 %v6318_v12, %v11153_v41  ;;  %v8141_v23 = vadd.f32 %v6094_v45, %v11156_v8  ;;  %v6320_v29 = vpop.f32.mrb[217].mxu1  ;;  %v6096_v38 = vpop.f32.mrb[122].mxu0  ;;  %6911 = vmatprep.mubr.bf16.mxu0 %v6422_v11  ;;  %v9386_v12 = vld [vmem:[#allocation17 + $0x1d0] ss:$8 sps:$4 sm:$0xff]  }
 0x8ae   : > { %v8173_v49 = vadd.f32 %v6320_v29, %v11159_v10  ;;  %v8142_v15 = vadd.f32 %v6096_v38, %v11150_v28  ;;  %v6322_v32 = vpop.f32.mrb[218].mxu1  ;;  %v6098_v25 = vpop.f32.mrb[123].mxu0  ;;  %6912 = vmatmul.mubr.bf16.gmra.mrb[148].mxu0 %v6421_v4  ;;  %v6385_v18 = vmax.f32 %v8140_v63, 0.0 }
 0x8af   : > { %v8174_v34 = vadd.f32 %v6322_v32, %v11153_v41  ;;  %v8143_v16 = vadd.f32 %v6098_v25, %v11156_v8  ;;  %v6324_v54 = vpop.f32.mrb[219].mxu1  ;;  %6963 = vmatpush1.bf16.msra.mxu0 %v9377_v3  ;;  %v6387_v24 = vmax.f32 %v8172_v19, 0.0  ;;  %v6386_v27 = vmax.f32 %v8141_v23, 0.0  ;;  %v9391_v23 = vld [vmem:[#allocation17 + $0x1e4] ss:$8 sps:$4 sm:$0xff]  }
 0x8b0   : > { %v6389_v20 = vmax.f32 %v8142_v15, 0.0  ;;  %v8175_v22 = vadd.f32 %v6324_v54, %v11159_v10  ;;  %6964 = vmatprep.subr.bf16.mxu0 %v9382_v21  ;;  %v6388_v47 = vmax.f32 %v8173_v49, 0.0  ;;  %v9394_v54 = vld [vmem:[#allocation17 + $0x1f4] ss:$8 sps:$4 sm:$0xff]  }
 0x8b1   : > { %v6391_v1 = vmax.f32 %v8174_v34, 0.0  ;;  %v6390_v53 = vmax.f32 %v8143_v16, 0.0 }
 0x8b2   : > { %v6425_v14 = vpack.c.bf16 %v6389_v20, %v6385_v18  ;;  %v6392_v51 = vmax.f32 %v8175_v22, 0.0 }
 0x8b3   : > { %v11241_v31 = vpack.c.bf16 %v6391_v1, %v6387_v24  ;;  %v6426_v43 = vpack.c.bf16 %v6390_v53, %v6386_v27  ;;  %v6102_v7 = vpop.f32.mrb[124].mxu0  ;;  %6965 = vmatpush1.bf16.msra.mxu0 %v9380_v33 }
 0x8b4   : > { %v6428_v6 = vpack.c.bf16 %v6392_v51, %v6388_v47  ;;  %v8144_v26 = vadd.f32 %v6102_v7, %v11150_v28  ;;  %v6328_v36 = vpop.f32.mrb[220].mxu1  ;;  %v6104_v52 = vpop.f32.mrb[125].mxu0  ;;  %6966 = vmatprep.subr.bf16.mxu0 %v9385_v59 }
 0x8b5   : > { %v8176_v42 = vadd.f32 %v6328_v36, %v11153_v41  ;;  %v8145_v30 = vadd.f32 %v6104_v52, %v11156_v8  ;;  %v6330_v62 = vpop.f32.mrb[221].mxu1  ;;  %v6106_v0 = vpop.f32.mrb[126].mxu0  ;;  %6921 = vmatprep.mubr.bf16.mxu0 %v6426_v43 }
 0x8b6   : > { %v8177_v2 = vadd.f32 %v6330_v62, %v11159_v10  ;;  %v8146_v4 = vadd.f32 %v6106_v0, %v11150_v28  ;;  %v6332_v44 = vpop.f32.mrb[222].mxu1  ;;  %v6108_v11 = vpop.f32.mrb[127].mxu0  ;;  %6922 = vmatmul.mubr.bf16.gmra.mrb[152].mxu0 %v6425_v14  ;;  %v6393_v45 = vmax.f32 %v8144_v26, 0.0 }
 0x8b7   : > { %v8178_v50 = vadd.f32 %v6332_v44, %v11153_v41  ;;  %v8147_v3 = vadd.f32 %v6108_v11, %v11156_v8  ;;  %v6334_v63 = vpop.f32.mrb[223].mxu1  ;;  %6967 = vmatpush1.bf16.msra.mxu0 %v9383_v35  ;;  %v6395_v29 = vmax.f32 %v8176_v42, 0.0  ;;  %v6394_v38 = vmax.f32 %v8145_v30, 0.0  ;;  %v9389_v8 = vld [vmem:[#allocation17 + $0x1e0] ss:$8 sps:$4 sm:$0xff]  }
 0x8b8   : > { %v6397_v21 = vmax.f32 %v8146_v4, 0.0  ;;  %v8179_v19 = vadd.f32 %v6334_v63, %v11159_v10  ;;  %6968 = vmatprep.subr.bf16.mxu0 %v9388_v61  ;;  %v6396_v15 = vmax.f32 %v8177_v2, 0.0  ;;  %v9392_v10 = vld [vmem:[#allocation17 + $0x1f0] ss:$8 sps:$4 sm:$0xff]  }
 0x8b9   : > { %v6399_v49 = vmax.f32 %v8178_v50, 0.0  ;;  %v6398_v28 = vmax.f32 %v8147_v3, 0.0 }
 0x8ba   : > { %v6429_v32 = vpack.c.bf16 %v6397_v21, %v6393_v45  ;;  %v6400_v25 = vmax.f32 %v8179_v19, 0.0 }
 0x8bb   : > { %v6431_v34 = vpack.c.bf16 %v6399_v49, %v6395_v29  ;;  %v6430_v41 = vpack.c.bf16 %v6398_v28, %v6394_v38  ;;  %6969 = vmatpush1.bf16.msra.mxu0 %v9386_v12 }
 0x8bc   : > { %v6432_v16 = vpack.c.bf16 %v6400_v25, %v6396_v15  ;;  %6970 = vmatprep.subr.bf16.mxu0 %v9391_v23 }
 0x8bd   : > { %6931 = vmatprep.mubr.bf16.mxu0 %v6430_v41 }
 0x8be   : > { %6932 = vmatmul.mubr.bf16.gmra.mrb[156].mxu0 %v6429_v32 }
 0x8bf   : > { %6971 = vmatpush1.bf16.msra.mxu0 %v9389_v8  ;;  %6974 = vmatprep.mubr.bf16.mxu0 %v11171_v58 }
 0x8c0   : > { %6972 = vmatprep.subr.bf16.mxu0 %v9394_v54 }
 0x8c3   : > { %6973 = vmatpush1.bf16.msra.mxu0 %v9392_v10 }
 0x8c6   : > { %6975 = vmatmul.mubr.bf16.vlgmr.msra.gmra.mrb[128].mxu0 %v11169_v37 }
 0x8c7   : > { %6984 = vmatprep.mubr.bf16.mxu0 %v11183_v40 }
 0x8ce   : > { %6985 = vmatmul.mubr.bf16.gmra.mrb[132].mxu0 %v11181_v48 }
 0x8cf   : > { %6994 = vmatprep.mubr.bf16.mxu0 %v11195_v46 }
 0x8d6   : > { %6995 = vmatmul.mubr.bf16.gmra.mrb[136].mxu0 %v11193_v5 }
 0x8d7   : > { %7004 = vmatprep.mubr.bf16.mxu0 %v11207_v60 }
 0x8de   : > { %7005 = vmatmul.mubr.bf16.gmra.mrb[140].mxu0 %v11205_v13 }
 0x8df   : > { %7014 = vmatprep.mubr.bf16.mxu0 %v11219_v17 }
 0x8e6   : > { %7015 = vmatmul.mubr.bf16.gmra.mrb[144].mxu0 %v11217_v56 }
 0x8e7   : > { %7024 = vmatprep.mubr.bf16.mxu0 %v11231_v39 }
 0x8ee   : > { %7025 = vmatmul.mubr.bf16.gmra.mrb[148].mxu0 %v11229_v9 }
 0x8ef   : > { %7034 = vmatprep.mubr.bf16.mxu0 %v6428_v6 }
 0x8f6   : > { %7035 = vmatmul.mubr.bf16.gmra.mrb[152].mxu0 %v11241_v31 }
 0x8f7   : > { %7044 = vmatprep.mubr.bf16.mxu0 %v6432_v16 }
 0x8fe   : > { %7045 = vmatmul.mubr.bf16.gmra.mrb[156].mxu0 %v6431_v34 }
 0x8ff   : > { %9724 = shalt.err (!%p9721_p1)
}
 0x900   : > { %s9725_s12 = scalar_lea.hbm %s11271_s26, 2048  ;;  %s9729_s21 = scalar_lea.hbm %s11569_s11, 4096 }
 0x901   : > { %p9726_p11 = scmp.ne.s32.totalorder %s11271_s26, %s9725_s12  ;;  %p9730_p13 = scmp.lt.u32.totalorder %s11271_s26, %s11569_s11 }
 0x902   : > { %p9731_p7 = scmp.lt.u32.totalorder %s9729_s21, %s9725_s12  ;;  %p9733_p0 = scmp.lt.u32.totalorder %s9725_s12, %s11271_s26 }
 0x903   : > { %p9727_p12 = pnand %p9726_p11, %p11570_p2 }
 0x904   : > { %p9732_p9 = por %p9731_p7, %p9730_p13 }
 0x905   : > { %p9728_p6 = pneg %p9727_p12 }
 0x906   : > { %p9734_p5 = por %p9733_p0, %p9732_p9 }
 0x908   : > { %p9735_p8 = pnand %p9734_p5, %p9728_p6 }
 0x90a   : > { %9738 = shalt.err (!%p9735_p8)
}
 0x90b   : > { %s9879_s14 = smov 128   ;;  %s9880_s10 = smov 8  }
 0x90c   : > { %8441 = dma.vmem_to_hbm [thread:$0]  (%p11570_p2), %s11273_s13, 2048, %s11271_s26, %s11277_s25, %s9879_s14, %s9879_s14, %s9880_s10  }
 0x90d   : > { %s11571_s18 = sld [smem:[#allocation50_spill]]  ;;  %s7176_s4 = sshll.u32 %s10778_s28, 4  ;;  %s11312_s4 = int_to_ptr.vmem [resolvable:$true] %s7176_s4 }
 0x90e   : > { %s9739_s0 = scalar_lea.vmem %s11312_s4, 2048  ;;  %s9881_s21 = smov [#allocation22]  }
 0x90f   : > { %p9740_p4 = scmp.ne.s32.totalorder %s11312_s4, %s9739_s0  ;;  %s9743_s6 = sshll.u32 %s9881_s21, 4  ;;  %s9744_s6 = int_to_ptr.vmem [resolvable:$false] %s9743_s6 }
 0x910   : > { %s9745_s13 = scalar_lea.vmem %s9744_s6, 4096  ;;  %p9746_p1 = scmp.lt.s32.totalorder %s11312_s4, %s9744_s6 }
 0x911   : > { %p9741_p3 = pnand %p9740_p4, %p11570_p2  ;;  %p9747_p11 = scmp.lt.s32.totalorder %s9745_s13, %s9739_s0 }
 0x913   : > { %s11309_s12 = scalar_lea.hbm %s11571_s18, %s8018_s9  ;;  %p9742_p10 = pneg %p9741_p3 }
 0x914   : > { %p9748_p12 = por %p9747_p11, %p9746_p1 }
 0x916   : > { %p9749_p6 = pnand %p9748_p12, %p9742_p10 }
 0x918   : > { %9752 = shalt.err (!%p9749_p6)
}
 0x919   : > { %s9753_s28 = scalar_lea.hbm %s11309_s12, 2048  ;;  %s9757_s30 = scalar_lea.hbm %s11571_s18, 4096 }
 0x91a   : > { %p9754_p13 = scmp.ne.s32.totalorder %s11309_s12, %s9753_s28  ;;  %p9758_p0 = scmp.lt.u32.totalorder %s11309_s12, %s11571_s18 }
 0x91b   : > { %p9759_p5 = scmp.lt.u32.totalorder %s9757_s30, %s9753_s28  ;;  %p9761_p4 = scmp.lt.u32.totalorder %s9753_s28, %s11309_s12 }
 0x91c   : > { %p9755_p7 = pnand %p9754_p13, %p11570_p2 }
 0x91d   : > { %p9760_p8 = por %p9759_p5, %p9758_p0 }
 0x91e   : > { %p9756_p9 = pneg %p9755_p7 }
 0x91f   : > { %p9762_p3 = por %p9761_p4, %p9760_p8 }
 0x921   : > { %p9763_p10 = pnand %p9762_p3, %p9756_p9 }
 0x923   : > { %9766 = shalt.err (!%p9763_p10)
}
 0x924   : > { %8442 = dma.vmem_to_hbm [thread:$0]  (%p11570_p2), %s11312_s4, 2048, %s11309_s12, %s11277_s25, %s9879_s14, %s9879_s14, %s9880_s10  }
 0x925   : > { %s11572_s6 = sld [smem:[#allocation47_spill]]  ;;  %s11354_s25 = scalar_lea.vmem [#allocation19], %s7428_s19 }
 0x926   : > { %s8017_s19 = sshll.u32 %s10011_s3, 12  ;;  %s7144_s14 = sshll.u32 %s11354_s25, 4  ;;  %s11420_s14 = int_to_ptr.vmem [resolvable:$true] %s7144_s14 }
 0x927   : > { %s11573_s4 = sld [smem:[#allocation48_spill]]  ;;  %s7120_s3 = scalar_lea.sflag [#allocation4], %s10352_s7 }
 0x928   : > { %s9767_s28 = scalar_lea.vmem %s11420_s14, 4096  ;;  %s9882_s9 = smov [#allocation19]  }
 0x929   : > { %p9768_p1 = scmp.ne.s32.totalorder %s11420_s14, %s9767_s28  ;;  %s9771_s26 = sshll.u32 %s9882_s9, 4  ;;  %s9772_s26 = int_to_ptr.vmem [resolvable:$false] %s9771_s26 }
 0x92a   : > { %s9773_s30 = scalar_lea.vmem %s9772_s26, 8192  ;;  %p9774_p6 = scmp.lt.s32.totalorder %s11420_s14, %s9772_s26 }
 0x92b   : > { %v6497_v37 = vld [vmem:[%s11572_s6] sm:$0x3]  ;;  %p9769_p11 = pnand %p9768_p1, %p11570_p2  ;;  %p9775_p13 = scmp.lt.s32.totalorder %s9773_s30, %s9767_s28 }
 0x92c   : > { %v11343_v58 = vrot.slane %v6497_v37, %v10496_v55  ;;  %v11346_v48 = vrot.slane %v6497_v37, %v10504_v57 }
 0x92d   : > { %s11418_s13 = scalar_lea.hbm %s11573_s4, %s8017_s19  ;;  %p9770_p12 = pneg %p9769_p11 }
 0x92e   : > { %p9776_p7 = por %p9775_p13, %p9774_p6 }
 0x930   : > { %p9777_p9 = pnand %p9776_p7, %p9770_p12 }
 0x999   : > { %v6976_v40 = vpop.f32.mrb[128].mxu0 }
 0x99a   : > { %v8180_v5 = vadd.f32 %v6976_v40, %v11343_v58  ;;  %v6978_v46 = vpop.f32.mrb[129].mxu0 }
 0x99b   : > { %v8181_v13 = vadd.f32 %v6978_v46, %v11346_v48  ;;  %v6980_v60 = vpop.f32.mrb[130].mxu0 }
 0x99c   : > { %v7055_v56 = vmax.f32 %v8180_v5, 0.0  ;;  %v8182_v17 = vadd.f32 %v6980_v60, %v11343_v58  ;;  %v6982_v9 = vpop.f32.mrb[131].mxu0 }
 0x99d   : > { %v7056_v39 = vmax.f32 %v8181_v13, 0.0  ;;  %v8183_v33 = vadd.f32 %v6982_v9, %v11346_v48 }
 0x99e   : > { %7087 = vst [vmem:[%s11354_s25] sm:$0xff] %v7055_v56  ;;  %v7057_v55 = vmax.f32 %v8182_v17, 0.0 }
 0x99f   : > { %7088 = vst [vmem:[%s11354_s25 + $0x8] sm:$0xff] %v7056_v39  ;;  %v7058_v57 = vmax.f32 %v8183_v33, 0.0 }
 0x9a0   : > { %7089 = vst [vmem:[%s11354_s25 + $0x10] sm:$0xff] %v7057_v55 }
 0x9a1   : > { %7090 = vst [vmem:[%s11354_s25 + $0x18] sm:$0xff] %v7058_v57  ;;  %v6986_v18 = vpop.f32.mrb[132].mxu0 }
 0x9a2   : > { %v8184_v20 = vadd.f32 %v6986_v18, %v11343_v58  ;;  %v6988_v22 = vpop.f32.mrb[133].mxu0 }
 0x9a3   : > { %v8185_v59 = vadd.f32 %v6988_v22, %v11346_v48  ;;  %v6990_v24 = vpop.f32.mrb[134].mxu0 }
 0x9a4   : > { %v7059_v27 = vmax.f32 %v8184_v20, 0.0  ;;  %v8186_v1 = vadd.f32 %v6990_v24, %v11343_v58  ;;  %v6992_v53 = vpop.f32.mrb[135].mxu0 }
 0x9a5   : > { %v7060_v47 = vmax.f32 %v8185_v59, 0.0  ;;  %v8187_v14 = vadd.f32 %v6992_v53, %v11346_v48 }
 0x9a6   : > { %7091 = vst [vmem:[%s11354_s25 + $0x20] sm:$0xff] %v7059_v27  ;;  %v7061_v51 = vmax.f32 %v8186_v1, 0.0 }
 0x9a7   : > { %7092 = vst [vmem:[%s11354_s25 + $0x28] sm:$0xff] %v7060_v47  ;;  %v7062_v31 = vmax.f32 %v8187_v14, 0.0 }
 0x9a8   : > { %7093 = vst [vmem:[%s11354_s25 + $0x30] sm:$0xff] %v7061_v51 }
 0x9a9   : > { %7094 = vst [vmem:[%s11354_s25 + $0x38] sm:$0xff] %v7062_v31  ;;  %v6996_v43 = vpop.f32.mrb[136].mxu0 }
 0x9aa   : > { %v8188_v7 = vadd.f32 %v6996_v43, %v11343_v58  ;;  %v6998_v35 = vpop.f32.mrb[137].mxu0 }
 0x9ab   : > { %v8189_v6 = vadd.f32 %v6998_v35, %v11346_v48  ;;  %v7000_v26 = vpop.f32.mrb[138].mxu0 }
 0x9ac   : > { %v7063_v36 = vmax.f32 %v8188_v7, 0.0  ;;  %v8190_v52 = vadd.f32 %v7000_v26, %v11343_v58  ;;  %v7002_v61 = vpop.f32.mrb[139].mxu0 }
 0x9ad   : > { %v7064_v42 = vmax.f32 %v8189_v6, 0.0  ;;  %v8191_v30 = vadd.f32 %v7002_v61, %v11346_v48 }
 0x9ae   : > { %7095 = vst [vmem:[%s11354_s25 + $0x40] sm:$0xff] %v7063_v36  ;;  %v7065_v62 = vmax.f32 %v8190_v52, 0.0 }
 0x9af   : > { %7096 = vst [vmem:[%s11354_s25 + $0x48] sm:$0xff] %v7064_v42  ;;  %v7066_v0 = vmax.f32 %v8191_v30, 0.0 }
 0x9b0   : > { %7097 = vst [vmem:[%s11354_s25 + $0x50] sm:$0xff] %v7065_v62 }
 0x9b1   : > { %7098 = vst [vmem:[%s11354_s25 + $0x58] sm:$0xff] %v7066_v0  ;;  %v7006_v2 = vpop.f32.mrb[140].mxu0 }
 0x9b2   : > { %v8192_v4 = vadd.f32 %v7006_v2, %v11343_v58  ;;  %v7008_v44 = vpop.f32.mrb[141].mxu0 }
 0x9b3   : > { %v8193_v11 = vadd.f32 %v7008_v44, %v11346_v48  ;;  %v7010_v50 = vpop.f32.mrb[142].mxu0 }
 0x9b4   : > { %v7067_v3 = vmax.f32 %v8192_v4, 0.0  ;;  %v8194_v63 = vadd.f32 %v7010_v50, %v11343_v58  ;;  %v7012_v12 = vpop.f32.mrb[143].mxu0 }
 0x9b5   : > { %v7068_v45 = vmax.f32 %v8193_v11, 0.0  ;;  %v8195_v21 = vadd.f32 %v7012_v12, %v11346_v48 }
 0x9b6   : > { %7099 = vst [vmem:[%s11354_s25 + $0x60] sm:$0xff] %v7067_v3  ;;  %v7069_v19 = vmax.f32 %v8194_v63, 0.0 }
 0x9b7   : > { %7100 = vst [vmem:[%s11354_s25 + $0x68] sm:$0xff] %v7068_v45  ;;  %v7070_v23 = vmax.f32 %v8195_v21, 0.0 }
 0x9b8   : > { %7101 = vst [vmem:[%s11354_s25 + $0x70] sm:$0xff] %v7069_v19 }
 0x9b9   : > { %7102 = vst [vmem:[%s11354_s25 + $0x78] sm:$0xff] %v7070_v23  ;;  %v7016_v29 = vpop.f32.mrb[144].mxu0 }
 0x9ba   : > { %v8196_v38 = vadd.f32 %v7016_v29, %v11343_v58  ;;  %v7018_v49 = vpop.f32.mrb[145].mxu0 }
 0x9bb   : > { %v8197_v28 = vadd.f32 %v7018_v49, %v11346_v48  ;;  %v7020_v15 = vpop.f32.mrb[146].mxu0 }
 0x9bc   : > { %v7071_v32 = vmax.f32 %v8196_v38, 0.0  ;;  %v8198_v25 = vadd.f32 %v7020_v15, %v11343_v58  ;;  %v7022_v34 = vpop.f32.mrb[147].mxu0 }
 0x9bd   : > { %v7072_v41 = vmax.f32 %v8197_v28, 0.0  ;;  %v8199_v8 = vadd.f32 %v7022_v34, %v11346_v48 }
 0x9be   : > { %7103 = vst [vmem:[%s11354_s25 + $0x80] sm:$0xff] %v7071_v32  ;;  %v7073_v16 = vmax.f32 %v8198_v25, 0.0 }
 0x9bf   : > { %7104 = vst [vmem:[%s11354_s25 + $0x88] sm:$0xff] %v7072_v41  ;;  %v7074_v54 = vmax.f32 %v8199_v8, 0.0 }
 0x9c0   : > { %7105 = vst [vmem:[%s11354_s25 + $0x90] sm:$0xff] %v7073_v16 }
 0x9c1   : > { %7106 = vst [vmem:[%s11354_s25 + $0x98] sm:$0xff] %v7074_v54  ;;  %v7026_v10 = vpop.f32.mrb[148].mxu0 }
 0x9c2   : > { %v8200_v37 = vadd.f32 %v7026_v10, %v11343_v58  ;;  %v7028_v40 = vpop.f32.mrb[149].mxu0 }
 0x9c3   : > { %v8201_v5 = vadd.f32 %v7028_v40, %v11346_v48  ;;  %v7030_v46 = vpop.f32.mrb[150].mxu0 }
 0x9c4   : > { %v7075_v13 = vmax.f32 %v8200_v37, 0.0  ;;  %v8202_v60 = vadd.f32 %v7030_v46, %v11343_v58  ;;  %v7032_v56 = vpop.f32.mrb[151].mxu0 }
 0x9c5   : > { %v7076_v17 = vmax.f32 %v8201_v5, 0.0  ;;  %v8203_v9 = vadd.f32 %v7032_v56, %v11346_v48 }
 0x9c6   : > { %7107 = vst [vmem:[%s11354_s25 + $0xa0] sm:$0xff] %v7075_v13  ;;  %v7077_v39 = vmax.f32 %v8202_v60, 0.0 }
 0x9c7   : > { %7108 = vst [vmem:[%s11354_s25 + $0xa8] sm:$0xff] %v7076_v17  ;;  %v7078_v33 = vmax.f32 %v8203_v9, 0.0 }
 0x9c8   : > { %7109 = vst [vmem:[%s11354_s25 + $0xb0] sm:$0xff] %v7077_v39 }
 0x9c9   : > { %7110 = vst [vmem:[%s11354_s25 + $0xb8] sm:$0xff] %v7078_v33  ;;  %v7036_v55 = vpop.f32.mrb[152].mxu0 }
 0x9ca   : > { %v8204_v57 = vadd.f32 %v7036_v55, %v11343_v58  ;;  %v7038_v18 = vpop.f32.mrb[153].mxu0 }
 0x9cb   : > { %v8205_v20 = vadd.f32 %v7038_v18, %v11346_v48  ;;  %v7040_v22 = vpop.f32.mrb[154].mxu0 }
 0x9cc   : > { %v7079_v59 = vmax.f32 %v8204_v57, 0.0  ;;  %v8206_v24 = vadd.f32 %v7040_v22, %v11343_v58  ;;  %v7042_v27 = vpop.f32.mrb[155].mxu0 }
 0x9cd   : > { %v7080_v1 = vmax.f32 %v8205_v20, 0.0  ;;  %v8207_v53 = vadd.f32 %v7042_v27, %v11346_v48 }
 0x9ce   : > { %7111 = vst [vmem:[%s11354_s25 + $0xc0] sm:$0xff] %v7079_v59  ;;  %v7081_v47 = vmax.f32 %v8206_v24, 0.0 }
 0x9cf   : > { %7112 = vst [vmem:[%s11354_s25 + $0xc8] sm:$0xff] %v7080_v1  ;;  %v7082_v14 = vmax.f32 %v8207_v53, 0.0 }
 0x9d0   : > { %7113 = vst [vmem:[%s11354_s25 + $0xd0] sm:$0xff] %v7081_v47 }
 0x9d1   : > { %7114 = vst [vmem:[%s11354_s25 + $0xd8] sm:$0xff] %v7082_v14  ;;  %v7046_v51 = vpop.f32.mrb[156].mxu0 }
 0x9d2   : > { %v8208_v31 = vadd.f32 %v7046_v51, %v11343_v58  ;;  %v7048_v43 = vpop.f32.mrb[157].mxu0 }
 0x9d3   : > { %v8209_v7 = vadd.f32 %v7048_v43, %v11346_v48  ;;  %v7050_v35 = vpop.f32.mrb[158].mxu0 }
 0x9d4   : > { %v7083_v6 = vmax.f32 %v8208_v31, 0.0  ;;  %v8210_v26 = vadd.f32 %v7050_v35, %v11343_v58  ;;  %v7052_v36 = vpop.f32.mrb[159].mxu0 }
 0x9d5   : > { %v7084_v52 = vmax.f32 %v8209_v7, 0.0  ;;  %v8211_v61 = vadd.f32 %v7052_v36, %v11346_v48 }
 0x9d6   : > { %7115 = vst [vmem:[%s11354_s25 + $0xe0] sm:$0xff] %v7083_v6  ;;  %v7085_v42 = vmax.f32 %v8210_v26, 0.0 }
 0x9d7   : > { %7116 = vst [vmem:[%s11354_s25 + $0xe8] sm:$0xff] %v7084_v52  ;;  %v7086_v30 = vmax.f32 %v8211_v61, 0.0 }
 0x9d8   : > { %7117 = vst [vmem:[%s11354_s25 + $0xf0] sm:$0xff] %v7085_v42 }
 0x9d9   : > { %7118 = vst [vmem:[%s11354_s25 + $0xf8] sm:$0xff] %v7086_v30 }
 0x9da   : > { %9780 = shalt.err (!%p9777_p9)
}
 0x9db   : > { %s9781_s20 = scalar_lea.hbm %s11418_s13, 4096  ;;  %s9785_s21 = scalar_lea.hbm %s11573_s4, 8192 }
 0x9dc   : > { %p9782_p0 = scmp.ne.s32.totalorder %s11418_s13, %s9781_s20  ;;  %p9786_p4 = scmp.lt.u32.totalorder %s11418_s13, %s11573_s4 }
 0x9dd   : > { %p9787_p3 = scmp.lt.u32.totalorder %s9785_s21, %s9781_s20  ;;  %p9789_p1 = scmp.lt.u32.totalorder %s9781_s20, %s11418_s13 }
 0x9de   : > { %p9783_p5 = pnand %p9782_p0, %p11570_p2 }
 0x9df   : > { %p9788_p10 = por %p9787_p3, %p9786_p4 }
 0x9e0   : > { %p9784_p8 = pneg %p9783_p5 }
 0x9e1   : > { %p9790_p11 = por %p9789_p1, %p9788_p10 }
 0x9e3   : > { %p9791_p12 = pnand %p9790_p11, %p9784_p8 }
 0x9e5   : > { %9794 = shalt.err (!%p9791_p12)
}
 0x9e6   : > { %s9883_s19 = smov 256   ;;  %s9884_s10 = smov 16  }
 0x9e7   : > { %8440 = dma.vmem_to_hbm [thread:$0]  (%p11570_p2), %s11420_s14, 4096, %s11418_s13, %s7120_s3, %s9883_s19, %s9883_s19, %s9884_s10  }
 0x9e8 PF: > { %s7191_s12 = sand.u32 1, %s9849_s1   ;;  %p11574_p6 = scmp.ne.s32.totalorder %s11545_s17, 0 }
 0x9e9   : > { %p11575_p13 = scmp.ge.s32.totalorder %s9861_s24, 2  ;;  %s7192_s28 = scalar_lea.sflag [#allocation4], %s7191_s12 }
 0x9eb   : > { %p8479_p7 = pnand %p11575_p13, %p11574_p6 }
 0x9ed   : > { %9840 = dma.done.wait (!%p8479_p7), %s7192_s28, 4096  }
 0x9ee   : > { %9842 = vsyncadd (!%p8479_p7), %s7192_s28, 4294963200  ;;  %s11576_s9 = sadd.s32 4294967294, %s9861_s24  }
 0x9ef   : > { %s7200_s26 = sand.u32 1, %s11576_s9  }
 0x9f0   : > { %s7201_s30 = scalar_lea.sflag [#allocation21], %s7200_s26 }
 0x9f1   : > { %9844 = dma.done.wait (!%p8479_p7), %s7201_s30, 4096  }
 0x9f2   : > { %9846 = vsyncadd (!%p8479_p7), %s7201_s30, 4294963200  ;;  %p44_p2 = scmp.ge.s32.totalorder %s10222_s27, 4   ;;  %s11577_s1 = smov %s9853_s22 }
 0x9f3   : > { %s11578_s22 = smov %s9857_s23  ;;  %s11579_s23 = smov %s10233_s2 }
 0x9f4   : > { %s11580_s24 = smov %s10222_s27  ;;  %46 = sbr.rel (!%p44_p2) target bundleno = 33 (0x21), region = 214 }
 0x9fb   :  { %7215 = vsyncpa [#allocation3], 1 }
 0x9fc   :  { %7217 = vsyncpa [#allocation3 + $0x1], 1 }
 0x9fd   :  { %7218 = vsyncpa [#allocation6], 1 }
 0x9fe   :  { %7220 = vsyncpa [#allocation6 + $0x1], 1 }
 0x9ff   :  { %7221 = vsyncpa [#allocation9], 1 }
 0xa00   :  { %7222 = vsyncpa [#allocation12], 1 }
 0xa01   :  { %7223 = vsyncpa [#allocation15], 1 }
 0xa02   :  { %7224 = vsyncpa [#allocation18], 1 }
 0xa03   :  { %7225 = vsyncpa [#allocation4], 1 }
 0xa04   :  { %7227 = vsyncpa [#allocation4 + $0x1], 1 }
 0xa05   :  { %7228 = vsyncpa [#allocation21], 1 }
 0xa06   :  { %7230 = vsyncpa [#allocation21 + $0x1], 1 }

</bundles_post_ra>
